<compile_context>
chip_gen: v6e
topology: v6e:2x2x1
jax: 0.10.0
libtpu: 0.0.40
codegen_flags: <defaults>
</compile_context>

<pallas_src>
import math

import jax
import jax.numpy as jnp
import numpy as np
from jax.experimental import pallas as pl
from jax.experimental.pallas import tpu as pltpu


def _round_up(v, m):
    return (v + m - 1) // m * m


def _vmem_estimate(tb, bb, L, H, Hp, w_bytes, single_buffer_weights):
    """Rough per-call VMEM footprint (bytes) for block-size selection."""
    Lm1 = max(L - 1, 1)
    wfac = 1 if single_buffer_weights else 2
    return (2 * tb * bb * Hp * 4            # xp input (double-buffered)
            + 2 * tb * L * bb * H * 4       # states output (double-buffered)
            + 2 * tb * bb * H * 4           # outputs output (double-buffered)
            + wfac * (L + Lm1) * Hp * Hp * w_bytes   # recurrent + input weights
            + wfac * Lm1 * Hp * 4                    # folded biases
            + L * bb * Hp * 4)                       # hidden-carry scratch


def make_self_rnn_kernel(num_layers, time_block, batch_block, H, Hp,
                         param_dtype, activation):
    L, Tt, bb = num_layers, time_block, batch_block
    cdt = param_dtype
    if activation == "tanh":
        act = jnp.tanh
    elif activation == "relu":
        act = lambda v: jnp.maximum(v, 0.0)
    else:
        raise NotImplementedError(activation)

    def kernel(xp_ref, whh_ref, wih_ref, b_ref, states_ref, out_ref, h_ref):
        # xp_ref:     (Tt, bb, Hp)        hoisted layer-0 pre-activation x@Wih0+b0 (f32)
        # whh_ref:    (L, Hp, Hp)         recurrent weights, all layers (param_dtype)
        # wih_ref:    (max(L-1,1),Hp,Hp)  input weights for layers >= 1 (param_dtype)
        # b_ref:      (max(L-1,1),1,Hp)   folded b_ih+b_hh for layers >= 1 (f32)
        # states_ref: (Tt, L, bb, H)      per-(step, layer) hidden states (output, f32)
        # out_ref:    (Tt, bb, H)         last-layer hidden per step (output, f32)
        # h_ref:      (L, bb, Hp)         hidden carry across time chunks (scratch, f32)
        t_chunk = pl.program_id(1)

        # hx = None -> zero initial hidden state (get_zero_states), per batch block.
        @pl.when(t_chunk == 0)
        def _init():
            h_ref[...] = jnp.zeros_like(h_ref)

        # Hidden carry in locals for the whole chunk (one load here, one store
        # at the end) — removes a VMEM store->load round trip from the serial chain.
        h = [h_ref[i] for i in range(L)]
        # Loop-invariant bias broadcasts hoisted out of the time unroll.
        b = [jnp.broadcast_to(b_ref[i - 1], (bb, Hp)) for i in range(1, L)]

        for s in range(Tt):                 # static unroll over time steps in chunk
            # Layer 0: input projection hoisted out of the recurrence (xp).
            pre = xp_ref[s] + jnp.dot(h[0].astype(cdt), whh_ref[0],
                                      preferred_element_type=jnp.float32)
            nh = act(pre)
            h[0] = nh
            states_ref[s, 0] = nh[:, :H]
            inp = nh
            for i in range(1, L):           # static unroll over layers
                pre = (jnp.dot(inp.astype(cdt), wih_ref[i - 1],
                               preferred_element_type=jnp.float32)
                       + jnp.dot(h[i].astype(cdt), whh_ref[i],
                                 preferred_element_type=jnp.float32)
                       + b[i - 1])
                nh = act(pre)
                h[i] = nh
                states_ref[s, i] = nh[:, :H]
                inp = nh
            out_ref[s] = inp[:, :H]         # last layer's hidden = per-step output

        # Write the hidden carry back once per chunk.
        for i in range(L):
            h_ref[i] = h[i]

    return kernel


def self_rnn_forward(x, w_ih, w_hh, b_ih, b_hh, *, time_block=8, batch_block=None,
                     param_dtype=jnp.bfloat16, activation="tanh",
                     vmem_budget_bytes=40 * 1024 * 1024):
    """x: (T, B, input_size) f32.
    w_ih: list of L arrays pre-transposed to (in_i, H).
    w_hh: list of L arrays pre-transposed to (H, H).
    b_ih, b_hh: (L, 1, H) f32.
    Returns (outputs (T, B, H), all_states (T*L, B, H))."""
    T, B, _ = x.shape
    L = len(w_ih)
    H = w_hh[0].shape[0]
    Hp = _round_up(H, 128)               # lane-dense hidden width for the matmuls
    f32 = jnp.float32
    w_bytes = jnp.dtype(param_dtype).itemsize

    # --- batch block (megacore sharding on v7x: 2 TensorCores) ---
    if batch_block is None:
        bb = B // 2 if (B >= 16 and (B // 2) % 8 == 0) else B
    else:
        bb = batch_block
    assert B % bb == 0 and (bb == B or bb % 8 == 0), (
        "batch_block must divide B and be a multiple of 8 (f32 sublane) unless == B")

    # --- time block: fit the VMEM budget; pad T instead of degrading to tb=1 ---
    tb = max(1, min(time_block, T))
    while tb > 1 and _vmem_estimate(tb, bb, L, H, Hp, w_bytes, True) > vmem_budget_bytes:
        tb = max(1, tb // 2)
    Tp = _round_up(T, tb)

    # ---- parameter / input prep (outside the serial recurrence) ----
    # Hoisted layer-0 projection: one big lane/row-dense matmul, folded bias.
    b0 = (b_ih[0, 0] + b_hh[0, 0]).astype(f32)                       # (H,)
    xp = jnp.einsum("tbi,ih->tbh", x.astype(f32), w_ih[0].astype(f32)) + b0
    xp = jnp.pad(xp, ((0, Tp - T), (0, 0), (0, Hp - H))).astype(f32)  # (Tp, B, Hp)

    # Recurrent weights for all layers (padding rows/cols are exactly zero, so
    # padded hidden lanes stay exactly 0 even in bf16).
    whh_all = jnp.stack(
        [jnp.pad(w_hh[i], ((0, Hp - H), (0, Hp - H))) for i in range(L)], 0
    ).astype(param_dtype)                                            # (L, Hp, Hp)

    Lm1 = max(L - 1, 1)
    if L > 1:
        wih_rest = jnp.stack(
            [jnp.pad(w_ih[i], ((0, Hp - H), (0, Hp - H))) for i in range(1, L)], 0
        ).astype(param_dtype)                                        # (L-1, Hp, Hp)
        b_rest = jnp.stack(
            [jnp.pad(b_ih[i, 0] + b_hh[i, 0], (0, Hp - H)) for i in range(1, L)], 0
        ).reshape(Lm1, 1, Hp).astype(f32)                            # (L-1, 1, Hp)
    else:
        # Never read; keep them at the minimal (8,128) tile so no real DMA/VMEM.
        wih_rest = jnp.zeros((1, 8, 128), param_dtype)
        b_rest = jnp.zeros((1, 1, 128), f32)

    kernel = make_self_rnn_kernel(L, tb, bb, H, Hp, param_dtype, activation)

    grid = (B // bb, Tp // tb)
    est = _vmem_estimate(tb, bb, L, H, Hp, w_bytes, True)
    vmem_limit = int(min(max(3 * est, 16 * 1024 * 1024), 60 * 1024 * 1024))

    def run(single_buffer_weights):
        def wspec(shape):
            idx = lambda b, t: (0,) * len(shape)
            if single_buffer_weights:
                # Constant index map -> single buffer is enough; halves weight VMEM.
                return pl.BlockSpec(shape, idx, pipeline_mode=pl.Buffered(1))
            return pl.BlockSpec(shape, idx)

        in_specs = [
            pl.BlockSpec((tb, bb, Hp), lambda b, t: (t, b, 0)),      # xp
            wspec(tuple(whh_all.shape)),                             # recurrent W
            wspec(tuple(wih_rest.shape)),                            # input W (L>=2)
            wspec(tuple(b_rest.shape)),                              # folded biases
        ]
        out_specs = [
            pl.BlockSpec((tb, L, bb, H), lambda b, t: (t, 0, b, 0)),  # states
            pl.BlockSpec((tb, bb, H), lambda b, t: (t, b, 0)),        # outputs
        ]
        out_shape = (
            jax.ShapeDtypeStruct((Tp, L, B, H), f32),
            jax.ShapeDtypeStruct((Tp, B, H), f32),
        )
        return pl.pallas_call(
            kernel,
            out_shape=out_shape,
            grid_spec=pltpu.PrefetchScalarGridSpec(
                num_scalar_prefetch=0,
                grid=grid,
                in_specs=in_specs,
                out_specs=out_specs,
                scratch_shapes=[pltpu.VMEM((L, bb, Hp), f32)],
            ),
            compiler_params=pltpu.CompilerParams(
                # Batch blocks are independent (megacore-shardable on v7x);
                # the time recurrence must stay sequential ('arbitrary').
                dimension_semantics=("parallel", "arbitrary"),
                vmem_limit_bytes=vmem_limit,
            ),
        )(xp, whh_all, wih_rest, b_rest)

    try:
        states, outputs = run(True)
    except Exception:
        # pipeline_mode / pl.Buffered(1) not supported on this jax version:
        # fall back to default (double-buffered) weight blocks.
        states, outputs = run(False)

    states = states[:T]                    # drop time padding (no lane padding in HBM)
    outputs = outputs[:T]
    all_states = states.reshape(T * L, B, H)   # torch.cat of (L,B,H) stacks over T
    return outputs, all_states


def self_rnn_reference(x, w_ih, w_hh, b_ih, b_hh):
    """Pure-JAX reference mirroring the PyTorch forward (hx=None, tanh)."""
    T, B, _ = x.shape
    L = len(w_ih)
    H = w_hh[0].shape[0]
    h = jnp.zeros((L, B, H), jnp.float32)
    outputs, all_states = [], []
    for t in range(T):
        inp = x[t]
        new_h = []
        for i in range(L):
            nhx = jnp.tanh(inp @ w_ih[i] + b_ih[i, 0] + h[i] @ w_hh[i] + b_hh[i, 0])
            new_h.append(nhx)
            inp = nhx
        h = jnp.stack(new_h, 0)
        outputs.append(h[-1])
        all_states.append(h)
    return jnp.stack(outputs, 0), jnp.concatenate(all_states, 0)


if __name__ == "__main__":
    # Small shapes consistent with the module's forward: (seq, batch, input_size)
    T, B = 8, 8
    input_size, hidden_size, num_layers = 16, 32, 2

    key = jax.random.PRNGKey(0)
    stdv = 1.0 / math.sqrt(hidden_size)

    # Deterministic parameter init (uniform(-stdv, stdv), matching reset_parameters).
    # PyTorch nn.Linear weight is (out, in); we store the transpose (in, out) so
    # the kernel computes x @ W directly.
    keys = jax.random.split(key, 4 * num_layers + 1)
    kidx = 0
    w_ih, w_hh = [], []
    b_ih_rows, b_hh_rows = [], []
    for i in range(num_layers):
        in_i = input_size if i == 0 else hidden_size
        w_ih.append(jax.random.uniform(keys[kidx], (in_i, hidden_size),
                                       jnp.float32, -stdv, stdv)); kidx += 1
        w_hh.append(jax.random.uniform(keys[kidx], (hidden_size, hidden_size),
                                       jnp.float32, -stdv, stdv)); kidx += 1
        b_ih_rows.append(jax.random.uniform(keys[kidx], (hidden_size,),
                                            jnp.float32, -stdv, stdv)); kidx += 1
        b_hh_rows.append(jax.random.uniform(keys[kidx], (hidden_size,),
                                            jnp.float32, -stdv, stdv)); kidx += 1
    b_ih = jnp.stack(b_ih_rows, 0).reshape(num_layers, 1, hidden_size)
    b_hh = jnp.stack(b_hh_rows, 0).reshape(num_layers, 1, hidden_size)

    x = jax.random.normal(keys[kidx], (T, B, input_size), jnp.float32)

    ref_out, ref_states = self_rnn_reference(x, w_ih, w_hh, b_ih, b_hh)

    # --- f32-weight path: tight tolerance; tb=4 exercises the chunk carry. ---
    out_f32, st_f32 = self_rnn_forward(x, w_ih, w_hh, b_ih, b_hh,
                                       time_block=4, param_dtype=jnp.float32)
    out_f32 = jax.block_until_ready(out_f32)
    st_f32 = jax.block_until_ready(st_f32)
    assert out_f32.shape == (T, B, hidden_size)
    assert st_f32.shape == (T * num_layers, B, hidden_size)
    np.testing.assert_allclose(np.asarray(out_f32), np.asarray(ref_out),
                               rtol=1e-4, atol=1e-4)
    np.testing.assert_allclose(np.asarray(st_f32), np.asarray(ref_states),
                               rtol=1e-4, atol=1e-4)

    # --- bf16-weight path (native bf16 MXU): loose tolerance; tb=3 exercises the
    #     T-padding path (T=8 -> Tp=9). ---
    out_bf, st_bf = self_rnn_forward(x, w_ih, w_hh, b_ih, b_hh,
                                     time_block=3, param_dtype=jnp.bfloat16)
    out_bf = jax.block_until_ready(out_bf)
    st_bf = jax.block_until_ready(st_bf)
    assert out_bf.shape == (T, B, hidden_size)
    assert st_bf.shape == (T * num_layers, B, hidden_size)
    np.testing.assert_allclose(np.asarray(out_bf), np.asarray(ref_out),
                               rtol=3e-2, atol=3e-2)
    np.testing.assert_allclose(np.asarray(st_bf), np.asarray(ref_states),
                               rtol=3e-2, atol=3e-2)

    print("KERNEL_OK")
</pallas_src>

<mosaic_0001>
module attributes {stable_mosaic.version = 11 : i64} {
  func.func @kernel(%arg0: i32, %arg1: i32, %arg2: memref<4x8x128xf32, #tpu.memory_space<vmem>>, %arg3: memref<2x128x128xf32, #tpu.memory_space<vmem>>, %arg4: memref<1x128x128xf32, #tpu.memory_space<vmem>>, %arg5: memref<1x1x128xf32, #tpu.memory_space<vmem>>, %arg6: memref<4x2x8x32xf32, #tpu.memory_space<vmem>>, %arg7: memref<4x8x32xf32, #tpu.memory_space<vmem>>, %arg8: memref<2x8x128xf32, #tpu.memory_space<vmem>>) attributes {dimension_semantics = [#tpu.dimension_semantics<parallel>, #tpu.dimension_semantics<arbitrary>], iteration_bounds = array<i64: 1, 2>, scalar_prefetch = 0 : i64, scratch_operands = 1 : i64, tpu.core_type = #tpu.core_type<tc>, window_params = [{transform_indices = @transform_0, window_bounds = array<i64: 4, 8, 128>}, {pipeline_mode = #tpu.pipeline_mode<synchronous>, transform_indices = @transform_1, window_bounds = array<i64: 2, 128, 128>}, {pipeline_mode = #tpu.pipeline_mode<synchronous>, transform_indices = @transform_2, window_bounds = array<i64: 1, 128, 128>}, {pipeline_mode = #tpu.pipeline_mode<synchronous>, transform_indices = @transform_3, window_bounds = array<i64: 1, 1, 128>}, {transform_indices = @transform_4, window_bounds = array<i64: 4, 2, 8, 32>}, {transform_indices = @transform_5, window_bounds = array<i64: 4, 8, 32>}]} {
    %c0_i32 = arith.constant 0 : i32
    %0 = arith.cmpi eq, %arg1, %c0_i32 : i32
    %1 = arith.extui %0 : i1 to i32
    %c0_i32_0 = arith.constant 0 : i32
    %2 = arith.cmpi ne, %1, %c0_i32_0 : i32
    scf.if %2 {
      %cst_115 = arith.constant 0.000000e+00 : f32
      %129 = vector.broadcast %cst_115 : f32 to vector<2x8x128xf32>
      %c0_116 = arith.constant 0 : index
      %c0_117 = arith.constant 0 : index
      %c0_118 = arith.constant 0 : index
      %130 = vector.load %arg8[%c0_116, %c0_117, %c0_118] : memref<2x8x128xf32, #tpu.memory_space<vmem>>, vector<2x8x128xf32>
      tpu.vector_store %arg8[%c0_116, %c0_117, %c0_118], %129 {strides = array<i32>} : memref<2x8x128xf32, #tpu.memory_space<vmem>>, vector<2x8x128xf32>,
    } else {
    }
    %c0 = arith.constant 0 : index
    %c0_1 = arith.constant 0 : index
    %c0_2 = arith.constant 0 : index
    %3 = vector.load %arg8[%c0, %c0_1, %c0_2] : memref<2x8x128xf32, #tpu.memory_space<vmem>>, vector<1x8x128xf32>
    %4 = vector.shape_cast %3 : vector<1x8x128xf32> to vector<8x128xf32>
    %c1 = arith.constant 1 : index
    %c0_3 = arith.constant 0 : index
    %c0_4 = arith.constant 0 : index
    %5 = vector.load %arg8[%c1, %c0_3, %c0_4] : memref<2x8x128xf32, #tpu.memory_space<vmem>>, vector<1x8x128xf32>
    %6 = vector.shape_cast %5 : vector<1x8x128xf32> to vector<8x128xf32>
    %c0_5 = arith.constant 0 : index
    %c0_6 = arith.constant 0 : index
    %c0_7 = arith.constant 0 : index
    %7 = vector.load %arg5[%c0_5, %c0_6, %c0_7] : memref<1x1x128xf32, #tpu.memory_space<vmem>>, vector<1x1x128xf32>
    %8 = vector.shape_cast %7 : vector<1x1x128xf32> to vector<1x128xf32>
    %9 = vector.shape_cast %8 : vector<1x128xf32> to vector<1x128xf32>
    %10 = vector.broadcast %9 : vector<1x128xf32> to vector<8x128xf32>
    %c0_8 = arith.constant 0 : index
    %c0_9 = arith.constant 0 : index
    %c0_10 = arith.constant 0 : index
    %11 = vector.load %arg2[%c0_8, %c0_9, %c0_10] : memref<4x8x128xf32, #tpu.memory_space<vmem>>, vector<1x8x128xf32>
    %12 = vector.shape_cast %11 : vector<1x8x128xf32> to vector<8x128xf32>
    %c0_11 = arith.constant 0 : index
    %c0_12 = arith.constant 0 : index
    %c0_13 = arith.constant 0 : index
    %13 = vector.load %arg3[%c0_11, %c0_12, %c0_13] : memref<2x128x128xf32, #tpu.memory_space<vmem>>, vector<1x128x128xf32>
    %14 = vector.shape_cast %13 : vector<1x128x128xf32> to vector<128x128xf32>
    %cst = arith.constant dense<0.000000e+00> : vector<8x128xf32>
    %15 = tpu.matmul %4, %14, %cst {dimension_numbers = #tpu.dot_dimension_numbers<[1], [0], [0], [1], [0, 0, 1, 1], [], []>} : vector<8x128xf32>, vector<128x128xf32>, vector<8x128xf32> -> vector<8x128xf32>
    %16 = arith.addf %12, %15 : vector<8x128xf32>
    %17 = math.tanh %16 : vector<8x128xf32>
    %18 = vector.extract_strided_slice %17 {offsets = [0, 0], sizes = [8, 32], strides = [1, 1]} : vector<8x128xf32> to vector<8x32xf32>
    %c0_14 = arith.constant 0 : index
    %c0_15 = arith.constant 0 : index
    %c0_16 = arith.constant 0 : index
    %c0_17 = arith.constant 0 : index
    %19 = vector.load %arg6[%c0_14, %c0_15, %c0_16, %c0_17] : memref<4x2x8x32xf32, #tpu.memory_space<vmem>>, vector<1x1x8x32xf32>
    %20 = vector.shape_cast %19 : vector<1x1x8x32xf32> to vector<8x32xf32>
    %21 = vector.shape_cast %18 : vector<8x32xf32> to vector<1x1x8x32xf32>
    tpu.vector_store %arg6[%c0_14, %c0_15, %c0_16, %c0_17], %21 {strides = array<i32>} : memref<4x2x8x32xf32, #tpu.memory_space<vmem>>, vector<1x1x8x32xf32>,
    %c0_18 = arith.constant 0 : index
    %c0_19 = arith.constant 0 : index
    %c0_20 = arith.constant 0 : index
    %22 = vector.load %arg4[%c0_18, %c0_19, %c0_20] : memref<1x128x128xf32, #tpu.memory_space<vmem>>, vector<1x128x128xf32>
    %23 = vector.shape_cast %22 : vector<1x128x128xf32> to vector<128x128xf32>
    %cst_21 = arith.constant dense<0.000000e+00> : vector<8x128xf32>
    %24 = tpu.matmul %17, %23, %cst_21 {dimension_numbers = #tpu.dot_dimension_numbers<[1], [0], [0], [1], [0, 0, 1, 1], [], []>} : vector<8x128xf32>, vector<128x128xf32>, vector<8x128xf32> -> vector<8x128xf32>
    %c1_22 = arith.constant 1 : index
    %c0_23 = arith.constant 0 : index
    %c0_24 = arith.constant 0 : index
    %25 = vector.load %arg3[%c1_22, %c0_23, %c0_24] : memref<2x128x128xf32, #tpu.memory_space<vmem>>, vector<1x128x128xf32>
    %26 = vector.shape_cast %25 : vector<1x128x128xf32> to vector<128x128xf32>
    %cst_25 = arith.constant dense<0.000000e+00> : vector<8x128xf32>
    %27 = tpu.matmul %6, %26, %cst_25 {dimension_numbers = #tpu.dot_dimension_numbers<[1], [0], [0], [1], [0, 0, 1, 1], [], []>} : vector<8x128xf32>, vector<128x128xf32>, vector<8x128xf32> -> vector<8x128xf32>
    %28 = arith.addf %24, %27 : vector<8x128xf32>
    %29 = arith.addf %28, %10 : vector<8x128xf32>
    %30 = math.tanh %29 : vector<8x128xf32>
    %31 = vector.extract_strided_slice %30 {offsets = [0, 0], sizes = [8, 32], strides = [1, 1]} : vector<8x128xf32> to vector<8x32xf32>
    %c0_26 = arith.constant 0 : index
    %c1_27 = arith.constant 1 : index
    %c0_28 = arith.constant 0 : index
    %c0_29 = arith.constant 0 : index
    %32 = vector.load %arg6[%c0_26, %c1_27, %c0_28, %c0_29] : memref<4x2x8x32xf32, #tpu.memory_space<vmem>>, vector<1x1x8x32xf32>
    %33 = vector.shape_cast %32 : vector<1x1x8x32xf32> to vector<8x32xf32>
    %34 = vector.shape_cast %31 : vector<8x32xf32> to vector<1x1x8x32xf32>
    tpu.vector_store %arg6[%c0_26, %c1_27, %c0_28, %c0_29], %34 {strides = array<i32>} : memref<4x2x8x32xf32, #tpu.memory_space<vmem>>, vector<1x1x8x32xf32>,
    %35 = vector.extract_strided_slice %30 {offsets = [0, 0], sizes = [8, 32], strides = [1, 1]} : vector<8x128xf32> to vector<8x32xf32>
    %c0_30 = arith.constant 0 : index
    %c0_31 = arith.constant 0 : index
    %c0_32 = arith.constant 0 : index
    %36 = vector.load %arg7[%c0_30, %c0_31, %c0_32] : memref<4x8x32xf32, #tpu.memory_space<vmem>>, vector<1x8x32xf32>
    %37 = vector.shape_cast %36 : vector<1x8x32xf32> to vector<8x32xf32>
    %38 = vector.shape_cast %35 : vector<8x32xf32> to vector<1x8x32xf32>
    tpu.vector_store %arg7[%c0_30, %c0_31, %c0_32], %38 {strides = array<i32>} : memref<4x8x32xf32, #tpu.memory_space<vmem>>, vector<1x8x32xf32>,
    %c1_33 = arith.constant 1 : index
    %c0_34 = arith.constant 0 : index
    %c0_35 = arith.constant 0 : index
    %39 = vector.load %arg2[%c1_33, %c0_34, %c0_35] : memref<4x8x128xf32, #tpu.memory_space<vmem>>, vector<1x8x128xf32>
    %40 = vector.shape_cast %39 : vector<1x8x128xf32> to vector<8x128xf32>
    %c0_36 = arith.constant 0 : index
    %c0_37 = arith.constant 0 : index
    %c0_38 = arith.constant 0 : index
    %41 = vector.load %arg3[%c0_36, %c0_37, %c0_38] : memref<2x128x128xf32, #tpu.memory_space<vmem>>, vector<1x128x128xf32>
    %42 = vector.shape_cast %41 : vector<1x128x128xf32> to vector<128x128xf32>
    %cst_39 = arith.constant dense<0.000000e+00> : vector<8x128xf32>
    %43 = tpu.matmul %17, %42, %cst_39 {dimension_numbers = #tpu.dot_dimension_numbers<[1], [0], [0], [1], [0, 0, 1, 1], [], []>} : vector<8x128xf32>, vector<128x128xf32>, vector<8x128xf32> -> vector<8x128xf32>
    %44 = arith.addf %40, %43 : vector<8x128xf32>
    %45 = math.tanh %44 : vector<8x128xf32>
    %46 = vector.extract_strided_slice %45 {offsets = [0, 0], sizes = [8, 32], strides = [1, 1]} : vector<8x128xf32> to vector<8x32xf32>
    %c1_40 = arith.constant 1 : index
    %c0_41 = arith.constant 0 : index
    %c0_42 = arith.constant 0 : index
    %c0_43 = arith.constant 0 : index
    %47 = vector.load %arg6[%c1_40, %c0_41, %c0_42, %c0_43] : memref<4x2x8x32xf32, #tpu.memory_space<vmem>>, vector<1x1x8x32xf32>
    %48 = vector.shape_cast %47 : vector<1x1x8x32xf32> to vector<8x32xf32>
    %49 = vector.shape_cast %46 : vector<8x32xf32> to vector<1x1x8x32xf32>
    tpu.vector_store %arg6[%c1_40, %c0_41, %c0_42, %c0_43], %49 {strides = array<i32>} : memref<4x2x8x32xf32, #tpu.memory_space<vmem>>, vector<1x1x8x32xf32>,
    %c0_44 = arith.constant 0 : index
    %c0_45 = arith.constant 0 : index
    %c0_46 = arith.constant 0 : index
    %50 = vector.load %arg4[%c0_44, %c0_45, %c0_46] : memref<1x128x128xf32, #tpu.memory_space<vmem>>, vector<1x128x128xf32>
    %51 = vector.shape_cast %50 : vector<1x128x128xf32> to vector<128x128xf32>
    %cst_47 = arith.constant dense<0.000000e+00> : vector<8x128xf32>
    %52 = tpu.matmul %45, %51, %cst_47 {dimension_numbers = #tpu.dot_dimension_numbers<[1], [0], [0], [1], [0, 0, 1, 1], [], []>} : vector<8x128xf32>, vector<128x128xf32>, vector<8x128xf32> -> vector<8x128xf32>
    %c1_48 = arith.constant 1 : index
    %c0_49 = arith.constant 0 : index
    %c0_50 = arith.constant 0 : index
    %53 = vector.load %arg3[%c1_48, %c0_49, %c0_50] : memref<2x128x128xf32, #tpu.memory_space<vmem>>, vector<1x128x128xf32>
    %54 = vector.shape_cast %53 : vector<1x128x128xf32> to vector<128x128xf32>
    %cst_51 = arith.constant dense<0.000000e+00> : vector<8x128xf32>
    %55 = tpu.matmul %30, %54, %cst_51 {dimension_numbers = #tpu.dot_dimension_numbers<[1], [0], [0], [1], [0, 0, 1, 1], [], []>} : vector<8x128xf32>, vector<128x128xf32>, vector<8x128xf32> -> vector<8x128xf32>
    %56 = arith.addf %52, %55 : vector<8x128xf32>
    %57 = arith.addf %56, %10 : vector<8x128xf32>
    %58 = math.tanh %57 : vector<8x128xf32>
    %59 = vector.extract_strided_slice %58 {offsets = [0, 0], sizes = [8, 32], strides = [1, 1]} : vector<8x128xf32> to vector<8x32xf32>
    %c1_52 = arith.constant 1 : index
    %c1_53 = arith.constant 1 : index
    %c0_54 = arith.constant 0 : index
    %c0_55 = arith.constant 0 : index
    %60 = vector.load %arg6[%c1_52, %c1_53, %c0_54, %c0_55] : memref<4x2x8x32xf32, #tpu.memory_space<vmem>>, vector<1x1x8x32xf32>
    %61 = vector.shape_cast %60 : vector<1x1x8x32xf32> to vector<8x32xf32>
    %62 = vector.shape_cast %59 : vector<8x32xf32> to vector<1x1x8x32xf32>
    tpu.vector_store %arg6[%c1_52, %c1_53, %c0_54, %c0_55], %62 {strides = array<i32>} : memref<4x2x8x32xf32, #tpu.memory_space<vmem>>, vector<1x1x8x32xf32>,
    %63 = vector.extract_strided_slice %58 {offsets = [0, 0], sizes = [8, 32], strides = [1, 1]} : vector<8x128xf32> to vector<8x32xf32>
    %c1_56 = arith.constant 1 : index
    %c0_57 = arith.constant 0 : index
    %c0_58 = arith.constant 0 : index
    %64 = vector.load %arg7[%c1_56, %c0_57, %c0_58] : memref<4x8x32xf32, #tpu.memory_space<vmem>>, vector<1x8x32xf32>
    %65 = vector.shape_cast %64 : vector<1x8x32xf32> to vector<8x32xf32>
    %66 = vector.shape_cast %63 : vector<8x32xf32> to vector<1x8x32xf32>
    tpu.vector_store %arg7[%c1_56, %c0_57, %c0_58], %66 {strides = array<i32>} : memref<4x8x32xf32, #tpu.memory_space<vmem>>, vector<1x8x32xf32>,
    %c2 = arith.constant 2 : index
    %c0_59 = arith.constant 0 : index
    %c0_60 = arith.constant 0 : index
    %67 = vector.load %arg2[%c2, %c0_59, %c0_60] : memref<4x8x128xf32, #tpu.memory_space<vmem>>, vector<1x8x128xf32>
    %68 = vector.shape_cast %67 : vector<1x8x128xf32> to vector<8x128xf32>
    %c0_61 = arith.constant 0 : index
    %c0_62 = arith.constant 0 : index
    %c0_63 = arith.constant 0 : index
    %69 = vector.load %arg3[%c0_61, %c0_62, %c0_63] : memref<2x128x128xf32, #tpu.memory_space<vmem>>, vector<1x128x128xf32>
    %70 = vector.shape_cast %69 : vector<1x128x128xf32> to vector<128x128xf32>
    %cst_64 = arith.constant dense<0.000000e+00> : vector<8x128xf32>
    %71 = tpu.matmul %45, %70, %cst_64 {dimension_numbers = #tpu.dot_dimension_numbers<[1], [0], [0], [1], [0, 0, 1, 1], [], []>} : vector<8x128xf32>, vector<128x128xf32>, vector<8x128xf32> -> vector<8x128xf32>
    %72 = arith.addf %68, %71 : vector<8x128xf32>
    %73 = math.tanh %72 : vector<8x128xf32>
    %74 = vector.extract_strided_slice %73 {offsets = [0, 0], sizes = [8, 32], strides = [1, 1]} : vector<8x128xf32> to vector<8x32xf32>
    %c2_65 = arith.constant 2 : index
    %c0_66 = arith.constant 0 : index
    %c0_67 = arith.constant 0 : index
    %c0_68 = arith.constant 0 : index
    %75 = vector.load %arg6[%c2_65, %c0_66, %c0_67, %c0_68] : memref<4x2x8x32xf32, #tpu.memory_space<vmem>>, vector<1x1x8x32xf32>
    %76 = vector.shape_cast %75 : vector<1x1x8x32xf32> to vector<8x32xf32>
    %77 = vector.shape_cast %74 : vector<8x32xf32> to vector<1x1x8x32xf32>
    tpu.vector_store %arg6[%c2_65, %c0_66, %c0_67, %c0_68], %77 {strides = array<i32>} : memref<4x2x8x32xf32, #tpu.memory_space<vmem>>, vector<1x1x8x32xf32>,
    %c0_69 = arith.constant 0 : index
    %c0_70 = arith.constant 0 : index
    %c0_71 = arith.constant 0 : index
    %78 = vector.load %arg4[%c0_69, %c0_70, %c0_71] : memref<1x128x128xf32, #tpu.memory_space<vmem>>, vector<1x128x128xf32>
    %79 = vector.shape_cast %78 : vector<1x128x128xf32> to vector<128x128xf32>
    %cst_72 = arith.constant dense<0.000000e+00> : vector<8x128xf32>
    %80 = tpu.matmul %73, %79, %cst_72 {dimension_numbers = #tpu.dot_dimension_numbers<[1], [0], [0], [1], [0, 0, 1, 1], [], []>} : vector<8x128xf32>, vector<128x128xf32>, vector<8x128xf32> -> vector<8x128xf32>
    %c1_73 = arith.constant 1 : index
    %c0_74 = arith.constant 0 : index
    %c0_75 = arith.constant 0 : index
    %81 = vector.load %arg3[%c1_73, %c0_74, %c0_75] : memref<2x128x128xf32, #tpu.memory_space<vmem>>, vector<1x128x128xf32>
    %82 = vector.shape_cast %81 : vector<1x128x128xf32> to vector<128x128xf32>
    %cst_76 = arith.constant dense<0.000000e+00> : vector<8x128xf32>
    %83 = tpu.matmul %58, %82, %cst_76 {dimension_numbers = #tpu.dot_dimension_numbers<[1], [0], [0], [1], [0, 0, 1, 1], [], []>} : vector<8x128xf32>, vector<128x128xf32>, vector<8x128xf32> -> vector<8x128xf32>
    %84 = arith.addf %80, %83 : vector<8x128xf32>
    %85 = arith.addf %84, %10 : vector<8x128xf32>
    %86 = math.tanh %85 : vector<8x128xf32>
    %87 = vector.extract_strided_slice %86 {offsets = [0, 0], sizes = [8, 32], strides = [1, 1]} : vector<8x128xf32> to vector<8x32xf32>
    %c2_77 = arith.constant 2 : index
    %c1_78 = arith.constant 1 : index
    %c0_79 = arith.constant 0 : index
    %c0_80 = arith.constant 0 : index
    %88 = vector.load %arg6[%c2_77, %c1_78, %c0_79, %c0_80] : memref<4x2x8x32xf32, #tpu.memory_space<vmem>>, vector<1x1x8x32xf32>
    %89 = vector.shape_cast %88 : vector<1x1x8x32xf32> to vector<8x32xf32>
    %90 = vector.shape_cast %87 : vector<8x32xf32> to vector<1x1x8x32xf32>
    tpu.vector_store %arg6[%c2_77, %c1_78, %c0_79, %c0_80], %90 {strides = array<i32>} : memref<4x2x8x32xf32, #tpu.memory_space<vmem>>, vector<1x1x8x32xf32>,
    %91 = vector.extract_strided_slice %86 {offsets = [0, 0], sizes = [8, 32], strides = [1, 1]} : vector<8x128xf32> to vector<8x32xf32>
    %c2_81 = arith.constant 2 : index
    %c0_82 = arith.constant 0 : index
    %c0_83 = arith.constant 0 : index
    %92 = vector.load %arg7[%c2_81, %c0_82, %c0_83] : memref<4x8x32xf32, #tpu.memory_space<vmem>>, vector<1x8x32xf32>
    %93 = vector.shape_cast %92 : vector<1x8x32xf32> to vector<8x32xf32>
    %94 = vector.shape_cast %91 : vector<8x32xf32> to vector<1x8x32xf32>
    tpu.vector_store %arg7[%c2_81, %c0_82, %c0_83], %94 {strides = array<i32>} : memref<4x8x32xf32, #tpu.memory_space<vmem>>, vector<1x8x32xf32>,
    %c3 = arith.constant 3 : index
    %c0_84 = arith.constant 0 : index
    %c0_85 = arith.constant 0 : index
    %95 = vector.load %arg2[%c3, %c0_84, %c0_85] : memref<4x8x128xf32, #tpu.memory_space<vmem>>, vector<1x8x128xf32>
    %96 = vector.shape_cast %95 : vector<1x8x128xf32> to vector<8x128xf32>
    %c0_86 = arith.constant 0 : index
    %c0_87 = arith.constant 0 : index
    %c0_88 = arith.constant 0 : index
    %97 = vector.load %arg3[%c0_86, %c0_87, %c0_88] : memref<2x128x128xf32, #tpu.memory_space<vmem>>, vector<1x128x128xf32>
    %98 = vector.shape_cast %97 : vector<1x128x128xf32> to vector<128x128xf32>
    %cst_89 = arith.constant dense<0.000000e+00> : vector<8x128xf32>
    %99 = tpu.matmul %73, %98, %cst_89 {dimension_numbers = #tpu.dot_dimension_numbers<[1], [0], [0], [1], [0, 0, 1, 1], [], []>} : vector<8x128xf32>, vector<128x128xf32>, vector<8x128xf32> -> vector<8x128xf32>
    %100 = arith.addf %96, %99 : vector<8x128xf32>
    %101 = math.tanh %100 : vector<8x128xf32>
    %102 = vector.extract_strided_slice %101 {offsets = [0, 0], sizes = [8, 32], strides = [1, 1]} : vector<8x128xf32> to vector<8x32xf32>
    %c3_90 = arith.constant 3 : index
    %c0_91 = arith.constant 0 : index
    %c0_92 = arith.constant 0 : index
    %c0_93 = arith.constant 0 : index
    %103 = vector.load %arg6[%c3_90, %c0_91, %c0_92, %c0_93] : memref<4x2x8x32xf32, #tpu.memory_space<vmem>>, vector<1x1x8x32xf32>
    %104 = vector.shape_cast %103 : vector<1x1x8x32xf32> to vector<8x32xf32>
    %105 = vector.shape_cast %102 : vector<8x32xf32> to vector<1x1x8x32xf32>
    tpu.vector_store %arg6[%c3_90, %c0_91, %c0_92, %c0_93], %105 {strides = array<i32>} : memref<4x2x8x32xf32, #tpu.memory_space<vmem>>, vector<1x1x8x32xf32>,
    %c0_94 = arith.constant 0 : index
    %c0_95 = arith.constant 0 : index
    %c0_96 = arith.constant 0 : index
    %106 = vector.load %arg4[%c0_94, %c0_95, %c0_96] : memref<1x128x128xf32, #tpu.memory_space<vmem>>, vector<1x128x128xf32>
    %107 = vector.shape_cast %106 : vector<1x128x128xf32> to vector<128x128xf32>
    %cst_97 = arith.constant dense<0.000000e+00> : vector<8x128xf32>
    %108 = tpu.matmul %101, %107, %cst_97 {dimension_numbers = #tpu.dot_dimension_numbers<[1], [0], [0], [1], [0, 0, 1, 1], [], []>} : vector<8x128xf32>, vector<128x128xf32>, vector<8x128xf32> -> vector<8x128xf32>
    %c1_98 = arith.constant 1 : index
    %c0_99 = arith.constant 0 : index
    %c0_100 = arith.constant 0 : index
    %109 = vector.load %arg3[%c1_98, %c0_99, %c0_100] : memref<2x128x128xf32, #tpu.memory_space<vmem>>, vector<1x128x128xf32>
    %110 = vector.shape_cast %109 : vector<1x128x128xf32> to vector<128x128xf32>
    %cst_101 = arith.constant dense<0.000000e+00> : vector<8x128xf32>
    %111 = tpu.matmul %86, %110, %cst_101 {dimension_numbers = #tpu.dot_dimension_numbers<[1], [0], [0], [1], [0, 0, 1, 1], [], []>} : vector<8x128xf32>, vector<128x128xf32>, vector<8x128xf32> -> vector<8x128xf32>
    %112 = arith.addf %108, %111 : vector<8x128xf32>
    %113 = arith.addf %112, %10 : vector<8x128xf32>
    %114 = math.tanh %113 : vector<8x128xf32>
    %115 = vector.extract_strided_slice %114 {offsets = [0, 0], sizes = [8, 32], strides = [1, 1]} : vector<8x128xf32> to vector<8x32xf32>
    %c3_102 = arith.constant 3 : index
    %c1_103 = arith.constant 1 : index
    %c0_104 = arith.constant 0 : index
    %c0_105 = arith.constant 0 : index
    %116 = vector.load %arg6[%c3_102, %c1_103, %c0_104, %c0_105] : memref<4x2x8x32xf32, #tpu.memory_space<vmem>>, vector<1x1x8x32xf32>
    %117 = vector.shape_cast %116 : vector<1x1x8x32xf32> to vector<8x32xf32>
    %118 = vector.shape_cast %115 : vector<8x32xf32> to vector<1x1x8x32xf32>
    tpu.vector_store %arg6[%c3_102, %c1_103, %c0_104, %c0_105], %118 {strides = array<i32>} : memref<4x2x8x32xf32, #tpu.memory_space<vmem>>, vector<1x1x8x32xf32>,
    %119 = vector.extract_strided_slice %114 {offsets = [0, 0], sizes = [8, 32], strides = [1, 1]} : vector<8x128xf32> to vector<8x32xf32>
    %c3_106 = arith.constant 3 : index
    %c0_107 = arith.constant 0 : index
    %c0_108 = arith.constant 0 : index
    %120 = vector.load %arg7[%c3_106, %c0_107, %c0_108] : memref<4x8x32xf32, #tpu.memory_space<vmem>>, vector<1x8x32xf32>
    %121 = vector.shape_cast %120 : vector<1x8x32xf32> to vector<8x32xf32>
    %122 = vector.shape_cast %119 : vector<8x32xf32> to vector<1x8x32xf32>
    tpu.vector_store %arg7[%c3_106, %c0_107, %c0_108], %122 {strides = array<i32>} : memref<4x8x32xf32, #tpu.memory_space<vmem>>, vector<1x8x32xf32>,
    %c0_109 = arith.constant 0 : index
    %c0_110 = arith.constant 0 : index
    %c0_111 = arith.constant 0 : index
    %123 = vector.load %arg8[%c0_109, %c0_110, %c0_111] : memref<2x8x128xf32, #tpu.memory_space<vmem>>, vector<1x8x128xf32>
    %124 = vector.shape_cast %123 : vector<1x8x128xf32> to vector<8x128xf32>
    %125 = vector.shape_cast %101 : vector<8x128xf32> to vector<1x8x128xf32>
    tpu.vector_store %arg8[%c0_109, %c0_110, %c0_111], %125 {strides = array<i32>} : memref<2x8x128xf32, #tpu.memory_space<vmem>>, vector<1x8x128xf32>,
    %c1_112 = arith.constant 1 : index
    %c0_113 = arith.constant 0 : index
    %c0_114 = arith.constant 0 : index
    %126 = vector.load %arg8[%c1_112, %c0_113, %c0_114] : memref<2x8x128xf32, #tpu.memory_space<vmem>>, vector<1x8x128xf32>
    %127 = vector.shape_cast %126 : vector<1x8x128xf32> to vector<8x128xf32>
    %128 = vector.shape_cast %114 : vector<8x128xf32> to vector<1x8x128xf32>
    tpu.vector_store %arg8[%c1_112, %c0_113, %c0_114], %128 {strides = array<i32>} : memref<2x8x128xf32, #tpu.memory_space<vmem>>, vector<1x8x128xf32>,
    return
  }
  func.func @transform_0(%arg0: i32, %arg1: i32) -> (i32, i32, i32) {
    %c0_i32 = arith.constant 0 : i32
    %c0_i32_0 = arith.constant 0 : i32
    return %arg1, %arg0, %c0_i32 : i32, i32, i32
  }
  func.func @transform_1(%arg0: i32, %arg1: i32) -> (i32, i32, i32) {
    %c0_i32 = arith.constant 0 : i32
    %c0_i32_0 = arith.constant 0 : i32
    %c0_i32_1 = arith.constant 0 : i32
    %c0_i32_2 = arith.constant 0 : i32
    return %c0_i32, %c0_i32_0, %c0_i32_1 : i32, i32, i32
  }
  func.func @transform_2(%arg0: i32, %arg1: i32) -> (i32, i32, i32) {
    %c0_i32 = arith.constant 0 : i32
    %c0_i32_0 = arith.constant 0 : i32
    %c0_i32_1 = arith.constant 0 : i32
    %c0_i32_2 = arith.constant 0 : i32
    return %c0_i32, %c0_i32_0, %c0_i32_1 : i32, i32, i32
  }
  func.func @transform_3(%arg0: i32, %arg1: i32) -> (i32, i32, i32) {
    %c0_i32 = arith.constant 0 : i32
    %c0_i32_0 = arith.constant 0 : i32
    %c0_i32_1 = arith.constant 0 : i32
    %c0_i32_2 = arith.constant 0 : i32
    return %c0_i32, %c0_i32_0, %c0_i32_1 : i32, i32, i32
  }
  func.func @transform_4(%arg0: i32, %arg1: i32) -> (i32, i32, i32, i32) {
    %c0_i32 = arith.constant 0 : i32
    %c0_i32_0 = arith.constant 0 : i32
    %c0_i32_1 = arith.constant 0 : i32
    return %arg1, %c0_i32, %arg0, %c0_i32_0 : i32, i32, i32, i32
  }
  func.func @transform_5(%arg0: i32, %arg1: i32) -> (i32, i32, i32) {
    %c0_i32 = arith.constant 0 : i32
    %c0_i32_0 = arith.constant 0 : i32
    return %arg1, %arg0, %c0_i32 : i32, i32, i32
  }
}

module attributes {stable_mosaic.version = 11 : i64} {
  func.func @kernel(%arg0: i32, %arg1: i32, %arg2: memref<4x8x128xf32, #tpu.memory_space<vmem>>, %arg3: memref<2x128x128xf32, #tpu.memory_space<vmem>>, %arg4: memref<1x128x128xf32, #tpu.memory_space<vmem>>, %arg5: memref<1x1x128xf32, #tpu.memory_space<vmem>>, %arg6: memref<4x2x8x32xf32, #tpu.memory_space<vmem>>, %arg7: memref<4x8x32xf32, #tpu.memory_space<vmem>>, %arg8: memref<2x8x128xf32, #tpu.memory_space<vmem>>) attributes {dimension_semantics = [#tpu.dimension_semantics<parallel>, #tpu.dimension_semantics<arbitrary>], iteration_bounds = array<i64: 1, 2>, scalar_prefetch = 0 : i64, scratch_operands = 1 : i64, tpu.core_type = #tpu.core_type<tc>, window_params = [{transform_indices = @transform_0, window_bounds = array<i64: 4, 8, 128>}, {pipeline_mode = #tpu.pipeline_mode<synchronous>, transform_indices = @transform_1, window_bounds = array<i64: 2, 128, 128>}, {pipeline_mode = #tpu.pipeline_mode<synchronous>, transform_indices = @transform_2, window_bounds = array<i64: 1, 128, 128>}, {pipeline_mode = #tpu.pipeline_mode<synchronous>, transform_indices = @transform_3, window_bounds = array<i64: 1, 1, 128>}, {transform_indices = @transform_4, window_bounds = array<i64: 4, 2, 8, 32>}, {transform_indices = @transform_5, window_bounds = array<i64: 4, 8, 32>}]} {
    %c0_i32 = arith.constant 0 : i32
    %0 = arith.cmpi eq, %arg1, %c0_i32 : i32
    %1 = arith.extui %0 : i1 to i32
    %c0_i32_0 = arith.constant 0 : i32
    %2 = arith.cmpi ne, %1, %c0_i32_0 : i32
    scf.if %2 {
      %cst_115 = arith.constant 0.000000e+00 : f32
      %129 = vector.broadcast %cst_115 : f32 to vector<2x8x128xf32>
      %c0_116 = arith.constant 0 : index
      %c0_117 = arith.constant 0 : index
      %c0_118 = arith.constant 0 : index
      %130 = vector.load %arg8[%c0_116, %c0_117, %c0_118] : memref<2x8x128xf32, #tpu.memory_space<vmem>>, vector<2x8x128xf32>
      tpu.vector_store %arg8[%c0_116, %c0_117, %c0_118], %129 {strides = array<i32>} : memref<2x8x128xf32, #tpu.memory_space<vmem>>, vector<2x8x128xf32>,
    } else {
    }
    %c0 = arith.constant 0 : index
    %c0_1 = arith.constant 0 : index
    %c0_2 = arith.constant 0 : index
    %3 = vector.load %arg8[%c0, %c0_1, %c0_2] : memref<2x8x128xf32, #tpu.memory_space<vmem>>, vector<1x8x128xf32>
    %4 = vector.shape_cast %3 : vector<1x8x128xf32> to vector<8x128xf32>
    %c1 = arith.constant 1 : index
    %c0_3 = arith.constant 0 : index
    %c0_4 = arith.constant 0 : index
    %5 = vector.load %arg8[%c1, %c0_3, %c0_4] : memref<2x8x128xf32, #tpu.memory_space<vmem>>, vector<1x8x128xf32>
    %6 = vector.shape_cast %5 : vector<1x8x128xf32> to vector<8x128xf32>
    %c0_5 = arith.constant 0 : index
    %c0_6 = arith.constant 0 : index
    %c0_7 = arith.constant 0 : index
    %7 = vector.load %arg5[%c0_5, %c0_6, %c0_7] : memref<1x1x128xf32, #tpu.memory_space<vmem>>, vector<1x1x128xf32>
    %8 = vector.shape_cast %7 : vector<1x1x128xf32> to vector<1x128xf32>
    %9 = vector.shape_cast %8 : vector<1x128xf32> to vector<1x128xf32>
    %10 = vector.broadcast %9 : vector<1x128xf32> to vector<8x128xf32>
    %c0_8 = arith.constant 0 : index
    %c0_9 = arith.constant 0 : index
    %c0_10 = arith.constant 0 : index
    %11 = vector.load %arg2[%c0_8, %c0_9, %c0_10] : memref<4x8x128xf32, #tpu.memory_space<vmem>>, vector<1x8x128xf32>
    %12 = vector.shape_cast %11 : vector<1x8x128xf32> to vector<8x128xf32>
    %c0_11 = arith.constant 0 : index
    %c0_12 = arith.constant 0 : index
    %c0_13 = arith.constant 0 : index
    %13 = vector.load %arg3[%c0_11, %c0_12, %c0_13] : memref<2x128x128xf32, #tpu.memory_space<vmem>>, vector<1x128x128xf32>
    %14 = vector.shape_cast %13 : vector<1x128x128xf32> to vector<128x128xf32>
    %cst = arith.constant dense<0.000000e+00> : vector<8x128xf32>
    %15 = tpu.matmul %4, %14, %cst {dimension_numbers = #tpu.dot_dimension_numbers<[1], [0], [0], [1], [0, 0, 1, 1], [], []>} : vector<8x128xf32>, vector<128x128xf32>, vector<8x128xf32> -> vector<8x128xf32>
    %16 = arith.addf %12, %15 : vector<8x128xf32>
    %17 = math.tanh %16 : vector<8x128xf32>
    %18 = vector.extract_strided_slice %17 {offsets = [0, 0], sizes = [8, 32], strides = [1, 1]} : vector<8x128xf32> to vector<8x32xf32>
    %c0_14 = arith.constant 0 : index
    %c0_15 = arith.constant 0 : index
    %c0_16 = arith.constant 0 : index
    %c0_17 = arith.constant 0 : index
    %19 = vector.load %arg6[%c0_14, %c0_15, %c0_16, %c0_17] : memref<4x2x8x32xf32, #tpu.memory_space<vmem>>, vector<1x1x8x32xf32>
    %20 = vector.shape_cast %19 : vector<1x1x8x32xf32> to vector<8x32xf32>
    %21 = vector.shape_cast %18 : vector<8x32xf32> to vector<1x1x8x32xf32>
    tpu.vector_store %arg6[%c0_14, %c0_15, %c0_16, %c0_17], %21 {strides = array<i32>} : memref<4x2x8x32xf32, #tpu.memory_space<vmem>>, vector<1x1x8x32xf32>,
    %c0_18 = arith.constant 0 : index
    %c0_19 = arith.constant 0 : index
    %c0_20 = arith.constant 0 : index
    %22 = vector.load %arg4[%c0_18, %c0_19, %c0_20] : memref<1x128x128xf32, #tpu.memory_space<vmem>>, vector<1x128x128xf32>
    %23 = vector.shape_cast %22 : vector<1x128x128xf32> to vector<128x128xf32>
    %cst_21 = arith.constant dense<0.000000e+00> : vector<8x128xf32>
    %24 = tpu.matmul %17, %23, %cst_21 {dimension_numbers = #tpu.dot_dimension_numbers<[1], [0], [0], [1], [0, 0, 1, 1], [], []>} : vector<8x128xf32>, vector<128x128xf32>, vector<8x128xf32> -> vector<8x128xf32>
    %c1_22 = arith.constant 1 : index
    %c0_23 = arith.constant 0 : index
    %c0_24 = arith.constant 0 : index
    %25 = vector.load %arg3[%c1_22, %c0_23, %c0_24] : memref<2x128x128xf32, #tpu.memory_space<vmem>>, vector<1x128x128xf32>
    %26 = vector.shape_cast %25 : vector<1x128x128xf32> to vector<128x128xf32>
    %cst_25 = arith.constant dense<0.000000e+00> : vector<8x128xf32>
    %27 = tpu.matmul %6, %26, %cst_25 {dimension_numbers = #tpu.dot_dimension_numbers<[1], [0], [0], [1], [0, 0, 1, 1], [], []>} : vector<8x128xf32>, vector<128x128xf32>, vector<8x128xf32> -> vector<8x128xf32>
    %28 = arith.addf %24, %27 : vector<8x128xf32>
    %29 = arith.addf %28, %10 : vector<8x128xf32>
    %30 = math.tanh %29 : vector<8x128xf32>
    %31 = vector.extract_strided_slice %30 {offsets = [0, 0], sizes = [8, 32], strides = [1, 1]} : vector<8x128xf32> to vector<8x32xf32>
    %c0_26 = arith.constant 0 : index
    %c1_27 = arith.constant 1 : index
    %c0_28 = arith.constant 0 : index
    %c0_29 = arith.constant 0 : index
    %32 = vector.load %arg6[%c0_26, %c1_27, %c0_28, %c0_29] : memref<4x2x8x32xf32, #tpu.memory_space<vmem>>, vector<1x1x8x32xf32>
    %33 = vector.shape_cast %32 : vector<1x1x8x32xf32> to vector<8x32xf32>
    %34 = vector.shape_cast %31 : vector<8x32xf32> to vector<1x1x8x32xf32>
    tpu.vector_store %arg6[%c0_26, %c1_27, %c0_28, %c0_29], %34 {strides = array<i32>} : memref<4x2x8x32xf32, #tpu.memory_space<vmem>>, vector<1x1x8x32xf32>,
    %35 = vector.extract_strided_slice %30 {offsets = [0, 0], sizes = [8, 32], strides = [1, 1]} : vector<8x128xf32> to vector<8x32xf32>
    %c0_30 = arith.constant 0 : index
    %c0_31 = arith.constant 0 : index
    %c0_32 = arith.constant 0 : index
    %36 = vector.load %arg7[%c0_30, %c0_31, %c0_32] : memref<4x8x32xf32, #tpu.memory_space<vmem>>, vector<1x8x32xf32>
    %37 = vector.shape_cast %36 : vector<1x8x32xf32> to vector<8x32xf32>
    %38 = vector.shape_cast %35 : vector<8x32xf32> to vector<1x8x32xf32>
    tpu.vector_store %arg7[%c0_30, %c0_31, %c0_32], %38 {strides = array<i32>} : memref<4x8x32xf32, #tpu.memory_space<vmem>>, vector<1x8x32xf32>,
    %c1_33 = arith.constant 1 : index
    %c0_34 = arith.constant 0 : index
    %c0_35 = arith.constant 0 : index
    %39 = vector.load %arg2[%c1_33, %c0_34, %c0_35] : memref<4x8x128xf32, #tpu.memory_space<vmem>>, vector<1x8x128xf32>
    %40 = vector.shape_cast %39 : vector<1x8x128xf32> to vector<8x128xf32>
    %c0_36 = arith.constant 0 : index
    %c0_37 = arith.constant 0 : index
    %c0_38 = arith.constant 0 : index
    %41 = vector.load %arg3[%c0_36, %c0_37, %c0_38] : memref<2x128x128xf32, #tpu.memory_space<vmem>>, vector<1x128x128xf32>
    %42 = vector.shape_cast %41 : vector<1x128x128xf32> to vector<128x128xf32>
    %cst_39 = arith.constant dense<0.000000e+00> : vector<8x128xf32>
    %43 = tpu.matmul %17, %42, %cst_39 {dimension_numbers = #tpu.dot_dimension_numbers<[1], [0], [0], [1], [0, 0, 1, 1], [], []>} : vector<8x128xf32>, vector<128x128xf32>, vector<8x128xf32> -> vector<8x128xf32>
    %44 = arith.addf %40, %43 : vector<8x128xf32>
    %45 = math.tanh %44 : vector<8x128xf32>
    %46 = vector.extract_strided_slice %45 {offsets = [0, 0], sizes = [8, 32], strides = [1, 1]} : vector<8x128xf32> to vector<8x32xf32>
    %c1_40 = arith.constant 1 : index
    %c0_41 = arith.constant 0 : index
    %c0_42 = arith.constant 0 : index
    %c0_43 = arith.constant 0 : index
    %47 = vector.load %arg6[%c1_40, %c0_41, %c0_42, %c0_43] : memref<4x2x8x32xf32, #tpu.memory_space<vmem>>, vector<1x1x8x32xf32>
    %48 = vector.shape_cast %47 : vector<1x1x8x32xf32> to vector<8x32xf32>
    %49 = vector.shape_cast %46 : vector<8x32xf32> to vector<1x1x8x32xf32>
    tpu.vector_store %arg6[%c1_40, %c0_41, %c0_42, %c0_43], %49 {strides = array<i32>} : memref<4x2x8x32xf32, #tpu.memory_space<vmem>>, vector<1x1x8x32xf32>,
    %c0_44 = arith.constant 0 : index
    %c0_45 = arith.constant 0 : index
    %c0_46 = arith.constant 0 : index
    %50 = vector.load %arg4[%c0_44, %c0_45, %c0_46] : memref<1x128x128xf32, #tpu.memory_space<vmem>>, vector<1x128x128xf32>
    %51 = vector.shape_cast %50 : vector<1x128x128xf32> to vector<128x128xf32>
    %cst_47 = arith.constant dense<0.000000e+00> : vector<8x128xf32>
    %52 = tpu.matmul %45, %51, %cst_47 {dimension_numbers = #tpu.dot_dimension_numbers<[1], [0], [0], [1], [0, 0, 1, 1], [], []>} : vector<8x128xf32>, vector<128x128xf32>, vector<8x128xf32> -> vector<8x128xf32>
    %c1_48 = arith.constant 1 : index
    %c0_49 = arith.constant 0 : index
    %c0_50 = arith.constant 0 : index
    %53 = vector.load %arg3[%c1_48, %c0_49, %c0_50] : memref<2x128x128xf32, #tpu.memory_space<vmem>>, vector<1x128x128xf32>
    %54 = vector.shape_cast %53 : vector<1x128x128xf32> to vector<128x128xf32>
    %cst_51 = arith.constant dense<0.000000e+00> : vector<8x128xf32>
    %55 = tpu.matmul %30, %54, %cst_51 {dimension_numbers = #tpu.dot_dimension_numbers<[1], [0], [0], [1], [0, 0, 1, 1], [], []>} : vector<8x128xf32>, vector<128x128xf32>, vector<8x128xf32> -> vector<8x128xf32>
    %56 = arith.addf %52, %55 : vector<8x128xf32>
    %57 = arith.addf %56, %10 : vector<8x128xf32>
    %58 = math.tanh %57 : vector<8x128xf32>
    %59 = vector.extract_strided_slice %58 {offsets = [0, 0], sizes = [8, 32], strides = [1, 1]} : vector<8x128xf32> to vector<8x32xf32>
    %c1_52 = arith.constant 1 : index
    %c1_53 = arith.constant 1 : index
    %c0_54 = arith.constant 0 : index
    %c0_55 = arith.constant 0 : index
    %60 = vector.load %arg6[%c1_52, %c1_53, %c0_54, %c0_55] : memref<4x2x8x32xf32, #tpu.memory_space<vmem>>, vector<1x1x8x32xf32>
    %61 = vector.shape_cast %60 : vector<1x1x8x32xf32> to vector<8x32xf32>
    %62 = vector.shape_cast %59 : vector<8x32xf32> to vector<1x1x8x32xf32>
    tpu.vector_store %arg6[%c1_52, %c1_53, %c0_54, %c0_55], %62 {strides = array<i32>} : memref<4x2x8x32xf32, #tpu.memory_space<vmem>>, vector<1x1x8x32xf32>,
    %63 = vector.extract_strided_slice %58 {offsets = [0, 0], sizes = [8, 32], strides = [1, 1]} : vector<8x128xf32> to vector<8x32xf32>
    %c1_56 = arith.constant 1 : index
    %c0_57 = arith.constant 0 : index
    %c0_58 = arith.constant 0 : index
    %64 = vector.load %arg7[%c1_56, %c0_57, %c0_58] : memref<4x8x32xf32, #tpu.memory_space<vmem>>, vector<1x8x32xf32>
    %65 = vector.shape_cast %64 : vector<1x8x32xf32> to vector<8x32xf32>
    %66 = vector.shape_cast %63 : vector<8x32xf32> to vector<1x8x32xf32>
    tpu.vector_store %arg7[%c1_56, %c0_57, %c0_58], %66 {strides = array<i32>} : memref<4x8x32xf32, #tpu.memory_space<vmem>>, vector<1x8x32xf32>,
    %c2 = arith.constant 2 : index
    %c0_59 = arith.constant 0 : index
    %c0_60 = arith.constant 0 : index
    %67 = vector.load %arg2[%c2, %c0_59, %c0_60] : memref<4x8x128xf32, #tpu.memory_space<vmem>>, vector<1x8x128xf32>
    %68 = vector.shape_cast %67 : vector<1x8x128xf32> to vector<8x128xf32>
    %c0_61 = arith.constant 0 : index
    %c0_62 = arith.constant 0 : index
    %c0_63 = arith.constant 0 : index
    %69 = vector.load %arg3[%c0_61, %c0_62, %c0_63] : memref<2x128x128xf32, #tpu.memory_space<vmem>>, vector<1x128x128xf32>
    %70 = vector.shape_cast %69 : vector<1x128x128xf32> to vector<128x128xf32>
    %cst_64 = arith.constant dense<0.000000e+00> : vector<8x128xf32>
    %71 = tpu.matmul %45, %70, %cst_64 {dimension_numbers = #tpu.dot_dimension_numbers<[1], [0], [0], [1], [0, 0, 1, 1], [], []>} : vector<8x128xf32>, vector<128x128xf32>, vector<8x128xf32> -> vector<8x128xf32>
    %72 = arith.addf %68, %71 : vector<8x128xf32>
    %73 = math.tanh %72 : vector<8x128xf32>
    %74 = vector.extract_strided_slice %73 {offsets = [0, 0], sizes = [8, 32], strides = [1, 1]} : vector<8x128xf32> to vector<8x32xf32>
    %c2_65 = arith.constant 2 : index
    %c0_66 = arith.constant 0 : index
    %c0_67 = arith.constant 0 : index
    %c0_68 = arith.constant 0 : index
    %75 = vector.load %arg6[%c2_65, %c0_66, %c0_67, %c0_68] : memref<4x2x8x32xf32, #tpu.memory_space<vmem>>, vector<1x1x8x32xf32>
    %76 = vector.shape_cast %75 : vector<1x1x8x32xf32> to vector<8x32xf32>
    %77 = vector.shape_cast %74 : vector<8x32xf32> to vector<1x1x8x32xf32>
    tpu.vector_store %arg6[%c2_65, %c0_66, %c0_67, %c0_68], %77 {strides = array<i32>} : memref<4x2x8x32xf32, #tpu.memory_space<vmem>>, vector<1x1x8x32xf32>,
    %c0_69 = arith.constant 0 : index
    %c0_70 = arith.constant 0 : index
    %c0_71 = arith.constant 0 : index
    %78 = vector.load %arg4[%c0_69, %c0_70, %c0_71] : memref<1x128x128xf32, #tpu.memory_space<vmem>>, vector<1x128x128xf32>
    %79 = vector.shape_cast %78 : vector<1x128x128xf32> to vector<128x128xf32>
    %cst_72 = arith.constant dense<0.000000e+00> : vector<8x128xf32>
    %80 = tpu.matmul %73, %79, %cst_72 {dimension_numbers = #tpu.dot_dimension_numbers<[1], [0], [0], [1], [0, 0, 1, 1], [], []>} : vector<8x128xf32>, vector<128x128xf32>, vector<8x128xf32> -> vector<8x128xf32>
    %c1_73 = arith.constant 1 : index
    %c0_74 = arith.constant 0 : index
    %c0_75 = arith.constant 0 : index
    %81 = vector.load %arg3[%c1_73, %c0_74, %c0_75] : memref<2x128x128xf32, #tpu.memory_space<vmem>>, vector<1x128x128xf32>
    %82 = vector.shape_cast %81 : vector<1x128x128xf32> to vector<128x128xf32>
    %cst_76 = arith.constant dense<0.000000e+00> : vector<8x128xf32>
    %83 = tpu.matmul %58, %82, %cst_76 {dimension_numbers = #tpu.dot_dimension_numbers<[1], [0], [0], [1], [0, 0, 1, 1], [], []>} : vector<8x128xf32>, vector<128x128xf32>, vector<8x128xf32> -> vector<8x128xf32>
    %84 = arith.addf %80, %83 : vector<8x128xf32>
    %85 = arith.addf %84, %10 : vector<8x128xf32>
    %86 = math.tanh %85 : vector<8x128xf32>
    %87 = vector.extract_strided_slice %86 {offsets = [0, 0], sizes = [8, 32], strides = [1, 1]} : vector<8x128xf32> to vector<8x32xf32>
    %c2_77 = arith.constant 2 : index
    %c1_78 = arith.constant 1 : index
    %c0_79 = arith.constant 0 : index
    %c0_80 = arith.constant 0 : index
    %88 = vector.load %arg6[%c2_77, %c1_78, %c0_79, %c0_80] : memref<4x2x8x32xf32, #tpu.memory_space<vmem>>, vector<1x1x8x32xf32>
    %89 = vector.shape_cast %88 : vector<1x1x8x32xf32> to vector<8x32xf32>
    %90 = vector.shape_cast %87 : vector<8x32xf32> to vector<1x1x8x32xf32>
    tpu.vector_store %arg6[%c2_77, %c1_78, %c0_79, %c0_80], %90 {strides = array<i32>} : memref<4x2x8x32xf32, #tpu.memory_space<vmem>>, vector<1x1x8x32xf32>,
    %91 = vector.extract_strided_slice %86 {offsets = [0, 0], sizes = [8, 32], strides = [1, 1]} : vector<8x128xf32> to vector<8x32xf32>
    %c2_81 = arith.constant 2 : index
    %c0_82 = arith.constant 0 : index
    %c0_83 = arith.constant 0 : index
    %92 = vector.load %arg7[%c2_81, %c0_82, %c0_83] : memref<4x8x32xf32, #tpu.memory_space<vmem>>, vector<1x8x32xf32>
    %93 = vector.shape_cast %92 : vector<1x8x32xf32> to vector<8x32xf32>
    %94 = vector.shape_cast %91 : vector<8x32xf32> to vector<1x8x32xf32>
    tpu.vector_store %arg7[%c2_81, %c0_82, %c0_83], %94 {strides = array<i32>} : memref<4x8x32xf32, #tpu.memory_space<vmem>>, vector<1x8x32xf32>,
    %c3 = arith.constant 3 : index
    %c0_84 = arith.constant 0 : index
    %c0_85 = arith.constant 0 : index
    %95 = vector.load %arg2[%c3, %c0_84, %c0_85] : memref<4x8x128xf32, #tpu.memory_space<vmem>>, vector<1x8x128xf32>
    %96 = vector.shape_cast %95 : vector<1x8x128xf32> to vector<8x128xf32>
    %c0_86 = arith.constant 0 : index
    %c0_87 = arith.constant 0 : index
    %c0_88 = arith.constant 0 : index
    %97 = vector.load %arg3[%c0_86, %c0_87, %c0_88] : memref<2x128x128xf32, #tpu.memory_space<vmem>>, vector<1x128x128xf32>
    %98 = vector.shape_cast %97 : vector<1x128x128xf32> to vector<128x128xf32>
    %cst_89 = arith.constant dense<0.000000e+00> : vector<8x128xf32>
    %99 = tpu.matmul %73, %98, %cst_89 {dimension_numbers = #tpu.dot_dimension_numbers<[1], [0], [0], [1], [0, 0, 1, 1], [], []>} : vector<8x128xf32>, vector<128x128xf32>, vector<8x128xf32> -> vector<8x128xf32>
    %100 = arith.addf %96, %99 : vector<8x128xf32>
    %101 = math.tanh %100 : vector<8x128xf32>
    %102 = vector.extract_strided_slice %101 {offsets = [0, 0], sizes = [8, 32], strides = [1, 1]} : vector<8x128xf32> to vector<8x32xf32>
    %c3_90 = arith.constant 3 : index
    %c0_91 = arith.constant 0 : index
    %c0_92 = arith.constant 0 : index
    %c0_93 = arith.constant 0 : index
    %103 = vector.load %arg6[%c3_90, %c0_91, %c0_92, %c0_93] : memref<4x2x8x32xf32, #tpu.memory_space<vmem>>, vector<1x1x8x32xf32>
    %104 = vector.shape_cast %103 : vector<1x1x8x32xf32> to vector<8x32xf32>
    %105 = vector.shape_cast %102 : vector<8x32xf32> to vector<1x1x8x32xf32>
    tpu.vector_store %arg6[%c3_90, %c0_91, %c0_92, %c0_93], %105 {strides = array<i32>} : memref<4x2x8x32xf32, #tpu.memory_space<vmem>>, vector<1x1x8x32xf32>,
    %c0_94 = arith.constant 0 : index
    %c0_95 = arith.constant 0 : index
    %c0_96 = arith.constant 0 : index
    %106 = vector.load %arg4[%c0_94, %c0_95, %c0_96] : memref<1x128x128xf32, #tpu.memory_space<vmem>>, vector<1x128x128xf32>
    %107 = vector.shape_cast %106 : vector<1x128x128xf32> to vector<128x128xf32>
    %cst_97 = arith.constant dense<0.000000e+00> : vector<8x128xf32>
    %108 = tpu.matmul %101, %107, %cst_97 {dimension_numbers = #tpu.dot_dimension_numbers<[1], [0], [0], [1], [0, 0, 1, 1], [], []>} : vector<8x128xf32>, vector<128x128xf32>, vector<8x128xf32> -> vector<8x128xf32>
    %c1_98 = arith.constant 1 : index
    %c0_99 = arith.constant 0 : index
    %c0_100 = arith.constant 0 : index
    %109 = vector.load %arg3[%c1_98, %c0_99, %c0_100] : memref<2x128x128xf32, #tpu.memory_space<vmem>>, vector<1x128x128xf32>
    %110 = vector.shape_cast %109 : vector<1x128x128xf32> to vector<128x128xf32>
    %cst_101 = arith.constant dense<0.000000e+00> : vector<8x128xf32>
    %111 = tpu.matmul %86, %110, %cst_101 {dimension_numbers = #tpu.dot_dimension_numbers<[1], [0], [0], [1], [0, 0, 1, 1], [], []>} : vector<8x128xf32>, vector<128x128xf32>, vector<8x128xf32> -> vector<8x128xf32>
    %112 = arith.addf %108, %111 : vector<8x128xf32>
    %113 = arith.addf %112, %10 : vector<8x128xf32>
    %114 = math.tanh %113 : vector<8x128xf32>
    %115 = vector.extract_strided_slice %114 {offsets = [0, 0], sizes = [8, 32], strides = [1, 1]} : vector<8x128xf32> to vector<8x32xf32>
    %c3_102 = arith.constant 3 : index
    %c1_103 = arith.constant 1 : index
    %c0_104 = arith.constant 0 : index
    %c0_105 = arith.constant 0 : index
    %116 = vector.load %arg6[%c3_102, %c1_103, %c0_104, %c0_105] : memref<4x2x8x32xf32, #tpu.memory_space<vmem>>, vector<1x1x8x32xf32>
    %117 = vector.shape_cast %116 : vector<1x1x8x32xf32> to vector<8x32xf32>
    %118 = vector.shape_cast %115 : vector<8x32xf32> to vector<1x1x8x32xf32>
    tpu.vector_store %arg6[%c3_102, %c1_103, %c0_104, %c0_105], %118 {strides = array<i32>} : memref<4x2x8x32xf32, #tpu.memory_space<vmem>>, vector<1x1x8x32xf32>,
    %119 = vector.extract_strided_slice %114 {offsets = [0, 0], sizes = [8, 32], strides = [1, 1]} : vector<8x128xf32> to vector<8x32xf32>
    %c3_106 = arith.constant 3 : index
    %c0_107 = arith.constant 0 : index
    %c0_108 = arith.constant 0 : index
    %120 = vector.load %arg7[%c3_106, %c0_107, %c0_108] : memref<4x8x32xf32, #tpu.memory_space<vmem>>, vector<1x8x32xf32>
    %121 = vector.shape_cast %120 : vector<1x8x32xf32> to vector<8x32xf32>
    %122 = vector.shape_cast %119 : vector<8x32xf32> to vector<1x8x32xf32>
    tpu.vector_store %arg7[%c3_106, %c0_107, %c0_108], %122 {strides = array<i32>} : memref<4x8x32xf32, #tpu.memory_space<vmem>>, vector<1x8x32xf32>,
    %c0_109 = arith.constant 0 : index
    %c0_110 = arith.constant 0 : index
    %c0_111 = arith.constant 0 : index
    %123 = vector.load %arg8[%c0_109, %c0_110, %c0_111] : memref<2x8x128xf32, #tpu.memory_space<vmem>>, vector<1x8x128xf32>
    %124 = vector.shape_cast %123 : vector<1x8x128xf32> to vector<8x128xf32>
    %125 = vector.shape_cast %101 : vector<8x128xf32> to vector<1x8x128xf32>
    tpu.vector_store %arg8[%c0_109, %c0_110, %c0_111], %125 {strides = array<i32>} : memref<2x8x128xf32, #tpu.memory_space<vmem>>, vector<1x8x128xf32>,
    %c1_112 = arith.constant 1 : index
    %c0_113 = arith.constant 0 : index
    %c0_114 = arith.constant 0 : index
    %126 = vector.load %arg8[%c1_112, %c0_113, %c0_114] : memref<2x8x128xf32, #tpu.memory_space<vmem>>, vector<1x8x128xf32>
    %127 = vector.shape_cast %126 : vector<1x8x128xf32> to vector<8x128xf32>
    %128 = vector.shape_cast %114 : vector<8x128xf32> to vector<1x8x128xf32>
    tpu.vector_store %arg8[%c1_112, %c0_113, %c0_114], %128 {strides = array<i32>} : memref<2x8x128xf32, #tpu.memory_space<vmem>>, vector<1x8x128xf32>,
    return
  }
  func.func @transform_0(%arg0: i32, %arg1: i32) -> (i32, i32, i32) {
    %c0_i32 = arith.constant 0 : i32
    %c0_i32_0 = arith.constant 0 : i32
    return %arg1, %arg0, %c0_i32 : i32, i32, i32
  }
  func.func @transform_1(%arg0: i32, %arg1: i32) -> (i32, i32, i32) {
    %c0_i32 = arith.constant 0 : i32
    %c0_i32_0 = arith.constant 0 : i32
    %c0_i32_1 = arith.constant 0 : i32
    %c0_i32_2 = arith.constant 0 : i32
    return %c0_i32, %c0_i32_0, %c0_i32_1 : i32, i32, i32
  }
  func.func @transform_2(%arg0: i32, %arg1: i32) -> (i32, i32, i32) {
    %c0_i32 = arith.constant 0 : i32
    %c0_i32_0 = arith.constant 0 : i32
    %c0_i32_1 = arith.constant 0 : i32
    %c0_i32_2 = arith.constant 0 : i32
    return %c0_i32, %c0_i32_0, %c0_i32_1 : i32, i32, i32
  }
  func.func @transform_3(%arg0: i32, %arg1: i32) -> (i32, i32, i32) {
    %c0_i32 = arith.constant 0 : i32
    %c0_i32_0 = arith.constant 0 : i32
    %c0_i32_1 = arith.constant 0 : i32
    %c0_i32_2 = arith.constant 0 : i32
    return %c0_i32, %c0_i32_0, %c0_i32_1 : i32, i32, i32
  }
  func.func @transform_4(%arg0: i32, %arg1: i32) -> (i32, i32, i32, i32) {
    %c0_i32 = arith.constant 0 : i32
    %c0_i32_0 = arith.constant 0 : i32
    %c0_i32_1 = arith.constant 0 : i32
    return %arg1, %c0_i32, %arg0, %c0_i32_0 : i32, i32, i32, i32
  }
  func.func @transform_5(%arg0: i32, %arg1: i32) -> (i32, i32, i32) {
    %c0_i32 = arith.constant 0 : i32
    %c0_i32_0 = arith.constant 0 : i32
    return %arg1, %arg0, %c0_i32 : i32, i32, i32
  }
}

</mosaic_0001>

<bundles_post_ra>
// kernel: tpu_custom_call.1
= control target key start
LH: loop header
LB: loop body
LE: loop exit
PB: predicated region body
PF: predicated region fallthrough
CT: control target
= control target key end

     0   :  { %s3375_s0 = inlined_call_operand.hbm [shape: f32[8,8,128], index: 0, kind: input, shape index: {}]   ;;  %s3376_s1 = inlined_call_operand.hbm [shape: f32[2,128,128], index: 1, kind: input, shape index: {}]   ;;  %s3377_s2 = inlined_call_operand.hbm [shape: f32[1,128,128], index: 2, kind: input, shape index: {}]   ;;  %s3378_s3 = inlined_call_operand.vmem [shape: f32[1,1,128], index: 3, kind: input, shape index: {}]   ;;  %s3379_s4 = inlined_call_operand.hbm [shape: f32[8,2,8,32], index: 4, kind: output, shape index: {0}]   ;;  %s3380_s5 = inlined_call_operand.hbm [shape: f32[8,8,32], index: 5, kind: output, shape index: {1}]  }
   0x1   :  { %3383 = sst [smem:[#allocation16_spill]] %s3376_s1 }
   0x2   :  { %11 = vsyncpa [#allocation4], 0 }
   0x3   :  { %13 = vsyncpa [#allocation4 + $0x1], 0 }
   0x4   :  { %14 = vsyncpa [#allocation7], 0 }
   0x5   :  { %15 = vsyncpa [#allocation5], 0 }
   0x6   :  { %17 = vsyncpa [#allocation5 + $0x1], 0 }
   0x7   :  { %18 = vsyncpa [#allocation11], 0 }
   0x8   :  { %20 = vsyncpa [#allocation11 + $0x1], 0  ;;  %s2594_s18 = smov 0   ;;  %s2596_s19 = smov 0  }
   0x9   :  { %s2598_s20 = smov 0   ;;  %s2600_s21 = smov 0  }
   0xa   :  { %s2602_s22 = smov 0   ;;  %s2604_s23 = smov 0  }
   0xb LB: > { %s1578_s24 = sadd.s32 4294967295, %s2550_s23   ;;  %s1579_s25 = sadd.s32 4294967294, %s2550_s23   ;;  %s2550_s23 = sphi %s2604_s23, %s26_s23   ;;  %s2546_s22 = sphi %s2602_s22, %s3401_s22   ;;  %s2542_s21 = sphi %s2600_s21, %s3400_s21   ;;  %s2538_s20 = sphi %s2598_s20, %s3399_s20   ;;  %s2534_s19 = sphi %s2596_s19, %s3398_s19   ;;  %s2530_s18 = sphi %s2594_s18, %s3397_s18  }
   0xc   : > { %p60_p0 = scmp.ne.s32.totalorder %s2534_s19, %s2530_s18  ;;  %p2628_p1 = scmp.eq.s32.totalorder %s1578_s24, 0 }
   0xd   : > { %p2632_p2 = scmp.eq.s32.totalorder %s1578_s24, 1  ;;  %p155_p3 = scmp.eq.s32.totalorder %s1579_s25, 1 }
   0xe   : > { %p2638_p4 = por %p2628_p1, %p60_p0  ;;  %p1580_p5 = scmp.ge.s32.totalorder %s2550_s23, 1 }
   0xf   : > { %p2643_p6 = por %p155_p3, %p60_p0  ;;  %p190_p7 = scmp.lt.s32.totalorder %s2550_s23, 3 }
  0x10   : > { %s2552_s6 = smov [#allocation6]   ;;  %s2553_s9 = smov [#allocation8]  }
  0x11   : > { %s3387_s29 = scalar_select %p2643_p6, 1, 0 }
  0x12   : > { %p2648_p8 = pnand %p1580_p5, %p190_p7  ;;  %s202_s7 = sshll.u32 %s2552_s6, 4  ;;  %s203_s7 = int_to_ptr.vmem [resolvable:$true] %s202_s7 }
  0x13   : > { %s215_s10 = sshll.u32 %s2553_s9, 4  ;;  %s2367_s11 = scalar_lea.vmem %s203_s7, 4096  ;;  %s216_s10 = int_to_ptr.vmem [resolvable:$true] %s215_s10 }
  0x14   : > { %p2259_p9 = pneg %p2648_p8  ;;  %p2368_p13 = scmp.ne.s32.totalorder %s203_s7, %s2367_s11 }
  0x15   : > { %p2375_p5 = scmp.lt.s32.totalorder %s203_s7, %s203_s7  ;;  %p2376_p7 = scmp.lt.s32.totalorder %s2367_s11, %s2367_s11 }
  0x16   : > { %p2657_p11 = pnand %p2259_p9, %p2628_p1 }
  0x17   : > { %p2377_p10 = por %p2376_p7, %p2375_p5 }
  0x18   : > { %p2358_p12 = pneg %p2657_p11 }
  0x1a   : > { %p2370_p0 = pnand %p2368_p13, %p2358_p12 }
  0x1c   : > { %p2371_p3 = pneg %p2370_p0 }
  0x1e   : > { %p2378_p9 = pnand %p2377_p10, %p2371_p3 }
  0x20   : > { %2381 = shalt.err (!%p2378_p9)
}
  0x21   : > { %s3381_s12 = smov 128   ;;  %s3382_s13 = smov 8  }
  0x22   : > { %s3390_s1 = sld [smem:[#allocation16_spill]]  ;;  %s2393_s16 = scalar_lea.vmem %s216_s10, 2048 }
  0x23   : > { %p2394_p13 = scmp.ne.s32.totalorder %s216_s10, %s2393_s16  ;;  %p2401_p10 = scmp.lt.s32.totalorder %s216_s10, %s216_s10 }
  0x24   : > { %p2402_p3 = scmp.lt.s32.totalorder %s2393_s16, %s2393_s16 }
  0x25   : > { %p2396_p0 = pnand %p2394_p13, %p2358_p12 }
  0x26   : > { %p2403_p7 = por %p2402_p3, %p2401_p10 }
  0x27   : > { %p2397_p5 = pneg %p2396_p0 }
  0x28   : > { %2262 = dma.hbm_to_vmem [thread:$0]  (!%p2657_p11), %s3390_s1, 4096, %s203_s7, [#allocation7], %s3381_s12, %s3381_s12, %s3382_s13  }
  0x29   : > { %p2404_p9 = pnand %p2403_p7, %p2397_p5 }
  0x2b   : > { %2407 = shalt.err (!%p2404_p9)
}
  0x2c   : > { %2265 = dma.hbm_to_vmem [thread:$0]  (!%p2657_p11), %s3377_s2, 2048, %s216_s10, [#allocation7], %s3381_s12, %s3381_s12, %s3382_s13  }
  0x2d   : > { %s35_s25 = sadd.s32 1, %s2546_s22  ;;  %s47_s6 = sadd.s32 1, %s2538_s20 }
  0x2e   : > { %p36_p12 = scmp.ge.s32.totalorder %s35_s25, 2  ;;  %p54_p13 = scmp.ne.s32.totalorder %s2538_s20, %s2534_s19 }
  0x2f   : > { %p55_p0 = scmp.eq.s32.totalorder %s2550_s23, 0  ;;  %p2279_p5 = scmp.lt.s32.totalorder %s2550_s23, 2 }
  0x30   : > { %s3403_s25 = smov (%p36_p12, %s35_s25), 0  ;;  %p2695_p3 = por %p2632_p2, %p54_p13 }
  0x31   : > { %p56_p10 = por %p55_p0, %p54_p13  ;;  %s42_s8 = ssub.s32 %s2546_s22, %s3403_s25 }
  0x32   : > { %s232_s9 = sand.u32 1, %s2538_s20   ;;  %p45_p7 = scmp.eq.s32.totalorder %s42_s8, 0 }
  0x33   : > { %s1584_s10 = sshll.u32 %s232_s9, 5  ;;  %s1617_s11 = sshll.u32 %s2546_s22, 9 }
  0x34   : > { %s2704_s14 = scalar_select %p45_p7, %s2538_s20, %s47_s6  }
  0x35   : > { %s243_s17 = scalar_lea.hbm %s3375_s0, %s1617_s11  ;;  %s236_s24 = scalar_lea.vmem [#allocation3], %s1584_s10 }
  0x36   : > { %s244_s12 = sshll.u32 %s236_s24, 4  ;;  %p2711_p11 = pnand %p2279_p5, %p56_p10  ;;  %s245_s12 = int_to_ptr.vmem [resolvable:$true] %s244_s12 }
  0x37   : > { %s233_s13 = scalar_lea.sflag [#allocation4], %s232_s9  ;;  %s2421_s8 = scalar_lea.vmem %s245_s12, 512 }
  0x38   : > { %p2410_p2 = pneg %p2711_p11  ;;  %p2422_p9 = scmp.ne.s32.totalorder %s245_s12, %s2421_s8 }
  0x39   : > { %s2556_s6 = smov [#allocation3]  }
  0x3a   : > { %p2424_p12 = pnand %p2422_p9, %p2410_p2  ;;  %s2426_s1 = sshll.u32 %s2556_s6, 4  ;;  %s2427_s1 = int_to_ptr.vmem [resolvable:$false] %s2426_s1 }
  0x3b   : > { %s2428_s11 = scalar_lea.vmem %s2427_s1, 1024  ;;  %p2429_p0 = scmp.lt.s32.totalorder %s245_s12, %s2427_s1 }
  0x3c   : > { %p2425_p13 = pneg %p2424_p12  ;;  %p2430_p7 = scmp.lt.s32.totalorder %s2428_s11, %s2421_s8 }
  0x3e   : > { %p2431_p6 = por %p2430_p7, %p2429_p0 }
  0x40   : > { %p2432_p5 = pnand %p2431_p6, %p2425_p13 }
  0x42   : > { %2435 = shalt.err (!%p2432_p5)
}
  0x43   : > { %s3393_s10 = smov 8   ;;  %s3394_s15 = smov 128  }
  0x44   : > { %2269 = dma.hbm_to_vmem [thread:$0]  (!%p2711_p11), %s243_s17, 512, %s245_s12, %s233_s13, %s3394_s15, %s3394_s15, %s3393_s10  }
  0x45   : > { %256 = sbr.rel (%p2648_p8) target bundleno = 1241 (0x4d9), region = 36  ;;  %s2725_s9 = sand.u32 (!%p2648_p8), 1, %s2534_s19  }
  0x46   : > { %s1588_s1 = sshll.u32 (!%p2648_p8), %s2725_s9, 5  ;;  %s259_s16 = scalar_lea.sflag (!%p2648_p8), [#allocation4], %s2725_s9 }
  0x47   : > { %s2729_s24 = scalar_lea.vmem (!%p2648_p8), [#allocation3], %s1588_s1 }
  0x4a   : > { %2513 = dma.done.wait (%p2638_p4), %s259_s16, 512  }
  0x4b   : > { %2515 = vsyncadd (%p2638_p4), %s259_s16, 4294966784 }
  0x4c   : > { %2517 = dma.done.wait (%p2628_p1), [#allocation7], 6144  }
  0x4d   : > { %2519 = vsyncadd (%p2628_p1), [#allocation7], 4294961152  ;;  %s1591_s30 = sshll.u32 %s2725_s9, 6  ;;  %s2742_s13 = scalar_lea.vmem [#allocation10], %s1588_s1 }
  0x4e   : > { %s2740_s12 = scalar_lea.vmem [#allocation9], %s1591_s30  ;;  %p1593_p6 = scmp.ne.s32.totalorder %s2542_s21, 0 }
  0x50   : > { %308 = sbr.rel (%p1593_p6) target bundleno = 87 (0x57), region = 52 }
  0x55   : > { %v2557_v0 = vmov 0.0  }
  0x56   : > { %309 = vst [vmem:[#allocation2] sm:$0xff] %v2557_v0  ;;  %310 = vst [vmem:[#allocation2 + $0x8] sm:$0xff] %v2557_v0 }
  0x57 PF: > { %v2745_v1 = vld [vmem:[#allocation6 + $0x78] sm:$0xff]  ;;  %v2558_v2 = vmov 0.0   ;;  %v2748_v3 = vld [vmem:[#allocation6 + $0x70] sm:$0xff]  ;;  %vm2559_vm0 = vmmov 0   ;;  %v2755_v4 = vld [vmem:[#allocation6 + $0x68] sm:$0xff]  ;;  %vm410_vm1 = vcmask 261120  }
  0x58   : > { %1825 = vmatprep.subr.mxu0 %v2558_v2  ;;  %1857 = vmatprep.mubr.msk.f32.mxu0 %vm2559_vm0, %v2558_v2  ;;  %v2761_v5 = vld [vmem:[#allocation6 + $0x60] sm:$0xff]  ;;  %v2763_v6 = vld [vmem:[#allocation6 + $0xf8] sm:$0xff]  ;;  %v2767_v7 = vld [vmem:[#allocation6 + $0xf0] sm:$0xff]  ;;  %s1619_s17 = sshll.u32 %s2542_s21, 10  ;;  %s1423_s27 = sshll.u32 %s2740_s12, 4  ;;  %s3289_s27 = int_to_ptr.vmem [resolvable:$true] %s1423_s27 }
  0x59   : > { %1826 = vmatpush3.msra.mxu0 %v2745_v1  ;;  %1860 = vmatprep.subr.mxu1 %v2558_v2  ;;  %v2770_v8 = vld [vmem:[#allocation6 + $0x58] sm:$0xff]  ;;  %v2773_v9 = vld [vmem:[#allocation6 + $0xe8] sm:$0xff]  ;;  %v2778_v10 = vld [vmem:[#allocation6 + $0x50] sm:$0xff]  ;;  %s3285_s11 = scalar_lea.hbm %s3379_s4, %s1619_s17  ;;  %s1620_s10 = sshll.u32 %s2542_s21, 9 }
  0x5a   : > { %1827 = vmatprep.subr.mxu0 %v2558_v2  ;;  %1892 = vmatprep.mubr.msk.f32.mxu1 %vm2559_vm0, %v2558_v2  ;;  %v2781_v11 = vld [vmem:[#allocation6 + $0xe0] sm:$0xff]  ;;  %v2786_v12 = vld [vmem:[#allocation6 + $0x48] sm:$0xff]  ;;  %v2789_v13 = vld [vmem:[#allocation6 + $0xd8] sm:$0xff]  ;;  %s1440_s15 = sshll.u32 %s2742_s13, 4  ;;  %s1403_s21 = scalar_lea.sflag [#allocation5], %s2725_s9  ;;  %s3296_s15 = int_to_ptr.vmem [resolvable:$true] %s1440_s15 }
  0x5b   : > { %1828 = vmatpush3.msra.mxu0 %v2748_v3  ;;  %1861 = vmatpush3.msra.mxu1 %v2763_v6  ;;  %v2794_v14 = vld [vmem:[#allocation6 + $0x40] sm:$0xff]  ;;  %v2797_v15 = vld [vmem:[#allocation6 + $0xd0] sm:$0xff]  ;;  %v2802_v16 = vld [vmem:[#allocation6 + $0x38] sm:$0xff]  ;;  %s2436_s30 = scalar_lea.vmem %s3289_s27, 1024  ;;  %s2560_s26 = smov [#allocation9]  }
  0x5c   : > { %1829 = vmatprep.subr.mxu0 %v2558_v2  ;;  %1862 = vmatprep.subr.mxu1 %v2558_v2  ;;  %v2805_v17 = vld [vmem:[#allocation6 + $0xc8] sm:$0xff]  ;;  %v2810_v18 = vld [vmem:[#allocation6 + $0x30] sm:$0xff]  ;;  %v2813_v19 = vld [vmem:[#allocation6 + $0xc0] sm:$0xff]  ;;  %p2437_p1 = scmp.ne.s32.totalorder %s3289_s27, %s2436_s30  ;;  %s2440_s28 = sshll.u32 %s2560_s26, 4  ;;  %s2441_s28 = int_to_ptr.vmem [resolvable:$false] %s2440_s28 }
  0x5d   : > { %1830 = vmatpush3.msra.mxu0 %v2755_v4  ;;  %1863 = vmatpush3.msra.mxu1 %v2767_v7  ;;  %v2818_v20 = vld [vmem:[#allocation6 + $0x28] sm:$0xff]  ;;  %v2821_v21 = vld [vmem:[#allocation6 + $0xb8] sm:$0xff]  ;;  %v2826_v22 = vld [vmem:[#allocation6 + $0x20] sm:$0xff]  ;;  %s2442_s17 = scalar_lea.vmem %s2441_s28, 2048  ;;  %p2443_p10 = scmp.lt.s32.totalorder %s3289_s27, %s2441_s28 }
  0x5e   : > { %1831 = vmatprep.subr.mxu0 %v2558_v2  ;;  %1864 = vmatprep.subr.mxu1 %v2558_v2  ;;  %v2829_v23 = vld [vmem:[#allocation6 + $0xb0] sm:$0xff]  ;;  %v2834_v24 = vld [vmem:[#allocation6 + $0x18] sm:$0xff]  ;;  %v2837_v25 = vld [vmem:[#allocation6 + $0xa8] sm:$0xff]  ;;  %p2438_p4 = pnand %p2437_p1, %p2695_p3  ;;  %p2444_p11 = scmp.lt.s32.totalorder %s2442_s17, %s2436_s30 }
  0x5f   : > { %1832 = vmatpush3.msra.mxu0 %v2761_v5  ;;  %1865 = vmatpush3.msra.mxu1 %v2773_v9  ;;  %v2842_v26 = vld [vmem:[#allocation6 + $0x10] sm:$0xff]  ;;  %v2845_v27 = vld [vmem:[#allocation6 + $0xa0] sm:$0xff]  ;;  %v2850_v28 = vld [vmem:[#allocation6 + $0x8] sm:$0xff] }
  0x60   : > { %1833 = vmatprep.subr.mxu0 %v2558_v2  ;;  %1866 = vmatprep.subr.mxu1 %v2558_v2  ;;  %v2853_v29 = vld [vmem:[#allocation6 + $0x98] sm:$0xff]  ;;  %v2858_v30 = vld [vmem:[#allocation6] sm:$0xff]  ;;  %v2861_v31 = vld [vmem:[#allocation6 + $0x90] sm:$0xff]  ;;  %p2439_p8 = pneg %p2438_p4  ;;  %p2445_p2 = por %p2444_p11, %p2443_p10 }
  0x61   : > { %1834 = vmatpush3.msra.mxu0 %v2770_v8  ;;  %1867 = vmatpush3.msra.mxu1 %v2781_v11  ;;  %v311_v32 = vld [vmem:[#allocation2] sm:$0xff]  ;;  %v2867_v33 = vld [vmem:[#allocation6 + $0x88] sm:$0xff]  ;;  %v2871_v34 = vld [vmem:[#allocation8 + $0x78] sm:$0xff] }
  0x62   : > { %1835 = vmatprep.subr.mxu0 %v2558_v2  ;;  %1868 = vmatprep.subr.mxu1 %v2558_v2  ;;  %v2874_v35 = vld [vmem:[#allocation6 + $0x80] sm:$0xff]  ;;  %v313_v36 = vld [vmem:[#allocation2 + $0x8] sm:$0xff]  ;;  %v2880_v37 = vld [vmem:[#allocation8 + $0x70] sm:$0xff]  ;;  %p2446_p9 = pnand %p2445_p2, %p2439_p8 }
  0x63   : > { %1836 = vmatpush3.msra.mxu0 %v2778_v10  ;;  %1869 = vmatpush3.msra.mxu1 %v2789_v13  ;;  %v2885_v38 = vld [vmem:[#allocation8 + $0x68] sm:$0xff]  ;;  %v2891_v39 = vld [vmem:[#allocation8 + $0x60] sm:$0xff]  ;;  %v2897_v40 = vld [vmem:[#allocation8 + $0x58] sm:$0xff] }
  0x64   : > { %1837 = vmatprep.subr.mxu0 %v2558_v2  ;;  %1870 = vmatprep.subr.mxu1 %v2558_v2  ;;  %v2903_v41 = vld [vmem:[#allocation8 + $0x50] sm:$0xff]  ;;  %v2909_v42 = vld [vmem:[#allocation8 + $0x48] sm:$0xff]  ;;  %v2943_v43 = vld [vmem:[#allocation8 + $0x40] sm:$0xff] }
  0x65   : > { %1838 = vmatpush3.msra.mxu0 %v2786_v12  ;;  %1871 = vmatpush3.msra.mxu1 %v2797_v15  ;;  %v2947_v44 = vld [vmem:[#allocation8 + $0x38] sm:$0xff]  ;;  %v2951_v45 = vld [vmem:[#allocation8 + $0x30] sm:$0xff]  ;;  %v2955_v46 = vld [vmem:[#allocation8 + $0x28] sm:$0xff] }
  0x66   : > { %1839 = vmatprep.subr.mxu0 %v2558_v2  ;;  %1872 = vmatprep.subr.mxu1 %v2558_v2  ;;  %v2959_v47 = vld [vmem:[#allocation8 + $0x20] sm:$0xff]  ;;  %v2963_v48 = vld [vmem:[#allocation8 + $0x18] sm:$0xff]  ;;  %v2967_v49 = vld [vmem:[#allocation8 + $0x10] sm:$0xff] }
  0x67   : > { %1840 = vmatpush3.msra.mxu0 %v2794_v14  ;;  %1873 = vmatpush3.msra.mxu1 %v2805_v17  ;;  %v2971_v50 = vld [vmem:[#allocation8 + $0x8] sm:$0xff]  ;;  %v2975_v51 = vld [vmem:[#allocation8] sm:$0xff]  ;;  %v3056_v60 = vld [vmem:[%s3378_s3] ss:$0 sm:$0xff] }
  0x68   : > { %1841 = vmatprep.subr.mxu0 %v2558_v2  ;;  %1874 = vmatprep.subr.mxu1 %v2558_v2  ;;  %v321_v52 = vld [vmem:[%s2729_s24] sm:$0xff]  ;;  %v1596_v59 = vld [vmem:[%s2729_s24 + $0x8] sm:$0xff] }
  0x69   : > { %1842 = vmatpush3.msra.mxu0 %v2802_v16  ;;  %1875 = vmatpush3.msra.mxu1 %v2813_v19 }
  0x6a   : > { %1843 = vmatprep.subr.mxu0 %v2558_v2  ;;  %1876 = vmatprep.subr.mxu1 %v2558_v2 }
  0x6b   : > { %1844 = vmatpush3.msra.mxu0 %v2810_v18  ;;  %1877 = vmatpush3.msra.mxu1 %v2821_v21 }
  0x6c   : > { %1845 = vmatprep.subr.mxu0 %v2558_v2  ;;  %1878 = vmatprep.subr.mxu1 %v2558_v2 }
  0x6d   : > { %1846 = vmatpush3.msra.mxu0 %v2818_v20  ;;  %1879 = vmatpush3.msra.mxu1 %v2829_v23 }
  0x6e   : > { %1847 = vmatprep.subr.mxu0 %v2558_v2  ;;  %1880 = vmatprep.subr.mxu1 %v2558_v2 }
  0x6f   : > { %1848 = vmatpush3.msra.mxu0 %v2826_v22  ;;  %1881 = vmatpush3.msra.mxu1 %v2837_v25 }
  0x70   : > { %1849 = vmatprep.subr.mxu0 %v2558_v2  ;;  %1882 = vmatprep.subr.mxu1 %v2558_v2 }
  0x71   : > { %1850 = vmatpush3.msra.mxu0 %v2834_v24  ;;  %1883 = vmatpush3.msra.mxu1 %v2845_v27 }
  0x72   : > { %1851 = vmatprep.subr.mxu0 %v2558_v2  ;;  %1884 = vmatprep.subr.mxu1 %v2558_v2 }
  0x73   : > { %1852 = vmatpush3.msra.mxu0 %v2842_v26  ;;  %1885 = vmatpush3.msra.mxu1 %v2853_v29 }
  0x74   : > { %1853 = vmatprep.subr.mxu0 %v2558_v2  ;;  %1886 = vmatprep.subr.mxu1 %v2558_v2 }
  0x75   : > { %1854 = vmatpush3.msra.mxu0 %v2850_v28  ;;  %1887 = vmatpush3.msra.mxu1 %v2861_v31 }
  0x76   : > { %1855 = vmatprep.subr.mxu0 %v2558_v2  ;;  %1888 = vmatprep.subr.mxu1 %v2558_v2 }
  0x77   : > { %1856 = vmatpush3.msra.mxu0 %v2858_v30  ;;  %1889 = vmatpush3.msra.mxu1 %v2867_v33 }
  0x78   : > { %1858 = vmatmul.mubr.f32.vlgmr.msra.gmra.mxu0 %v311_v32  ;;  %1895 = vmatprep.subr.mxu0 %v2558_v2 }
  0x79   : > { %1890 = vmatprep.subr.mxu1 %v2558_v2  ;;  %1896 = vmatpush3.msra.mxu0 %v2871_v34 }
  0x7a   : > { %1891 = vmatpush3.msra.mxu1 %v2874_v35  ;;  %1897 = vmatprep.subr.mxu0 %v2558_v2 }
  0x7b   : > { %1930 = vmatprep.subr.mxu1 %v2558_v2  ;;  %1893 = vmatmul.mubr.f32.vlgmr.msra.gmra.mxu1 %v313_v36 }
  0x7c   : > { %1931 = vmatpush3.msra.mxu1 %v2745_v1  ;;  %1898 = vmatpush3.msra.mxu0 %v2880_v37 }
  0x7d   : > { %1932 = vmatprep.subr.mxu1 %v2558_v2  ;;  %1899 = vmatprep.subr.mxu0 %v2558_v2 }
  0x7e   : > { %1933 = vmatpush3.msra.mxu1 %v2748_v3  ;;  %1900 = vmatpush3.msra.mxu0 %v2885_v38 }
  0x7f   : > { %1934 = vmatprep.subr.mxu1 %v2558_v2  ;;  %1901 = vmatprep.subr.mxu0 %v2558_v2 }
  0x80   : > { %1935 = vmatpush3.msra.mxu1 %v2755_v4  ;;  %1902 = vmatpush3.msra.mxu0 %v2891_v39 }
  0x81   : > { %1936 = vmatprep.subr.mxu1 %v2558_v2  ;;  %1903 = vmatprep.subr.mxu0 %v2558_v2 }
  0x82   : > { %1937 = vmatpush3.msra.mxu1 %v2761_v5  ;;  %1904 = vmatpush3.msra.mxu0 %v2897_v40 }
  0x83   : > { %1938 = vmatprep.subr.mxu1 %v2558_v2  ;;  %1905 = vmatprep.subr.mxu0 %v2558_v2 }
  0x84   : > { %1939 = vmatpush3.msra.mxu1 %v2770_v8  ;;  %1906 = vmatpush3.msra.mxu0 %v2903_v41 }
  0x85   : > { %1940 = vmatprep.subr.mxu1 %v2558_v2  ;;  %1907 = vmatprep.subr.mxu0 %v2558_v2 }
  0x86   : > { %1941 = vmatpush3.msra.mxu1 %v2778_v10  ;;  %1908 = vmatpush3.msra.mxu0 %v2909_v42 }
  0x87   : > { %1942 = vmatprep.subr.mxu1 %v2558_v2  ;;  %1909 = vmatprep.subr.mxu0 %v2558_v2 }
  0x88   : > { %1943 = vmatpush3.msra.mxu1 %v2786_v12  ;;  %1927 = vmatprep.mubr.msk.f32.mxu0 %vm2559_vm0, %v2558_v2 }
  0x89   : > { %1944 = vmatprep.subr.mxu1 %v2558_v2  ;;  %1962 = vmatprep.mubr.msk.f32.mxu1 %vm2559_vm0, %v2558_v2 }
  0x8a   : > { %1945 = vmatpush3.msra.mxu1 %v2794_v14  ;;  %1910 = vmatpush3.msra.mxu0 %v2943_v43 }
  0x8b   : > { %1946 = vmatprep.subr.mxu1 %v2558_v2  ;;  %1911 = vmatprep.subr.mxu0 %v2558_v2 }
  0x8c   : > { %1947 = vmatpush3.msra.mxu1 %v2802_v16  ;;  %1912 = vmatpush3.msra.mxu0 %v2947_v44 }
  0x8d   : > { %1948 = vmatprep.subr.mxu1 %v2558_v2  ;;  %1913 = vmatprep.subr.mxu0 %v2558_v2 }
  0x8e   : > { %1949 = vmatpush3.msra.mxu1 %v2810_v18  ;;  %1914 = vmatpush3.msra.mxu0 %v2951_v45 }
  0x8f   : > { %1950 = vmatprep.subr.mxu1 %v2558_v2  ;;  %1915 = vmatprep.subr.mxu0 %v2558_v2 }
  0x90   : > { %1951 = vmatpush3.msra.mxu1 %v2818_v20  ;;  %1916 = vmatpush3.msra.mxu0 %v2955_v46 }
  0x91   : > { %1952 = vmatprep.subr.mxu1 %v2558_v2  ;;  %1917 = vmatprep.subr.mxu0 %v2558_v2 }
  0x92   : > { %1953 = vmatpush3.msra.mxu1 %v2826_v22  ;;  %1918 = vmatpush3.msra.mxu0 %v2959_v47 }
  0x93   : > { %1954 = vmatprep.subr.mxu1 %v2558_v2  ;;  %1919 = vmatprep.subr.mxu0 %v2558_v2 }
  0x94   : > { %1955 = vmatpush3.msra.mxu1 %v2834_v24  ;;  %1920 = vmatpush3.msra.mxu0 %v2963_v48 }
  0x95   : > { %1956 = vmatprep.subr.mxu1 %v2558_v2  ;;  %1921 = vmatprep.subr.mxu0 %v2558_v2 }
  0x96   : > { %1957 = vmatpush3.msra.mxu1 %v2842_v26  ;;  %1922 = vmatpush3.msra.mxu0 %v2967_v49 }
  0x97   : > { %1958 = vmatprep.subr.mxu1 %v2558_v2  ;;  %1923 = vmatprep.subr.mxu0 %v2558_v2 }
  0x98   : > { %1959 = vmatpush3.msra.mxu1 %v2850_v28  ;;  %1924 = vmatpush3.msra.mxu0 %v2971_v50 }
  0x99   : > { %1960 = vmatprep.subr.mxu1 %v2558_v2  ;;  %1925 = vmatprep.subr.mxu0 %v2558_v2 }
  0x9a   : > { %1961 = vmatpush3.msra.mxu1 %v2858_v30  ;;  %1926 = vmatpush3.msra.mxu0 %v2975_v51 }
  0x9b   : > { %2000 = vmatprep.subr.mxu1 %v2558_v2  ;;  %1965 = vmatprep.subr.mxu0 %v2558_v2 }
 0x138   : > { %v404_v53 = vpop.f32.mrf.mxu0 }
 0x139   : > { %v408_v54 = vadd.f32 %v404_v53, %v321_v52 }
 0x13a   : > { %v1859_v55 = vpop.f32.mrf.mxu0 }
 0x13b   : > { %2340 = vtanh.f32 %v408_v54  ;;  %v2980_v56 = vpop.f32.mrf.mxu1 }
 0x13d   : > { %v1894_v57 = vpop.f32.mrf.mxu1 }
 0x148   : > { %v2341_v58 = vpop.eup %2340 }
 0x149   : > { %411 = vst.msk [vmem:[%s2740_s12] sm:$0xff] %vm410_vm1, %v2341_v58  ;;  %1928 = vmatmul.mubr.f32.vlgmr.msra.gmra.mxu0 %v2341_v58  ;;  %1963 = vmatmul.mubr.f32.vlgmr.msra.gmra.mxu1 %v2341_v58 }
 0x14a   : > { %2001 = vmatpush3.msra.mxu1 %v2871_v34  ;;  %1966 = vmatpush3.msra.mxu0 %v2763_v6 }
 0x14b   : > { %2002 = vmatprep.subr.mxu1 %v2558_v2  ;;  %1967 = vmatprep.subr.mxu0 %v2558_v2 }
 0x14c   : > { %2003 = vmatpush3.msra.mxu1 %v2880_v37  ;;  %1968 = vmatpush3.msra.mxu0 %v2767_v7 }
 0x14d   : > { %2004 = vmatprep.subr.mxu1 %v2558_v2  ;;  %1969 = vmatprep.subr.mxu0 %v2558_v2 }
 0x14e   : > { %2005 = vmatpush3.msra.mxu1 %v2885_v38  ;;  %1970 = vmatpush3.msra.mxu0 %v2773_v9 }
 0x14f   : > { %2006 = vmatprep.subr.mxu1 %v2558_v2  ;;  %1971 = vmatprep.subr.mxu0 %v2558_v2 }
 0x150   : > { %2007 = vmatpush3.msra.mxu1 %v2891_v39  ;;  %1972 = vmatpush3.msra.mxu0 %v2781_v11 }
 0x151   : > { %2008 = vmatprep.subr.mxu1 %v2558_v2  ;;  %1973 = vmatprep.subr.mxu0 %v2558_v2 }
 0x152   : > { %2009 = vmatpush3.msra.mxu1 %v2897_v40  ;;  %1974 = vmatpush3.msra.mxu0 %v2789_v13 }
 0x153   : > { %2010 = vmatprep.subr.mxu1 %v2558_v2  ;;  %1975 = vmatprep.subr.mxu0 %v2558_v2 }
 0x154   : > { %2011 = vmatpush3.msra.mxu1 %v2903_v41  ;;  %1976 = vmatpush3.msra.mxu0 %v2797_v15 }
 0x155   : > { %2012 = vmatprep.subr.mxu1 %v2558_v2  ;;  %1977 = vmatprep.subr.mxu0 %v2558_v2 }
 0x156   : > { %2013 = vmatpush3.msra.mxu1 %v2909_v42  ;;  %1978 = vmatpush3.msra.mxu0 %v2805_v17 }
 0x157   : > { %2014 = vmatprep.subr.mxu1 %v2558_v2  ;;  %1979 = vmatprep.subr.mxu0 %v2558_v2 }
 0x158   : > { %2015 = vmatpush3.msra.mxu1 %v2943_v43  ;;  %1980 = vmatpush3.msra.mxu0 %v2813_v19 }
 0x159   : > { %2016 = vmatprep.subr.mxu1 %v2558_v2  ;;  %1981 = vmatprep.subr.mxu0 %v2558_v2 }
 0x15a   : > { %2017 = vmatpush3.msra.mxu1 %v2947_v44  ;;  %1982 = vmatpush3.msra.mxu0 %v2821_v21 }
 0x15b   : > { %2018 = vmatprep.subr.mxu1 %v2558_v2  ;;  %1983 = vmatprep.subr.mxu0 %v2558_v2 }
 0x15c   : > { %2019 = vmatpush3.msra.mxu1 %v2951_v45  ;;  %1984 = vmatpush3.msra.mxu0 %v2829_v23 }
 0x15d   : > { %2020 = vmatprep.subr.mxu1 %v2558_v2  ;;  %1985 = vmatprep.subr.mxu0 %v2558_v2 }
 0x15e   : > { %2021 = vmatpush3.msra.mxu1 %v2955_v46  ;;  %1986 = vmatpush3.msra.mxu0 %v2837_v25 }
 0x15f   : > { %2022 = vmatprep.subr.mxu1 %v2558_v2  ;;  %1987 = vmatprep.subr.mxu0 %v2558_v2 }
 0x160   : > { %2023 = vmatpush3.msra.mxu1 %v2959_v47  ;;  %1988 = vmatpush3.msra.mxu0 %v2845_v27 }
 0x161   : > { %2024 = vmatprep.subr.mxu1 %v2558_v2  ;;  %1989 = vmatprep.subr.mxu0 %v2558_v2 }
 0x162   : > { %2025 = vmatpush3.msra.mxu1 %v2963_v48  ;;  %1990 = vmatpush3.msra.mxu0 %v2853_v29 }
 0x163   : > { %2026 = vmatprep.subr.mxu1 %v2558_v2  ;;  %1991 = vmatprep.subr.mxu0 %v2558_v2 }
 0x164   : > { %2027 = vmatpush3.msra.mxu1 %v2967_v49  ;;  %1992 = vmatpush3.msra.mxu0 %v2861_v31 }
 0x165   : > { %2028 = vmatprep.subr.mxu1 %v2558_v2  ;;  %1993 = vmatprep.subr.mxu0 %v2558_v2 }
 0x166   : > { %2029 = vmatpush3.msra.mxu1 %v2971_v50  ;;  %1994 = vmatpush3.msra.mxu0 %v2867_v33 }
 0x167   : > { %2030 = vmatprep.subr.mxu1 %v2558_v2  ;;  %1995 = vmatprep.subr.mxu0 %v2558_v2 }
 0x168   : > { %2031 = vmatpush3.msra.mxu1 %v2975_v51  ;;  %2032 = vmatprep.mubr.msk.f32.mxu1 %vm2559_vm0, %v2558_v2 }
 0x169   : > { %1996 = vmatpush3.msra.mxu0 %v2874_v35  ;;  %1997 = vmatprep.mubr.msk.f32.mxu0 %vm2559_vm0, %v2558_v2 }
 0x16a   : > { %2035 = vmatprep.subr.mxu0 %v2558_v2  ;;  %2070 = vmatprep.subr.mxu1 %v2558_v2 }
 0x209   : > { %v581_v61 = vpop.f32.mrf.mxu0  ;;  %v674_v62 = vpop.f32.mrf.mxu1 }
 0x20a   : > { %v582_v63 = vadd.f32 %v581_v61, %v2980_v56  ;;  %v678_v0 = vadd.f32 %v1596_v59, %v674_v62 }
 0x20b   : > { %v1929_v32 = vpop.f32.mrf.mxu0  ;;  %v1964_v36 = vpop.f32.mrf.mxu1 }
 0x20c   : > { %v585_v52 = vadd.f32 %v3056_v60, %v582_v63  ;;  %2342 = vtanh.f32 %v678_v0 }
 0x20e   : > { %2344 = vtanh.f32 %v585_v52 }
 0x219   : > { %v3060_v53 = vpop.eup %2342 }
 0x21a   : > { %1597 = vst.msk [vmem:[%s2740_s12 + $0x10] sm:$0xff] %vm410_vm1, %v3060_v53  ;;  %2033 = vmatmul.mubr.f32.vlgmr.msra.gmra.mxu1 %v3060_v53 }
 0x21b   : > { %v2345_v54 = vpop.eup %2344  ;;  %2071 = vmatpush3.msra.mxu1 %v2763_v6  ;;  %2102 = vmatprep.mubr.msk.f32.mxu1 %vm2559_vm0, %v2558_v2 }
 0x21c   : > { %1595 = vst.msk [vmem:[%s2740_s12 + $0x8] sm:$0xff] %vm410_vm1, %v2345_v54  ;;  %589 = vst.msk [vmem:[%s2742_s13] sm:$0xff] %vm410_vm1, %v2345_v54  ;;  %1998 = vmatmul.mubr.f32.vlgmr.msra.gmra.mxu0 %v2345_v54  ;;  %2072 = vmatprep.subr.mxu1 %v2558_v2 }
 0x21d   : > { %2036 = vmatpush3.msra.mxu0 %v2745_v1  ;;  %2067 = vmatprep.mubr.msk.f32.mxu0 %vm2559_vm0, %v2558_v2 }
 0x21e   : > { %2037 = vmatprep.subr.mxu0 %v2558_v2  ;;  %2073 = vmatpush3.msra.mxu1 %v2767_v7 }
 0x21f   : > { %2038 = vmatpush3.msra.mxu0 %v2748_v3  ;;  %2074 = vmatprep.subr.mxu1 %v2558_v2 }
 0x220   : > { %2039 = vmatprep.subr.mxu0 %v2558_v2  ;;  %2075 = vmatpush3.msra.mxu1 %v2773_v9 }
 0x221   : > { %2040 = vmatpush3.msra.mxu0 %v2755_v4  ;;  %2076 = vmatprep.subr.mxu1 %v2558_v2 }
 0x222   : > { %2041 = vmatprep.subr.mxu0 %v2558_v2  ;;  %2077 = vmatpush3.msra.mxu1 %v2781_v11 }
 0x223   : > { %2042 = vmatpush3.msra.mxu0 %v2761_v5  ;;  %2078 = vmatprep.subr.mxu1 %v2558_v2 }
 0x224   : > { %2043 = vmatprep.subr.mxu0 %v2558_v2  ;;  %2079 = vmatpush3.msra.mxu1 %v2789_v13 }
 0x225   : > { %2044 = vmatpush3.msra.mxu0 %v2770_v8  ;;  %2080 = vmatprep.subr.mxu1 %v2558_v2 }
 0x226   : > { %2045 = vmatprep.subr.mxu0 %v2558_v2  ;;  %2081 = vmatpush3.msra.mxu1 %v2797_v15 }
 0x227   : > { %2046 = vmatpush3.msra.mxu0 %v2778_v10  ;;  %2082 = vmatprep.subr.mxu1 %v2558_v2 }
 0x228   : > { %2047 = vmatprep.subr.mxu0 %v2558_v2  ;;  %2083 = vmatpush3.msra.mxu1 %v2805_v17 }
 0x229   : > { %2048 = vmatpush3.msra.mxu0 %v2786_v12  ;;  %2084 = vmatprep.subr.mxu1 %v2558_v2 }
 0x22a   : > { %2049 = vmatprep.subr.mxu0 %v2558_v2  ;;  %2085 = vmatpush3.msra.mxu1 %v2813_v19 }
 0x22b   : > { %2050 = vmatpush3.msra.mxu0 %v2794_v14  ;;  %2086 = vmatprep.subr.mxu1 %v2558_v2 }
 0x22c   : > { %2051 = vmatprep.subr.mxu0 %v2558_v2  ;;  %2087 = vmatpush3.msra.mxu1 %v2821_v21 }
 0x22d   : > { %2052 = vmatpush3.msra.mxu0 %v2802_v16  ;;  %2088 = vmatprep.subr.mxu1 %v2558_v2 }
 0x22e   : > { %2053 = vmatprep.subr.mxu0 %v2558_v2  ;;  %2089 = vmatpush3.msra.mxu1 %v2829_v23 }
 0x22f   : > { %2054 = vmatpush3.msra.mxu0 %v2810_v18  ;;  %2090 = vmatprep.subr.mxu1 %v2558_v2 }
 0x230   : > { %2055 = vmatprep.subr.mxu0 %v2558_v2  ;;  %2091 = vmatpush3.msra.mxu1 %v2837_v25 }
 0x231   : > { %2056 = vmatpush3.msra.mxu0 %v2818_v20  ;;  %2092 = vmatprep.subr.mxu1 %v2558_v2 }
 0x232   : > { %2057 = vmatprep.subr.mxu0 %v2558_v2  ;;  %2093 = vmatpush3.msra.mxu1 %v2845_v27 }
 0x233   : > { %2058 = vmatpush3.msra.mxu0 %v2826_v22  ;;  %2094 = vmatprep.subr.mxu1 %v2558_v2 }
 0x234   : > { %2059 = vmatprep.subr.mxu0 %v2558_v2  ;;  %2095 = vmatpush3.msra.mxu1 %v2853_v29 }
 0x235   : > { %2060 = vmatpush3.msra.mxu0 %v2834_v24  ;;  %2096 = vmatprep.subr.mxu1 %v2558_v2 }
 0x236   : > { %2061 = vmatprep.subr.mxu0 %v2558_v2  ;;  %2097 = vmatpush3.msra.mxu1 %v2861_v31 }
 0x237   : > { %2062 = vmatpush3.msra.mxu0 %v2842_v26  ;;  %2098 = vmatprep.subr.mxu1 %v2558_v2 }
 0x238   : > { %2063 = vmatprep.subr.mxu0 %v2558_v2  ;;  %2099 = vmatpush3.msra.mxu1 %v2867_v33 }
 0x239   : > { %2064 = vmatpush3.msra.mxu0 %v2850_v28  ;;  %2100 = vmatprep.subr.mxu1 %v2558_v2 }
 0x23a   : > { %2065 = vmatprep.subr.mxu0 %v2558_v2  ;;  %2101 = vmatpush3.msra.mxu1 %v2874_v35 }
 0x23b   : > { %2066 = vmatpush3.msra.mxu0 %v2858_v30  ;;  %2140 = vmatprep.subr.mxu1 %v2558_v2 }
 0x23c   : > { %2068 = vmatmul.mubr.f32.vlgmr.msra.gmra.mxu0 %v3060_v53  ;;  %2105 = vmatprep.subr.mxu0 %v2558_v2 }
 0x23d   : > { %2106 = vmatpush3.msra.mxu0 %v2871_v34  ;;  %2137 = vmatprep.mubr.msk.f32.mxu0 %vm2559_vm0, %v2558_v2 }
 0x23e   : > { %2107 = vmatprep.subr.mxu0 %v2558_v2 }
 0x23f   : > { %2108 = vmatpush3.msra.mxu0 %v2880_v37 }
 0x240   : > { %2109 = vmatprep.subr.mxu0 %v2558_v2 }
 0x241   : > { %2110 = vmatpush3.msra.mxu0 %v2885_v38 }
 0x242   : > { %2111 = vmatprep.subr.mxu0 %v2558_v2 }
 0x243   : > { %2112 = vmatpush3.msra.mxu0 %v2891_v39 }
 0x244   : > { %2113 = vmatprep.subr.mxu0 %v2558_v2 }
 0x245   : > { %2114 = vmatpush3.msra.mxu0 %v2897_v40 }
 0x246   : > { %2115 = vmatprep.subr.mxu0 %v2558_v2 }
 0x247   : > { %2116 = vmatpush3.msra.mxu0 %v2903_v41 }
 0x248   : > { %2117 = vmatprep.subr.mxu0 %v2558_v2 }
 0x249   : > { %2118 = vmatpush3.msra.mxu0 %v2909_v42 }
 0x24a   : > { %2119 = vmatprep.subr.mxu0 %v2558_v2 }
 0x24b   : > { %2120 = vmatpush3.msra.mxu0 %v2943_v43 }
 0x24c   : > { %2121 = vmatprep.subr.mxu0 %v2558_v2 }
 0x24d   : > { %2122 = vmatpush3.msra.mxu0 %v2947_v44 }
 0x24e   : > { %2123 = vmatprep.subr.mxu0 %v2558_v2 }
 0x24f   : > { %2124 = vmatpush3.msra.mxu0 %v2951_v45 }
 0x250   : > { %2125 = vmatprep.subr.mxu0 %v2558_v2 }
 0x251   : > { %2126 = vmatpush3.msra.mxu0 %v2955_v46 }
 0x252   : > { %2127 = vmatprep.subr.mxu0 %v2558_v2 }
 0x253   : > { %2128 = vmatpush3.msra.mxu0 %v2959_v47 }
 0x254   : > { %2129 = vmatprep.subr.mxu0 %v2558_v2 }
 0x255   : > { %2130 = vmatpush3.msra.mxu0 %v2963_v48 }
 0x256   : > { %2131 = vmatprep.subr.mxu0 %v2558_v2 }
 0x257   : > { %2132 = vmatpush3.msra.mxu0 %v2967_v49 }
 0x258   : > { %2133 = vmatprep.subr.mxu0 %v2558_v2 }
 0x259   : > { %2134 = vmatpush3.msra.mxu0 %v2971_v50 }
 0x25a   : > { %2135 = vmatprep.subr.mxu0 %v2558_v2 }
 0x25b   : > { %2136 = vmatpush3.msra.mxu0 %v2975_v51 }
 0x25c   : > { %2175 = vmatprep.subr.mxu0 %v2558_v2 }
 0x2da   : > { %v850_v17 = vpop.f32.mrf.mxu1 }
 0x2dc   : > { %v780_v19 = vpop.f32.mrf.mxu0  ;;  %v2034_v21 = vpop.f32.mrf.mxu1 }
 0x2dd   : > { %v851_v23 = vadd.f32 %v850_v17, %v780_v19 }
 0x2de   : > { %v1999_v25 = vpop.f32.mrf.mxu0 }
 0x2df   : > { %v854_v27 = vadd.f32 %v3056_v60, %v851_v23 }
 0x2e1   : > { %2346 = vtanh.f32 %v854_v27 }
 0x2ee   : > { %v2347_v29 = vpop.eup %2346 }
 0x2ef   : > { %1598 = vst.msk [vmem:[%s2740_s12 + $0x18] sm:$0xff] %vm410_vm1, %v2347_v29  ;;  %1599 = vst.msk [vmem:[%s2742_s13 + $0x8] sm:$0xff] %vm410_vm1, %v2347_v29  ;;  %2103 = vmatmul.mubr.f32.vlgmr.msra.gmra.mxu1 %v2347_v29 }
 0x2f0   : > { %2141 = vmatpush3.msra.mxu1 %v2745_v1  ;;  %2172 = vmatprep.mubr.msk.f32.mxu1 %vm2559_vm0, %v2558_v2  ;;  %v1600_v1 = vld [vmem:[%s2729_s24 + $0x10] sm:$0xff] }
 0x2f1   : > { %2142 = vmatprep.subr.mxu1 %v2558_v2 }
 0x2f2   : > { %2143 = vmatpush3.msra.mxu1 %v2748_v3 }
 0x2f3   : > { %2144 = vmatprep.subr.mxu1 %v2558_v2 }
 0x2f4   : > { %2145 = vmatpush3.msra.mxu1 %v2755_v4 }
 0x2f5   : > { %2146 = vmatprep.subr.mxu1 %v2558_v2 }
 0x2f6   : > { %2147 = vmatpush3.msra.mxu1 %v2761_v5 }
 0x2f7   : > { %2148 = vmatprep.subr.mxu1 %v2558_v2 }
 0x2f8   : > { %2149 = vmatpush3.msra.mxu1 %v2770_v8  ;;  %v1245_v8 = vld [vmem:[#allocation6 + $0xb8] sm:$0xff] }
 0x2f9   : > { %2150 = vmatprep.subr.mxu1 %v2558_v2 }
 0x2fa   : > { %2151 = vmatpush3.msra.mxu1 %v2778_v10  ;;  %v1243_v10 = vld [vmem:[#allocation6 + $0xa8] sm:$0xff] }
 0x2fb   : > { %2152 = vmatprep.subr.mxu1 %v2558_v2 }
 0x2fc   : > { %v944_v3 = vpop.f32.mrf.mxu0  ;;  %2153 = vmatpush3.msra.mxu1 %v2786_v12  ;;  %v1241_v12 = vld [vmem:[#allocation6 + $0x98] sm:$0xff] }
 0x2fd   : > { %v948_v31 = vadd.f32 %v1600_v1, %v944_v3  ;;  %2154 = vmatprep.subr.mxu1 %v2558_v2 }
 0x2fe   : > { %v2069_v4 = vpop.f32.mrf.mxu0  ;;  %2155 = vmatpush3.msra.mxu1 %v2794_v14  ;;  %v1239_v14 = vld [vmem:[#allocation6 + $0x88] sm:$0xff] }
 0x2ff   : > { %2348 = vtanh.f32 %v948_v31  ;;  %2156 = vmatprep.subr.mxu1 %v2558_v2 }
 0x300   : > { %2157 = vmatpush3.msra.mxu1 %v2802_v16 }
 0x301   : > { %2158 = vmatprep.subr.mxu1 %v2558_v2 }
 0x302   : > { %2159 = vmatpush3.msra.mxu1 %v2810_v18 }
 0x303   : > { %2160 = vmatprep.subr.mxu1 %v2558_v2 }
 0x304   : > { %2161 = vmatpush3.msra.mxu1 %v2818_v20 }
 0x305   : > { %2162 = vmatprep.subr.mxu1 %v2558_v2 }
 0x306   : > { %2163 = vmatpush3.msra.mxu1 %v2826_v22  ;;  %v1604_v22 = vld [vmem:[%s2729_s24 + $0x18] sm:$0xff]  ;;  %s3294_s24 = scalar_lea.hbm %s3380_s5, %s1620_s10 }
 0x307   : > { %2164 = vmatprep.subr.mxu1 %v2558_v2 }
 0x308   : > { %2165 = vmatpush3.msra.mxu1 %v2834_v24 }
 0x309   : > { %2166 = vmatprep.subr.mxu1 %v2558_v2 }
 0x30a   : > { %2167 = vmatpush3.msra.mxu1 %v2842_v26 }
 0x30b   : > { %2168 = vmatprep.subr.mxu1 %v2558_v2 }
 0x30c   : > { %v2349_v5 = vpop.eup %2348  ;;  %2169 = vmatpush3.msra.mxu1 %v2850_v28 }
 0x30d   : > { %1601 = vst.msk [vmem:[%s2740_s12 + $0x20] sm:$0xff] %vm410_vm1, %v2349_v5  ;;  %2138 = vmatmul.mubr.f32.vlgmr.msra.gmra.mxu0 %v2349_v5  ;;  %2170 = vmatprep.subr.mxu1 %v2558_v2 }
 0x30e   : > { %2171 = vmatpush3.msra.mxu1 %v2858_v30  ;;  %2176 = vmatpush3.msra.mxu0 %v2763_v6  ;;  %v1247_v6 = vld [vmem:[#allocation6 + $0xc8] sm:$0xff] }
 0x30f   : > { %2173 = vmatmul.mubr.f32.vlgmr.msra.gmra.mxu1 %v2349_v5  ;;  %2210 = vmatprep.subr.mxu1 %v2558_v2 }
 0x310   : > { %2211 = vmatpush3.msra.mxu1 %v2871_v34  ;;  %2177 = vmatprep.subr.mxu0 %v2558_v2 }
 0x311   : > { %2212 = vmatprep.subr.mxu1 %v2558_v2  ;;  %2178 = vmatpush3.msra.mxu0 %v2767_v7  ;;  %v1246_v7 = vld [vmem:[#allocation6 + $0xc0] sm:$0xff] }
 0x312   : > { %2213 = vmatpush3.msra.mxu1 %v2880_v37  ;;  %2179 = vmatprep.subr.mxu0 %v2558_v2 }
 0x313   : > { %2214 = vmatprep.subr.mxu1 %v2558_v2  ;;  %2180 = vmatpush3.msra.mxu0 %v2773_v9  ;;  %v1244_v9 = vld [vmem:[#allocation6 + $0xb0] sm:$0xff] }
 0x314   : > { %2215 = vmatpush3.msra.mxu1 %v2885_v38  ;;  %2181 = vmatprep.subr.mxu0 %v2558_v2 }
 0x315   : > { %2216 = vmatprep.subr.mxu1 %v2558_v2  ;;  %2182 = vmatpush3.msra.mxu0 %v2781_v11  ;;  %v1242_v11 = vld [vmem:[#allocation6 + $0xa0] sm:$0xff] }
 0x316   : > { %2217 = vmatpush3.msra.mxu1 %v2891_v39  ;;  %2183 = vmatprep.subr.mxu0 %v2558_v2 }
 0x317   : > { %2218 = vmatprep.subr.mxu1 %v2558_v2  ;;  %2184 = vmatpush3.msra.mxu0 %v2789_v13  ;;  %v1240_v13 = vld [vmem:[#allocation6 + $0x90] sm:$0xff] }
 0x318   : > { %2219 = vmatpush3.msra.mxu1 %v2897_v40  ;;  %2185 = vmatprep.subr.mxu0 %v2558_v2 }
 0x319   : > { %2220 = vmatprep.subr.mxu1 %v2558_v2  ;;  %2186 = vmatpush3.msra.mxu0 %v2797_v15  ;;  %v1238_v15 = vld [vmem:[#allocation6 + $0x80] sm:$0xff] }
 0x31a   : > { %2221 = vmatpush3.msra.mxu1 %v2903_v41  ;;  %2187 = vmatprep.subr.mxu0 %v2558_v2 }
 0x31b   : > { %2222 = vmatprep.subr.mxu1 %v2558_v2  ;;  %2207 = vmatprep.mubr.msk.f32.mxu0 %vm2559_vm0, %v2558_v2 }
 0x31c   : > { %2223 = vmatpush3.msra.mxu1 %v2909_v42  ;;  %2242 = vmatprep.mubr.msk.f32.mxu1 %vm2559_vm0, %v2558_v2 }
 0x31d   : > { %2224 = vmatprep.subr.mxu1 %v2558_v2  ;;  %2188 = vmatpush3.msra.mxu0 %v1247_v6 }
 0x31e   : > { %2225 = vmatpush3.msra.mxu1 %v2943_v43  ;;  %2189 = vmatprep.subr.mxu0 %v2558_v2 }
 0x31f   : > { %2226 = vmatprep.subr.mxu1 %v2558_v2  ;;  %2190 = vmatpush3.msra.mxu0 %v1246_v7 }
 0x320   : > { %2227 = vmatpush3.msra.mxu1 %v2947_v44  ;;  %2191 = vmatprep.subr.mxu0 %v2558_v2 }
 0x321   : > { %2228 = vmatprep.subr.mxu1 %v2558_v2  ;;  %2192 = vmatpush3.msra.mxu0 %v1245_v8 }
 0x322   : > { %2229 = vmatpush3.msra.mxu1 %v2951_v45  ;;  %2193 = vmatprep.subr.mxu0 %v2558_v2 }
 0x323   : > { %2230 = vmatprep.subr.mxu1 %v2558_v2  ;;  %2194 = vmatpush3.msra.mxu0 %v1244_v9 }
 0x324   : > { %2231 = vmatpush3.msra.mxu1 %v2955_v46  ;;  %2195 = vmatprep.subr.mxu0 %v2558_v2 }
 0x325   : > { %2232 = vmatprep.subr.mxu1 %v2558_v2  ;;  %2196 = vmatpush3.msra.mxu0 %v1243_v10 }
 0x326   : > { %2233 = vmatpush3.msra.mxu1 %v2959_v47  ;;  %2197 = vmatprep.subr.mxu0 %v2558_v2 }
 0x327   : > { %2234 = vmatprep.subr.mxu1 %v2558_v2  ;;  %2198 = vmatpush3.msra.mxu0 %v1242_v11 }
 0x328   : > { %2235 = vmatpush3.msra.mxu1 %v2963_v48  ;;  %2199 = vmatprep.subr.mxu0 %v2558_v2 }
 0x329   : > { %2236 = vmatprep.subr.mxu1 %v2558_v2  ;;  %2200 = vmatpush3.msra.mxu0 %v1241_v12 }
 0x32a   : > { %2237 = vmatpush3.msra.mxu1 %v2967_v49  ;;  %2201 = vmatprep.subr.mxu0 %v2558_v2 }
 0x32b   : > { %2238 = vmatprep.subr.mxu1 %v2558_v2  ;;  %2202 = vmatpush3.msra.mxu0 %v1240_v13 }
 0x32c   : > { %2239 = vmatpush3.msra.mxu1 %v2971_v50  ;;  %2203 = vmatprep.subr.mxu0 %v2558_v2 }
 0x32d   : > { %2240 = vmatprep.subr.mxu1 %v2558_v2  ;;  %2204 = vmatpush3.msra.mxu0 %v1239_v14 }
 0x32e   : > { %2241 = vmatpush3.msra.mxu1 %v2975_v51  ;;  %2205 = vmatprep.subr.mxu0 %v2558_v2 }
 0x32f   : > { %2206 = vmatpush3.msra.mxu0 %v1238_v15 }
 0x3af   : > { %v1050_v16 = vpop.f32.mrf.mxu1 }
 0x3b1   : > { %v2104_v18 = vpop.f32.mrf.mxu1 }
 0x3cd   : > { %v1120_v20 = vpop.f32.mrf.mxu0 }
 0x3ce   : > { %v1121_v24 = vadd.f32 %v1120_v20, %v1050_v16 }
 0x3cf   : > { %v2139_v26 = vpop.f32.mrf.mxu0  ;;  %v1214_v28 = vpop.f32.mrf.mxu1 }
 0x3d0   : > { %v1124_v30 = vadd.f32 %v3056_v60, %v1121_v24  ;;  %v1218_v33 = vadd.f32 %v1604_v22, %v1214_v28 }
 0x3d1   : > { %v2174_v34 = vpop.f32.mrf.mxu1 }
 0x3d2   : > { %2350 = vtanh.f32 %v1124_v30 }
 0x3d3   : > { %2352 = vtanh.f32 %v1218_v33 }
 0x3df   : > { %v2351_v2 = vpop.eup %2350 }
 0x3e0   : > { %v2353_v35 = vpop.eup %2352  ;;  %1602 = vst.msk [vmem:[%s2740_s12 + $0x28] sm:$0xff] %vm410_vm1, %v2351_v2  ;;  %1603 = vst.msk [vmem:[%s2742_s13 + $0x10] sm:$0xff] %vm410_vm1, %v2351_v2  ;;  %2208 = vmatmul.mubr.f32.vlgmr.msra.gmra.mxu0 %v2351_v2 }
 0x3e1   : > { %1605 = vst.msk [vmem:[%s2740_s12 + $0x30] sm:$0xff] %vm410_vm1, %v2353_v35  ;;  %1400 = vst [vmem:[#allocation2] sm:$0xff] %v2353_v35  ;;  %2243 = vmatmul.mubr.f32.vlgmr.msra.gmra.mxu1 %v2353_v35 }
 0x4a0   : > { %v1320_v37 = vpop.f32.mrf.mxu0 }
 0x4a1   : > { %v1390_v38 = vpop.f32.mrf.mxu1 }
 0x4a2   : > { %v1391_v39 = vadd.f32 %v1390_v38, %v1320_v37  ;;  %v2209_v40 = vpop.f32.mrf.mxu0 }
 0x4a3   : > { %v2244_v41 = vpop.f32.mrf.mxu1 }
 0x4a4   : > { %v1394_v42 = vadd.f32 %v3056_v60, %v1391_v39 }
 0x4a6   : > { %2354 = vtanh.f32 %v1394_v42 }
 0x4b3   : > { %v2355_v43 = vpop.eup %2354 }
 0x4b4   : > { %1606 = vst.msk [vmem:[%s2740_s12 + $0x38] sm:$0xff] %vm410_vm1, %v2355_v43  ;;  %1401 = vst [vmem:[#allocation2 + $0x8] sm:$0xff] %v2355_v43 }
 0x4b5   : > { %1607 = vst.msk [vmem:[%s2742_s13 + $0x18] sm:$0xff] %vm410_vm1, %v2355_v43 }
 0x4b6   : > { %2449 = shalt.err (!%p2446_p9)
}
 0x4b7   : > { %s2450_s12 = scalar_lea.hbm %s3285_s11, 1024  ;;  %s2454_s6 = scalar_lea.hbm %s3379_s4, 2048 }
 0x4b8   : > { %p2451_p12 = scmp.ne.s32.totalorder %s3285_s11, %s2450_s12  ;;  %p2455_p7 = scmp.lt.s32.totalorder %s3285_s11, %s3379_s4 }
 0x4b9   : > { %p2456_p5 = scmp.lt.s32.totalorder %s2454_s6, %s2450_s12 }
 0x4ba   : > { %p2452_p13 = pnand %p2451_p12, %p2695_p3 }
 0x4bb   : > { %p2457_p6 = por %p2456_p5, %p2455_p7 }
 0x4bc   : > { %p2453_p0 = pneg %p2452_p13 }
 0x4be   : > { %p2458_p1 = pnand %p2457_p6, %p2453_p0 }
 0x4c0   : > { %2461 = shalt.err (!%p2458_p1)
}
 0x4c1   : > { %s2561_s16 = smov 128   ;;  %s2562_s30 = smov 8  }
 0x4c2   : > { %2255 = dma.vmem_to_hbm [thread:$0]  (%p2695_p3), %s3289_s27, 1024, %s3285_s11, %s1403_s21, %s2561_s16, %s2561_s16, %s2562_s30  }
 0x4c3   : > { %s1408_s26 = scalar_lea.sflag [#allocation11], %s2725_s9  ;;  %s2462_s28 = scalar_lea.vmem %s3296_s15, 512 }
 0x4c4   : > { %p2463_p4 = scmp.ne.s32.totalorder %s3296_s15, %s2462_s28  ;;  %s2563_s17 = smov [#allocation10]  }
 0x4c5   : > { %s2466_s12 = sshll.u32 %s2563_s17, 4  ;;  %s2467_s12 = int_to_ptr.vmem [resolvable:$false] %s2466_s12 }
 0x4c6   : > { %p2464_p8 = pnand %p2463_p4, %p2695_p3  ;;  %s2468_s13 = scalar_lea.vmem %s2467_s12, 1024 }
 0x4c7   : > { %p2469_p11 = scmp.lt.s32.totalorder %s3296_s15, %s2467_s12  ;;  %p2470_p2 = scmp.lt.s32.totalorder %s2468_s13, %s2462_s28 }
 0x4c8   : > { %p2465_p10 = pneg %p2464_p8 }
 0x4c9   : > { %p2471_p9 = por %p2470_p2, %p2469_p11 }
 0x4cb   : > { %p2472_p12 = pnand %p2471_p9, %p2465_p10 }
 0x4cd   : > { %2475 = shalt.err (!%p2472_p12)
}
 0x4ce   : > { %s2476_s27 = scalar_lea.hbm %s3294_s24, 512  ;;  %s2480_s21 = scalar_lea.hbm %s3380_s5, 1024 }
 0x4cf   : > { %p2477_p13 = scmp.ne.s32.totalorder %s3294_s24, %s2476_s27  ;;  %p2481_p5 = scmp.lt.s32.totalorder %s3294_s24, %s3380_s5 }
 0x4d0   : > { %p2482_p6 = scmp.lt.s32.totalorder %s2480_s21, %s2476_s27 }
 0x4d1   : > { %p2478_p0 = pnand %p2477_p13, %p2695_p3 }
 0x4d2   : > { %p2483_p1 = por %p2482_p6, %p2481_p5 }
 0x4d3   : > { %p2479_p7 = pneg %p2478_p0 }
 0x4d5   : > { %p2484_p4 = pnand %p2483_p1, %p2479_p7 }
 0x4d7   : > { %2487 = shalt.err (!%p2484_p4)
}
 0x4d8   : > { %2256 = dma.vmem_to_hbm [thread:$0]  (%p2695_p3), %s3296_s15, 512, %s3294_s24, %s1408_s26, %s2561_s16, %s2561_s16, %s2562_s30  }
 0x4d9 PF: > { %s1455_s10 = sand.u32 1, %s2530_s18   ;;  %p3395_p8 = scmp.ne.s32.totalorder %s3387_s29, 0 }
 0x4da   : > { %p3396_p10 = scmp.ge.s32.totalorder %s2550_s23, 2  ;;  %s1456_s1 = scalar_lea.sflag [#allocation5], %s1455_s10 }
 0x4dc   : > { %p2271_p11 = pnand %p3396_p10, %p3395_p8 }
 0x4de   : > { %p2272_p2 = pneg %p2271_p11 }
 0x4e0   : > { %2521 = dma.done.wait (%p2272_p2), %s1456_s1, 1024  }
 0x4e1   : > { %2523 = vsyncadd (%p2272_p2), %s1456_s1, 4294966272  ;;  %s1465_s28 = scalar_lea.sflag [#allocation11], %s1455_s10 }
 0x4e2   : > { %2525 = dma.done.wait (%p2272_p2), %s1465_s28, 512  }
 0x4e3   : > { %2527 = vsyncadd (%p2272_p2), %s1465_s28, 4294966784  ;;  %s26_s23 = sadd.s32 1, %s2550_s23   ;;  %s3397_s18 = smov %s2534_s19 }
 0x4e4   : > { %p23_p9 = scmp.ge.s32.totalorder %s26_s23, 4   ;;  %s3398_s19 = smov %s2538_s20 }
 0x4e5   : > { %s3399_s20 = smov %s2704_s14  ;;  %s3400_s21 = smov %s2546_s22 }
 0x4e6   : > { %s3401_s22 = smov %s3403_s25  ;;  %25 = sbr.rel (!%p23_p9) target bundleno = 11 (0xb), region = 125 }
 0x4eb   :  { %1470 = vsyncpa [#allocation4], 1 }
 0x4ec   :  { %1472 = vsyncpa [#allocation4 + $0x1], 1 }
 0x4ed   :  { %1473 = vsyncpa [#allocation7], 1 }
 0x4ee   :  { %1474 = vsyncpa [#allocation5], 1 }
 0x4ef   :  { %1476 = vsyncpa [#allocation5 + $0x1], 1 }
 0x4f0   :  { %1477 = vsyncpa [#allocation11], 1 }
 0x4f1   :  { %1479 = vsyncpa [#allocation11 + $0x1], 1 }

// kernel: tpu_custom_call.1
= control target key start
LH: loop header
LB: loop body
LE: loop exit
PB: predicated region body
PF: predicated region fallthrough
CT: control target
= control target key end

     0   :  { %s3375_s0 = inlined_call_operand.hbm [shape: f32[8,8,128], index: 0, kind: input, shape index: {}]   ;;  %s3376_s1 = inlined_call_operand.hbm [shape: f32[2,128,128], index: 1, kind: input, shape index: {}]   ;;  %s3377_s2 = inlined_call_operand.hbm [shape: f32[1,128,128], index: 2, kind: input, shape index: {}]   ;;  %s3378_s3 = inlined_call_operand.vmem [shape: f32[1,1,128], index: 3, kind: input, shape index: {}]   ;;  %s3379_s4 = inlined_call_operand.hbm [shape: f32[8,2,8,32], index: 4, kind: output, shape index: {0}]   ;;  %s3380_s5 = inlined_call_operand.hbm [shape: f32[8,8,32], index: 5, kind: output, shape index: {1}]  }
   0x1   :  { %3383 = sst [smem:[#allocation16_spill]] %s3376_s1 }
   0x2   :  { %11 = vsyncpa [#allocation4], 0 }
   0x3   :  { %13 = vsyncpa [#allocation4 + $0x1], 0 }
   0x4   :  { %14 = vsyncpa [#allocation7], 0 }
   0x5   :  { %15 = vsyncpa [#allocation5], 0 }
   0x6   :  { %17 = vsyncpa [#allocation5 + $0x1], 0 }
   0x7   :  { %18 = vsyncpa [#allocation11], 0 }
   0x8   :  { %20 = vsyncpa [#allocation11 + $0x1], 0  ;;  %s2594_s18 = smov 0   ;;  %s2596_s19 = smov 0  }
   0x9   :  { %s2598_s20 = smov 0   ;;  %s2600_s21 = smov 0  }
   0xa   :  { %s2602_s22 = smov 0   ;;  %s2604_s23 = smov 0  }
   0xb LB: > { %s1578_s24 = sadd.s32 4294967295, %s2550_s23   ;;  %s1579_s25 = sadd.s32 4294967294, %s2550_s23   ;;  %s2550_s23 = sphi %s2604_s23, %s26_s23   ;;  %s2546_s22 = sphi %s2602_s22, %s3401_s22   ;;  %s2542_s21 = sphi %s2600_s21, %s3400_s21   ;;  %s2538_s20 = sphi %s2598_s20, %s3399_s20   ;;  %s2534_s19 = sphi %s2596_s19, %s3398_s19   ;;  %s2530_s18 = sphi %s2594_s18, %s3397_s18  }
   0xc   : > { %p60_p0 = scmp.ne.s32.totalorder %s2534_s19, %s2530_s18  ;;  %p2628_p1 = scmp.eq.s32.totalorder %s1578_s24, 0 }
   0xd   : > { %p2632_p2 = scmp.eq.s32.totalorder %s1578_s24, 1  ;;  %p155_p3 = scmp.eq.s32.totalorder %s1579_s25, 1 }
   0xe   : > { %p2638_p4 = por %p2628_p1, %p60_p0  ;;  %p1580_p5 = scmp.ge.s32.totalorder %s2550_s23, 1 }
   0xf   : > { %p2643_p6 = por %p155_p3, %p60_p0  ;;  %p190_p7 = scmp.lt.s32.totalorder %s2550_s23, 3 }
  0x10   : > { %s2552_s6 = smov [#allocation6]   ;;  %s2553_s9 = smov [#allocation8]  }
  0x11   : > { %s3387_s29 = scalar_select %p2643_p6, 1, 0 }
  0x12   : > { %p2648_p8 = pnand %p1580_p5, %p190_p7  ;;  %s202_s7 = sshll.u32 %s2552_s6, 4  ;;  %s203_s7 = int_to_ptr.vmem [resolvable:$true] %s202_s7 }
  0x13   : > { %s215_s10 = sshll.u32 %s2553_s9, 4  ;;  %s2367_s11 = scalar_lea.vmem %s203_s7, 4096  ;;  %s216_s10 = int_to_ptr.vmem [resolvable:$true] %s215_s10 }
  0x14   : > { %p2259_p9 = pneg %p2648_p8  ;;  %p2368_p13 = scmp.ne.s32.totalorder %s203_s7, %s2367_s11 }
  0x15   : > { %p2375_p5 = scmp.lt.s32.totalorder %s203_s7, %s203_s7  ;;  %p2376_p7 = scmp.lt.s32.totalorder %s2367_s11, %s2367_s11 }
  0x16   : > { %p2657_p11 = pnand %p2259_p9, %p2628_p1 }
  0x17   : > { %p2377_p10 = por %p2376_p7, %p2375_p5 }
  0x18   : > { %p2358_p12 = pneg %p2657_p11 }
  0x1a   : > { %p2370_p0 = pnand %p2368_p13, %p2358_p12 }
  0x1c   : > { %p2371_p3 = pneg %p2370_p0 }
  0x1e   : > { %p2378_p9 = pnand %p2377_p10, %p2371_p3 }
  0x20   : > { %2381 = shalt.err (!%p2378_p9)
}
  0x21   : > { %s3381_s12 = smov 128   ;;  %s3382_s13 = smov 8  }
  0x22   : > { %s3390_s1 = sld [smem:[#allocation16_spill]]  ;;  %s2393_s16 = scalar_lea.vmem %s216_s10, 2048 }
  0x23   : > { %p2394_p13 = scmp.ne.s32.totalorder %s216_s10, %s2393_s16  ;;  %p2401_p10 = scmp.lt.s32.totalorder %s216_s10, %s216_s10 }
  0x24   : > { %p2402_p3 = scmp.lt.s32.totalorder %s2393_s16, %s2393_s16 }
  0x25   : > { %p2396_p0 = pnand %p2394_p13, %p2358_p12 }
  0x26   : > { %p2403_p7 = por %p2402_p3, %p2401_p10 }
  0x27   : > { %p2397_p5 = pneg %p2396_p0 }
  0x28   : > { %2262 = dma.hbm_to_vmem [thread:$0]  (!%p2657_p11), %s3390_s1, 4096, %s203_s7, [#allocation7], %s3381_s12, %s3381_s12, %s3382_s13  }
  0x29   : > { %p2404_p9 = pnand %p2403_p7, %p2397_p5 }
  0x2b   : > { %2407 = shalt.err (!%p2404_p9)
}
  0x2c   : > { %2265 = dma.hbm_to_vmem [thread:$0]  (!%p2657_p11), %s3377_s2, 2048, %s216_s10, [#allocation7], %s3381_s12, %s3381_s12, %s3382_s13  }
  0x2d   : > { %s35_s25 = sadd.s32 1, %s2546_s22  ;;  %s47_s6 = sadd.s32 1, %s2538_s20 }
  0x2e   : > { %p36_p12 = scmp.ge.s32.totalorder %s35_s25, 2  ;;  %p54_p13 = scmp.ne.s32.totalorder %s2538_s20, %s2534_s19 }
  0x2f   : > { %p55_p0 = scmp.eq.s32.totalorder %s2550_s23, 0  ;;  %p2279_p5 = scmp.lt.s32.totalorder %s2550_s23, 2 }
  0x30   : > { %s3403_s25 = smov (%p36_p12, %s35_s25), 0  ;;  %p2695_p3 = por %p2632_p2, %p54_p13 }
  0x31   : > { %p56_p10 = por %p55_p0, %p54_p13  ;;  %s42_s8 = ssub.s32 %s2546_s22, %s3403_s25 }
  0x32   : > { %s232_s9 = sand.u32 1, %s2538_s20   ;;  %p45_p7 = scmp.eq.s32.totalorder %s42_s8, 0 }
  0x33   : > { %s1584_s10 = sshll.u32 %s232_s9, 5  ;;  %s1617_s11 = sshll.u32 %s2546_s22, 9 }
  0x34   : > { %s2704_s14 = scalar_select %p45_p7, %s2538_s20, %s47_s6  }
  0x35   : > { %s243_s17 = scalar_lea.hbm %s3375_s0, %s1617_s11  ;;  %s236_s24 = scalar_lea.vmem [#allocation3], %s1584_s10 }
  0x36   : > { %s244_s12 = sshll.u32 %s236_s24, 4  ;;  %p2711_p11 = pnand %p2279_p5, %p56_p10  ;;  %s245_s12 = int_to_ptr.vmem [resolvable:$true] %s244_s12 }
  0x37   : > { %s233_s13 = scalar_lea.sflag [#allocation4], %s232_s9  ;;  %s2421_s8 = scalar_lea.vmem %s245_s12, 512 }
  0x38   : > { %p2410_p2 = pneg %p2711_p11  ;;  %p2422_p9 = scmp.ne.s32.totalorder %s245_s12, %s2421_s8 }
  0x39   : > { %s2556_s6 = smov [#allocation3]  }
  0x3a   : > { %p2424_p12 = pnand %p2422_p9, %p2410_p2  ;;  %s2426_s1 = sshll.u32 %s2556_s6, 4  ;;  %s2427_s1 = int_to_ptr.vmem [resolvable:$false] %s2426_s1 }
  0x3b   : > { %s2428_s11 = scalar_lea.vmem %s2427_s1, 1024  ;;  %p2429_p0 = scmp.lt.s32.totalorder %s245_s12, %s2427_s1 }
  0x3c   : > { %p2425_p13 = pneg %p2424_p12  ;;  %p2430_p7 = scmp.lt.s32.totalorder %s2428_s11, %s2421_s8 }
  0x3e   : > { %p2431_p6 = por %p2430_p7, %p2429_p0 }
  0x40   : > { %p2432_p5 = pnand %p2431_p6, %p2425_p13 }
  0x42   : > { %2435 = shalt.err (!%p2432_p5)
}
  0x43   : > { %s3393_s10 = smov 8   ;;  %s3394_s15 = smov 128  }
  0x44   : > { %2269 = dma.hbm_to_vmem [thread:$0]  (!%p2711_p11), %s243_s17, 512, %s245_s12, %s233_s13, %s3394_s15, %s3394_s15, %s3393_s10  }
  0x45   : > { %256 = sbr.rel (%p2648_p8) target bundleno = 1241 (0x4d9), region = 36  ;;  %s2725_s9 = sand.u32 (!%p2648_p8), 1, %s2534_s19  }
  0x46   : > { %s1588_s1 = sshll.u32 (!%p2648_p8), %s2725_s9, 5  ;;  %s259_s16 = scalar_lea.sflag (!%p2648_p8), [#allocation4], %s2725_s9 }
  0x47   : > { %s2729_s24 = scalar_lea.vmem (!%p2648_p8), [#allocation3], %s1588_s1 }
  0x4a   : > { %2513 = dma.done.wait (%p2638_p4), %s259_s16, 512  }
  0x4b   : > { %2515 = vsyncadd (%p2638_p4), %s259_s16, 4294966784 }
  0x4c   : > { %2517 = dma.done.wait (%p2628_p1), [#allocation7], 6144  }
  0x4d   : > { %2519 = vsyncadd (%p2628_p1), [#allocation7], 4294961152  ;;  %s1591_s30 = sshll.u32 %s2725_s9, 6  ;;  %s2742_s13 = scalar_lea.vmem [#allocation10], %s1588_s1 }
  0x4e   : > { %s2740_s12 = scalar_lea.vmem [#allocation9], %s1591_s30  ;;  %p1593_p6 = scmp.ne.s32.totalorder %s2542_s21, 0 }
  0x50   : > { %308 = sbr.rel (%p1593_p6) target bundleno = 87 (0x57), region = 52 }
  0x55   : > { %v2557_v0 = vmov 0.0  }
  0x56   : > { %309 = vst [vmem:[#allocation2] sm:$0xff] %v2557_v0  ;;  %310 = vst [vmem:[#allocation2 + $0x8] sm:$0xff] %v2557_v0 }
  0x57 PF: > { %v2745_v1 = vld [vmem:[#allocation6 + $0x78] sm:$0xff]  ;;  %v2558_v2 = vmov 0.0   ;;  %v2748_v3 = vld [vmem:[#allocation6 + $0x70] sm:$0xff]  ;;  %vm2559_vm0 = vmmov 0   ;;  %v2755_v4 = vld [vmem:[#allocation6 + $0x68] sm:$0xff]  ;;  %vm410_vm1 = vcmask 261120  }
  0x58   : > { %1825 = vmatprep.subr.mxu0 %v2558_v2  ;;  %1857 = vmatprep.mubr.msk.f32.mxu0 %vm2559_vm0, %v2558_v2  ;;  %v2761_v5 = vld [vmem:[#allocation6 + $0x60] sm:$0xff]  ;;  %v2763_v6 = vld [vmem:[#allocation6 + $0xf8] sm:$0xff]  ;;  %v2767_v7 = vld [vmem:[#allocation6 + $0xf0] sm:$0xff]  ;;  %s1619_s17 = sshll.u32 %s2542_s21, 10  ;;  %s1423_s27 = sshll.u32 %s2740_s12, 4  ;;  %s3289_s27 = int_to_ptr.vmem [resolvable:$true] %s1423_s27 }
  0x59   : > { %1826 = vmatpush3.msra.mxu0 %v2745_v1  ;;  %1860 = vmatprep.subr.mxu1 %v2558_v2  ;;  %v2770_v8 = vld [vmem:[#allocation6 + $0x58] sm:$0xff]  ;;  %v2773_v9 = vld [vmem:[#allocation6 + $0xe8] sm:$0xff]  ;;  %v2778_v10 = vld [vmem:[#allocation6 + $0x50] sm:$0xff]  ;;  %s3285_s11 = scalar_lea.hbm %s3379_s4, %s1619_s17  ;;  %s1620_s10 = sshll.u32 %s2542_s21, 9 }
  0x5a   : > { %1827 = vmatprep.subr.mxu0 %v2558_v2  ;;  %1892 = vmatprep.mubr.msk.f32.mxu1 %vm2559_vm0, %v2558_v2  ;;  %v2781_v11 = vld [vmem:[#allocation6 + $0xe0] sm:$0xff]  ;;  %v2786_v12 = vld [vmem:[#allocation6 + $0x48] sm:$0xff]  ;;  %v2789_v13 = vld [vmem:[#allocation6 + $0xd8] sm:$0xff]  ;;  %s1440_s15 = sshll.u32 %s2742_s13, 4  ;;  %s1403_s21 = scalar_lea.sflag [#allocation5], %s2725_s9  ;;  %s3296_s15 = int_to_ptr.vmem [resolvable:$true] %s1440_s15 }
  0x5b   : > { %1828 = vmatpush3.msra.mxu0 %v2748_v3  ;;  %1861 = vmatpush3.msra.mxu1 %v2763_v6  ;;  %v2794_v14 = vld [vmem:[#allocation6 + $0x40] sm:$0xff]  ;;  %v2797_v15 = vld [vmem:[#allocation6 + $0xd0] sm:$0xff]  ;;  %v2802_v16 = vld [vmem:[#allocation6 + $0x38] sm:$0xff]  ;;  %s2436_s30 = scalar_lea.vmem %s3289_s27, 1024  ;;  %s2560_s26 = smov [#allocation9]  }
  0x5c   : > { %1829 = vmatprep.subr.mxu0 %v2558_v2  ;;  %1862 = vmatprep.subr.mxu1 %v2558_v2  ;;  %v2805_v17 = vld [vmem:[#allocation6 + $0xc8] sm:$0xff]  ;;  %v2810_v18 = vld [vmem:[#allocation6 + $0x30] sm:$0xff]  ;;  %v2813_v19 = vld [vmem:[#allocation6 + $0xc0] sm:$0xff]  ;;  %p2437_p1 = scmp.ne.s32.totalorder %s3289_s27, %s2436_s30  ;;  %s2440_s28 = sshll.u32 %s2560_s26, 4  ;;  %s2441_s28 = int_to_ptr.vmem [resolvable:$false] %s2440_s28 }
  0x5d   : > { %1830 = vmatpush3.msra.mxu0 %v2755_v4  ;;  %1863 = vmatpush3.msra.mxu1 %v2767_v7  ;;  %v2818_v20 = vld [vmem:[#allocation6 + $0x28] sm:$0xff]  ;;  %v2821_v21 = vld [vmem:[#allocation6 + $0xb8] sm:$0xff]  ;;  %v2826_v22 = vld [vmem:[#allocation6 + $0x20] sm:$0xff]  ;;  %s2442_s17 = scalar_lea.vmem %s2441_s28, 2048  ;;  %p2443_p10 = scmp.lt.s32.totalorder %s3289_s27, %s2441_s28 }
  0x5e   : > { %1831 = vmatprep.subr.mxu0 %v2558_v2  ;;  %1864 = vmatprep.subr.mxu1 %v2558_v2  ;;  %v2829_v23 = vld [vmem:[#allocation6 + $0xb0] sm:$0xff]  ;;  %v2834_v24 = vld [vmem:[#allocation6 + $0x18] sm:$0xff]  ;;  %v2837_v25 = vld [vmem:[#allocation6 + $0xa8] sm:$0xff]  ;;  %p2438_p4 = pnand %p2437_p1, %p2695_p3  ;;  %p2444_p11 = scmp.lt.s32.totalorder %s2442_s17, %s2436_s30 }
  0x5f   : > { %1832 = vmatpush3.msra.mxu0 %v2761_v5  ;;  %1865 = vmatpush3.msra.mxu1 %v2773_v9  ;;  %v2842_v26 = vld [vmem:[#allocation6 + $0x10] sm:$0xff]  ;;  %v2845_v27 = vld [vmem:[#allocation6 + $0xa0] sm:$0xff]  ;;  %v2850_v28 = vld [vmem:[#allocation6 + $0x8] sm:$0xff] }
  0x60   : > { %1833 = vmatprep.subr.mxu0 %v2558_v2  ;;  %1866 = vmatprep.subr.mxu1 %v2558_v2  ;;  %v2853_v29 = vld [vmem:[#allocation6 + $0x98] sm:$0xff]  ;;  %v2858_v30 = vld [vmem:[#allocation6] sm:$0xff]  ;;  %v2861_v31 = vld [vmem:[#allocation6 + $0x90] sm:$0xff]  ;;  %p2439_p8 = pneg %p2438_p4  ;;  %p2445_p2 = por %p2444_p11, %p2443_p10 }
  0x61   : > { %1834 = vmatpush3.msra.mxu0 %v2770_v8  ;;  %1867 = vmatpush3.msra.mxu1 %v2781_v11  ;;  %v311_v32 = vld [vmem:[#allocation2] sm:$0xff]  ;;  %v2867_v33 = vld [vmem:[#allocation6 + $0x88] sm:$0xff]  ;;  %v2871_v34 = vld [vmem:[#allocation8 + $0x78] sm:$0xff] }
  0x62   : > { %1835 = vmatprep.subr.mxu0 %v2558_v2  ;;  %1868 = vmatprep.subr.mxu1 %v2558_v2  ;;  %v2874_v35 = vld [vmem:[#allocation6 + $0x80] sm:$0xff]  ;;  %v313_v36 = vld [vmem:[#allocation2 + $0x8] sm:$0xff]  ;;  %v2880_v37 = vld [vmem:[#allocation8 + $0x70] sm:$0xff]  ;;  %p2446_p9 = pnand %p2445_p2, %p2439_p8 }
  0x63   : > { %1836 = vmatpush3.msra.mxu0 %v2778_v10  ;;  %1869 = vmatpush3.msra.mxu1 %v2789_v13  ;;  %v2885_v38 = vld [vmem:[#allocation8 + $0x68] sm:$0xff]  ;;  %v2891_v39 = vld [vmem:[#allocation8 + $0x60] sm:$0xff]  ;;  %v2897_v40 = vld [vmem:[#allocation8 + $0x58] sm:$0xff] }
  0x64   : > { %1837 = vmatprep.subr.mxu0 %v2558_v2  ;;  %1870 = vmatprep.subr.mxu1 %v2558_v2  ;;  %v2903_v41 = vld [vmem:[#allocation8 + $0x50] sm:$0xff]  ;;  %v2909_v42 = vld [vmem:[#allocation8 + $0x48] sm:$0xff]  ;;  %v2943_v43 = vld [vmem:[#allocation8 + $0x40] sm:$0xff] }
  0x65   : > { %1838 = vmatpush3.msra.mxu0 %v2786_v12  ;;  %1871 = vmatpush3.msra.mxu1 %v2797_v15  ;;  %v2947_v44 = vld [vmem:[#allocation8 + $0x38] sm:$0xff]  ;;  %v2951_v45 = vld [vmem:[#allocation8 + $0x30] sm:$0xff]  ;;  %v2955_v46 = vld [vmem:[#allocation8 + $0x28] sm:$0xff] }
  0x66   : > { %1839 = vmatprep.subr.mxu0 %v2558_v2  ;;  %1872 = vmatprep.subr.mxu1 %v2558_v2  ;;  %v2959_v47 = vld [vmem:[#allocation8 + $0x20] sm:$0xff]  ;;  %v2963_v48 = vld [vmem:[#allocation8 + $0x18] sm:$0xff]  ;;  %v2967_v49 = vld [vmem:[#allocation8 + $0x10] sm:$0xff] }
  0x67   : > { %1840 = vmatpush3.msra.mxu0 %v2794_v14  ;;  %1873 = vmatpush3.msra.mxu1 %v2805_v17  ;;  %v2971_v50 = vld [vmem:[#allocation8 + $0x8] sm:$0xff]  ;;  %v2975_v51 = vld [vmem:[#allocation8] sm:$0xff]  ;;  %v3056_v60 = vld [vmem:[%s3378_s3] ss:$0 sm:$0xff] }
  0x68   : > { %1841 = vmatprep.subr.mxu0 %v2558_v2  ;;  %1874 = vmatprep.subr.mxu1 %v2558_v2  ;;  %v321_v52 = vld [vmem:[%s2729_s24] sm:$0xff]  ;;  %v1596_v59 = vld [vmem:[%s2729_s24 + $0x8] sm:$0xff] }
  0x69   : > { %1842 = vmatpush3.msra.mxu0 %v2802_v16  ;;  %1875 = vmatpush3.msra.mxu1 %v2813_v19 }
  0x6a   : > { %1843 = vmatprep.subr.mxu0 %v2558_v2  ;;  %1876 = vmatprep.subr.mxu1 %v2558_v2 }
  0x6b   : > { %1844 = vmatpush3.msra.mxu0 %v2810_v18  ;;  %1877 = vmatpush3.msra.mxu1 %v2821_v21 }
  0x6c   : > { %1845 = vmatprep.subr.mxu0 %v2558_v2  ;;  %1878 = vmatprep.subr.mxu1 %v2558_v2 }
  0x6d   : > { %1846 = vmatpush3.msra.mxu0 %v2818_v20  ;;  %1879 = vmatpush3.msra.mxu1 %v2829_v23 }
  0x6e   : > { %1847 = vmatprep.subr.mxu0 %v2558_v2  ;;  %1880 = vmatprep.subr.mxu1 %v2558_v2 }
  0x6f   : > { %1848 = vmatpush3.msra.mxu0 %v2826_v22  ;;  %1881 = vmatpush3.msra.mxu1 %v2837_v25 }
  0x70   : > { %1849 = vmatprep.subr.mxu0 %v2558_v2  ;;  %1882 = vmatprep.subr.mxu1 %v2558_v2 }
  0x71   : > { %1850 = vmatpush3.msra.mxu0 %v2834_v24  ;;  %1883 = vmatpush3.msra.mxu1 %v2845_v27 }
  0x72   : > { %1851 = vmatprep.subr.mxu0 %v2558_v2  ;;  %1884 = vmatprep.subr.mxu1 %v2558_v2 }
  0x73   : > { %1852 = vmatpush3.msra.mxu0 %v2842_v26  ;;  %1885 = vmatpush3.msra.mxu1 %v2853_v29 }
  0x74   : > { %1853 = vmatprep.subr.mxu0 %v2558_v2  ;;  %1886 = vmatprep.subr.mxu1 %v2558_v2 }
  0x75   : > { %1854 = vmatpush3.msra.mxu0 %v2850_v28  ;;  %1887 = vmatpush3.msra.mxu1 %v2861_v31 }
  0x76   : > { %1855 = vmatprep.subr.mxu0 %v2558_v2  ;;  %1888 = vmatprep.subr.mxu1 %v2558_v2 }
  0x77   : > { %1856 = vmatpush3.msra.mxu0 %v2858_v30  ;;  %1889 = vmatpush3.msra.mxu1 %v2867_v33 }
  0x78   : > { %1858 = vmatmul.mubr.f32.vlgmr.msra.gmra.mxu0 %v311_v32  ;;  %1895 = vmatprep.subr.mxu0 %v2558_v2 }
  0x79   : > { %1890 = vmatprep.subr.mxu1 %v2558_v2  ;;  %1896 = vmatpush3.msra.mxu0 %v2871_v34 }
  0x7a   : > { %1891 = vmatpush3.msra.mxu1 %v2874_v35  ;;  %1897 = vmatprep.subr.mxu0 %v2558_v2 }
  0x7b   : > { %1930 = vmatprep.subr.mxu1 %v2558_v2  ;;  %1893 = vmatmul.mubr.f32.vlgmr.msra.gmra.mxu1 %v313_v36 }
  0x7c   : > { %1931 = vmatpush3.msra.mxu1 %v2745_v1  ;;  %1898 = vmatpush3.msra.mxu0 %v2880_v37 }
  0x7d   : > { %1932 = vmatprep.subr.mxu1 %v2558_v2  ;;  %1899 = vmatprep.subr.mxu0 %v2558_v2 }
  0x7e   : > { %1933 = vmatpush3.msra.mxu1 %v2748_v3  ;;  %1900 = vmatpush3.msra.mxu0 %v2885_v38 }
  0x7f   : > { %1934 = vmatprep.subr.mxu1 %v2558_v2  ;;  %1901 = vmatprep.subr.mxu0 %v2558_v2 }
  0x80   : > { %1935 = vmatpush3.msra.mxu1 %v2755_v4  ;;  %1902 = vmatpush3.msra.mxu0 %v2891_v39 }
  0x81   : > { %1936 = vmatprep.subr.mxu1 %v2558_v2  ;;  %1903 = vmatprep.subr.mxu0 %v2558_v2 }
  0x82   : > { %1937 = vmatpush3.msra.mxu1 %v2761_v5  ;;  %1904 = vmatpush3.msra.mxu0 %v2897_v40 }
  0x83   : > { %1938 = vmatprep.subr.mxu1 %v2558_v2  ;;  %1905 = vmatprep.subr.mxu0 %v2558_v2 }
  0x84   : > { %1939 = vmatpush3.msra.mxu1 %v2770_v8  ;;  %1906 = vmatpush3.msra.mxu0 %v2903_v41 }
  0x85   : > { %1940 = vmatprep.subr.mxu1 %v2558_v2  ;;  %1907 = vmatprep.subr.mxu0 %v2558_v2 }
  0x86   : > { %1941 = vmatpush3.msra.mxu1 %v2778_v10  ;;  %1908 = vmatpush3.msra.mxu0 %v2909_v42 }
  0x87   : > { %1942 = vmatprep.subr.mxu1 %v2558_v2  ;;  %1909 = vmatprep.subr.mxu0 %v2558_v2 }
  0x88   : > { %1943 = vmatpush3.msra.mxu1 %v2786_v12  ;;  %1927 = vmatprep.mubr.msk.f32.mxu0 %vm2559_vm0, %v2558_v2 }
  0x89   : > { %1944 = vmatprep.subr.mxu1 %v2558_v2  ;;  %1962 = vmatprep.mubr.msk.f32.mxu1 %vm2559_vm0, %v2558_v2 }
  0x8a   : > { %1945 = vmatpush3.msra.mxu1 %v2794_v14  ;;  %1910 = vmatpush3.msra.mxu0 %v2943_v43 }
  0x8b   : > { %1946 = vmatprep.subr.mxu1 %v2558_v2  ;;  %1911 = vmatprep.subr.mxu0 %v2558_v2 }
  0x8c   : > { %1947 = vmatpush3.msra.mxu1 %v2802_v16  ;;  %1912 = vmatpush3.msra.mxu0 %v2947_v44 }
  0x8d   : > { %1948 = vmatprep.subr.mxu1 %v2558_v2  ;;  %1913 = vmatprep.subr.mxu0 %v2558_v2 }
  0x8e   : > { %1949 = vmatpush3.msra.mxu1 %v2810_v18  ;;  %1914 = vmatpush3.msra.mxu0 %v2951_v45 }
  0x8f   : > { %1950 = vmatprep.subr.mxu1 %v2558_v2  ;;  %1915 = vmatprep.subr.mxu0 %v2558_v2 }
  0x90   : > { %1951 = vmatpush3.msra.mxu1 %v2818_v20  ;;  %1916 = vmatpush3.msra.mxu0 %v2955_v46 }
  0x91   : > { %1952 = vmatprep.subr.mxu1 %v2558_v2  ;;  %1917 = vmatprep.subr.mxu0 %v2558_v2 }
  0x92   : > { %1953 = vmatpush3.msra.mxu1 %v2826_v22  ;;  %1918 = vmatpush3.msra.mxu0 %v2959_v47 }
  0x93   : > { %1954 = vmatprep.subr.mxu1 %v2558_v2  ;;  %1919 = vmatprep.subr.mxu0 %v2558_v2 }
  0x94   : > { %1955 = vmatpush3.msra.mxu1 %v2834_v24  ;;  %1920 = vmatpush3.msra.mxu0 %v2963_v48 }
  0x95   : > { %1956 = vmatprep.subr.mxu1 %v2558_v2  ;;  %1921 = vmatprep.subr.mxu0 %v2558_v2 }
  0x96   : > { %1957 = vmatpush3.msra.mxu1 %v2842_v26  ;;  %1922 = vmatpush3.msra.mxu0 %v2967_v49 }
  0x97   : > { %1958 = vmatprep.subr.mxu1 %v2558_v2  ;;  %1923 = vmatprep.subr.mxu0 %v2558_v2 }
  0x98   : > { %1959 = vmatpush3.msra.mxu1 %v2850_v28  ;;  %1924 = vmatpush3.msra.mxu0 %v2971_v50 }
  0x99   : > { %1960 = vmatprep.subr.mxu1 %v2558_v2  ;;  %1925 = vmatprep.subr.mxu0 %v2558_v2 }
  0x9a   : > { %1961 = vmatpush3.msra.mxu1 %v2858_v30  ;;  %1926 = vmatpush3.msra.mxu0 %v2975_v51 }
  0x9b   : > { %2000 = vmatprep.subr.mxu1 %v2558_v2  ;;  %1965 = vmatprep.subr.mxu0 %v2558_v2 }
 0x138   : > { %v404_v53 = vpop.f32.mrf.mxu0 }
 0x139   : > { %v408_v54 = vadd.f32 %v404_v53, %v321_v52 }
 0x13a   : > { %v1859_v55 = vpop.f32.mrf.mxu0 }
 0x13b   : > { %2340 = vtanh.f32 %v408_v54  ;;  %v2980_v56 = vpop.f32.mrf.mxu1 }
 0x13d   : > { %v1894_v57 = vpop.f32.mrf.mxu1 }
 0x148   : > { %v2341_v58 = vpop.eup %2340 }
 0x149   : > { %411 = vst.msk [vmem:[%s2740_s12] sm:$0xff] %vm410_vm1, %v2341_v58  ;;  %1928 = vmatmul.mubr.f32.vlgmr.msra.gmra.mxu0 %v2341_v58  ;;  %1963 = vmatmul.mubr.f32.vlgmr.msra.gmra.mxu1 %v2341_v58 }
 0x14a   : > { %2001 = vmatpush3.msra.mxu1 %v2871_v34  ;;  %1966 = vmatpush3.msra.mxu0 %v2763_v6 }
 0x14b   : > { %2002 = vmatprep.subr.mxu1 %v2558_v2  ;;  %1967 = vmatprep.subr.mxu0 %v2558_v2 }
 0x14c   : > { %2003 = vmatpush3.msra.mxu1 %v2880_v37  ;;  %1968 = vmatpush3.msra.mxu0 %v2767_v7 }
 0x14d   : > { %2004 = vmatprep.subr.mxu1 %v2558_v2  ;;  %1969 = vmatprep.subr.mxu0 %v2558_v2 }
 0x14e   : > { %2005 = vmatpush3.msra.mxu1 %v2885_v38  ;;  %1970 = vmatpush3.msra.mxu0 %v2773_v9 }
 0x14f   : > { %2006 = vmatprep.subr.mxu1 %v2558_v2  ;;  %1971 = vmatprep.subr.mxu0 %v2558_v2 }
 0x150   : > { %2007 = vmatpush3.msra.mxu1 %v2891_v39  ;;  %1972 = vmatpush3.msra.mxu0 %v2781_v11 }
 0x151   : > { %2008 = vmatprep.subr.mxu1 %v2558_v2  ;;  %1973 = vmatprep.subr.mxu0 %v2558_v2 }
 0x152   : > { %2009 = vmatpush3.msra.mxu1 %v2897_v40  ;;  %1974 = vmatpush3.msra.mxu0 %v2789_v13 }
 0x153   : > { %2010 = vmatprep.subr.mxu1 %v2558_v2  ;;  %1975 = vmatprep.subr.mxu0 %v2558_v2 }
 0x154   : > { %2011 = vmatpush3.msra.mxu1 %v2903_v41  ;;  %1976 = vmatpush3.msra.mxu0 %v2797_v15 }
 0x155   : > { %2012 = vmatprep.subr.mxu1 %v2558_v2  ;;  %1977 = vmatprep.subr.mxu0 %v2558_v2 }
 0x156   : > { %2013 = vmatpush3.msra.mxu1 %v2909_v42  ;;  %1978 = vmatpush3.msra.mxu0 %v2805_v17 }
 0x157   : > { %2014 = vmatprep.subr.mxu1 %v2558_v2  ;;  %1979 = vmatprep.subr.mxu0 %v2558_v2 }
 0x158   : > { %2015 = vmatpush3.msra.mxu1 %v2943_v43  ;;  %1980 = vmatpush3.msra.mxu0 %v2813_v19 }
 0x159   : > { %2016 = vmatprep.subr.mxu1 %v2558_v2  ;;  %1981 = vmatprep.subr.mxu0 %v2558_v2 }
 0x15a   : > { %2017 = vmatpush3.msra.mxu1 %v2947_v44  ;;  %1982 = vmatpush3.msra.mxu0 %v2821_v21 }
 0x15b   : > { %2018 = vmatprep.subr.mxu1 %v2558_v2  ;;  %1983 = vmatprep.subr.mxu0 %v2558_v2 }
 0x15c   : > { %2019 = vmatpush3.msra.mxu1 %v2951_v45  ;;  %1984 = vmatpush3.msra.mxu0 %v2829_v23 }
 0x15d   : > { %2020 = vmatprep.subr.mxu1 %v2558_v2  ;;  %1985 = vmatprep.subr.mxu0 %v2558_v2 }
 0x15e   : > { %2021 = vmatpush3.msra.mxu1 %v2955_v46  ;;  %1986 = vmatpush3.msra.mxu0 %v2837_v25 }
 0x15f   : > { %2022 = vmatprep.subr.mxu1 %v2558_v2  ;;  %1987 = vmatprep.subr.mxu0 %v2558_v2 }
 0x160   : > { %2023 = vmatpush3.msra.mxu1 %v2959_v47  ;;  %1988 = vmatpush3.msra.mxu0 %v2845_v27 }
 0x161   : > { %2024 = vmatprep.subr.mxu1 %v2558_v2  ;;  %1989 = vmatprep.subr.mxu0 %v2558_v2 }
 0x162   : > { %2025 = vmatpush3.msra.mxu1 %v2963_v48  ;;  %1990 = vmatpush3.msra.mxu0 %v2853_v29 }
 0x163   : > { %2026 = vmatprep.subr.mxu1 %v2558_v2  ;;  %1991 = vmatprep.subr.mxu0 %v2558_v2 }
 0x164   : > { %2027 = vmatpush3.msra.mxu1 %v2967_v49  ;;  %1992 = vmatpush3.msra.mxu0 %v2861_v31 }
 0x165   : > { %2028 = vmatprep.subr.mxu1 %v2558_v2  ;;  %1993 = vmatprep.subr.mxu0 %v2558_v2 }
 0x166   : > { %2029 = vmatpush3.msra.mxu1 %v2971_v50  ;;  %1994 = vmatpush3.msra.mxu0 %v2867_v33 }
 0x167   : > { %2030 = vmatprep.subr.mxu1 %v2558_v2  ;;  %1995 = vmatprep.subr.mxu0 %v2558_v2 }
 0x168   : > { %2031 = vmatpush3.msra.mxu1 %v2975_v51  ;;  %2032 = vmatprep.mubr.msk.f32.mxu1 %vm2559_vm0, %v2558_v2 }
 0x169   : > { %1996 = vmatpush3.msra.mxu0 %v2874_v35  ;;  %1997 = vmatprep.mubr.msk.f32.mxu0 %vm2559_vm0, %v2558_v2 }
 0x16a   : > { %2035 = vmatprep.subr.mxu0 %v2558_v2  ;;  %2070 = vmatprep.subr.mxu1 %v2558_v2 }
 0x209   : > { %v581_v61 = vpop.f32.mrf.mxu0  ;;  %v674_v62 = vpop.f32.mrf.mxu1 }
 0x20a   : > { %v582_v63 = vadd.f32 %v581_v61, %v2980_v56  ;;  %v678_v0 = vadd.f32 %v1596_v59, %v674_v62 }
 0x20b   : > { %v1929_v32 = vpop.f32.mrf.mxu0  ;;  %v1964_v36 = vpop.f32.mrf.mxu1 }
 0x20c   : > { %v585_v52 = vadd.f32 %v3056_v60, %v582_v63  ;;  %2342 = vtanh.f32 %v678_v0 }
 0x20e   : > { %2344 = vtanh.f32 %v585_v52 }
 0x219   : > { %v3060_v53 = vpop.eup %2342 }
 0x21a   : > { %1597 = vst.msk [vmem:[%s2740_s12 + $0x10] sm:$0xff] %vm410_vm1, %v3060_v53  ;;  %2033 = vmatmul.mubr.f32.vlgmr.msra.gmra.mxu1 %v3060_v53 }
 0x21b   : > { %v2345_v54 = vpop.eup %2344  ;;  %2071 = vmatpush3.msra.mxu1 %v2763_v6  ;;  %2102 = vmatprep.mubr.msk.f32.mxu1 %vm2559_vm0, %v2558_v2 }
 0x21c   : > { %1595 = vst.msk [vmem:[%s2740_s12 + $0x8] sm:$0xff] %vm410_vm1, %v2345_v54  ;;  %589 = vst.msk [vmem:[%s2742_s13] sm:$0xff] %vm410_vm1, %v2345_v54  ;;  %1998 = vmatmul.mubr.f32.vlgmr.msra.gmra.mxu0 %v2345_v54  ;;  %2072 = vmatprep.subr.mxu1 %v2558_v2 }
 0x21d   : > { %2036 = vmatpush3.msra.mxu0 %v2745_v1  ;;  %2067 = vmatprep.mubr.msk.f32.mxu0 %vm2559_vm0, %v2558_v2 }
 0x21e   : > { %2037 = vmatprep.subr.mxu0 %v2558_v2  ;;  %2073 = vmatpush3.msra.mxu1 %v2767_v7 }
 0x21f   : > { %2038 = vmatpush3.msra.mxu0 %v2748_v3  ;;  %2074 = vmatprep.subr.mxu1 %v2558_v2 }
 0x220   : > { %2039 = vmatprep.subr.mxu0 %v2558_v2  ;;  %2075 = vmatpush3.msra.mxu1 %v2773_v9 }
 0x221   : > { %2040 = vmatpush3.msra.mxu0 %v2755_v4  ;;  %2076 = vmatprep.subr.mxu1 %v2558_v2 }
 0x222   : > { %2041 = vmatprep.subr.mxu0 %v2558_v2  ;;  %2077 = vmatpush3.msra.mxu1 %v2781_v11 }
 0x223   : > { %2042 = vmatpush3.msra.mxu0 %v2761_v5  ;;  %2078 = vmatprep.subr.mxu1 %v2558_v2 }
 0x224   : > { %2043 = vmatprep.subr.mxu0 %v2558_v2  ;;  %2079 = vmatpush3.msra.mxu1 %v2789_v13 }
 0x225   : > { %2044 = vmatpush3.msra.mxu0 %v2770_v8  ;;  %2080 = vmatprep.subr.mxu1 %v2558_v2 }
 0x226   : > { %2045 = vmatprep.subr.mxu0 %v2558_v2  ;;  %2081 = vmatpush3.msra.mxu1 %v2797_v15 }
 0x227   : > { %2046 = vmatpush3.msra.mxu0 %v2778_v10  ;;  %2082 = vmatprep.subr.mxu1 %v2558_v2 }
 0x228   : > { %2047 = vmatprep.subr.mxu0 %v2558_v2  ;;  %2083 = vmatpush3.msra.mxu1 %v2805_v17 }
 0x229   : > { %2048 = vmatpush3.msra.mxu0 %v2786_v12  ;;  %2084 = vmatprep.subr.mxu1 %v2558_v2 }
 0x22a   : > { %2049 = vmatprep.subr.mxu0 %v2558_v2  ;;  %2085 = vmatpush3.msra.mxu1 %v2813_v19 }
 0x22b   : > { %2050 = vmatpush3.msra.mxu0 %v2794_v14  ;;  %2086 = vmatprep.subr.mxu1 %v2558_v2 }
 0x22c   : > { %2051 = vmatprep.subr.mxu0 %v2558_v2  ;;  %2087 = vmatpush3.msra.mxu1 %v2821_v21 }
 0x22d   : > { %2052 = vmatpush3.msra.mxu0 %v2802_v16  ;;  %2088 = vmatprep.subr.mxu1 %v2558_v2 }
 0x22e   : > { %2053 = vmatprep.subr.mxu0 %v2558_v2  ;;  %2089 = vmatpush3.msra.mxu1 %v2829_v23 }
 0x22f   : > { %2054 = vmatpush3.msra.mxu0 %v2810_v18  ;;  %2090 = vmatprep.subr.mxu1 %v2558_v2 }
 0x230   : > { %2055 = vmatprep.subr.mxu0 %v2558_v2  ;;  %2091 = vmatpush3.msra.mxu1 %v2837_v25 }
 0x231   : > { %2056 = vmatpush3.msra.mxu0 %v2818_v20  ;;  %2092 = vmatprep.subr.mxu1 %v2558_v2 }
 0x232   : > { %2057 = vmatprep.subr.mxu0 %v2558_v2  ;;  %2093 = vmatpush3.msra.mxu1 %v2845_v27 }
 0x233   : > { %2058 = vmatpush3.msra.mxu0 %v2826_v22  ;;  %2094 = vmatprep.subr.mxu1 %v2558_v2 }
 0x234   : > { %2059 = vmatprep.subr.mxu0 %v2558_v2  ;;  %2095 = vmatpush3.msra.mxu1 %v2853_v29 }
 0x235   : > { %2060 = vmatpush3.msra.mxu0 %v2834_v24  ;;  %2096 = vmatprep.subr.mxu1 %v2558_v2 }
 0x236   : > { %2061 = vmatprep.subr.mxu0 %v2558_v2  ;;  %2097 = vmatpush3.msra.mxu1 %v2861_v31 }
 0x237   : > { %2062 = vmatpush3.msra.mxu0 %v2842_v26  ;;  %2098 = vmatprep.subr.mxu1 %v2558_v2 }
 0x238   : > { %2063 = vmatprep.subr.mxu0 %v2558_v2  ;;  %2099 = vmatpush3.msra.mxu1 %v2867_v33 }
 0x239   : > { %2064 = vmatpush3.msra.mxu0 %v2850_v28  ;;  %2100 = vmatprep.subr.mxu1 %v2558_v2 }
 0x23a   : > { %2065 = vmatprep.subr.mxu0 %v2558_v2  ;;  %2101 = vmatpush3.msra.mxu1 %v2874_v35 }
 0x23b   : > { %2066 = vmatpush3.msra.mxu0 %v2858_v30  ;;  %2140 = vmatprep.subr.mxu1 %v2558_v2 }
 0x23c   : > { %2068 = vmatmul.mubr.f32.vlgmr.msra.gmra.mxu0 %v3060_v53  ;;  %2105 = vmatprep.subr.mxu0 %v2558_v2 }
 0x23d   : > { %2106 = vmatpush3.msra.mxu0 %v2871_v34  ;;  %2137 = vmatprep.mubr.msk.f32.mxu0 %vm2559_vm0, %v2558_v2 }
 0x23e   : > { %2107 = vmatprep.subr.mxu0 %v2558_v2 }
 0x23f   : > { %2108 = vmatpush3.msra.mxu0 %v2880_v37 }
 0x240   : > { %2109 = vmatprep.subr.mxu0 %v2558_v2 }
 0x241   : > { %2110 = vmatpush3.msra.mxu0 %v2885_v38 }
 0x242   : > { %2111 = vmatprep.subr.mxu0 %v2558_v2 }
 0x243   : > { %2112 = vmatpush3.msra.mxu0 %v2891_v39 }
 0x244   : > { %2113 = vmatprep.subr.mxu0 %v2558_v2 }
 0x245   : > { %2114 = vmatpush3.msra.mxu0 %v2897_v40 }
 0x246   : > { %2115 = vmatprep.subr.mxu0 %v2558_v2 }
 0x247   : > { %2116 = vmatpush3.msra.mxu0 %v2903_v41 }
 0x248   : > { %2117 = vmatprep.subr.mxu0 %v2558_v2 }
 0x249   : > { %2118 = vmatpush3.msra.mxu0 %v2909_v42 }
 0x24a   : > { %2119 = vmatprep.subr.mxu0 %v2558_v2 }
 0x24b   : > { %2120 = vmatpush3.msra.mxu0 %v2943_v43 }
 0x24c   : > { %2121 = vmatprep.subr.mxu0 %v2558_v2 }
 0x24d   : > { %2122 = vmatpush3.msra.mxu0 %v2947_v44 }
 0x24e   : > { %2123 = vmatprep.subr.mxu0 %v2558_v2 }
 0x24f   : > { %2124 = vmatpush3.msra.mxu0 %v2951_v45 }
 0x250   : > { %2125 = vmatprep.subr.mxu0 %v2558_v2 }
 0x251   : > { %2126 = vmatpush3.msra.mxu0 %v2955_v46 }
 0x252   : > { %2127 = vmatprep.subr.mxu0 %v2558_v2 }
 0x253   : > { %2128 = vmatpush3.msra.mxu0 %v2959_v47 }
 0x254   : > { %2129 = vmatprep.subr.mxu0 %v2558_v2 }
 0x255   : > { %2130 = vmatpush3.msra.mxu0 %v2963_v48 }
 0x256   : > { %2131 = vmatprep.subr.mxu0 %v2558_v2 }
 0x257   : > { %2132 = vmatpush3.msra.mxu0 %v2967_v49 }
 0x258   : > { %2133 = vmatprep.subr.mxu0 %v2558_v2 }
 0x259   : > { %2134 = vmatpush3.msra.mxu0 %v2971_v50 }
 0x25a   : > { %2135 = vmatprep.subr.mxu0 %v2558_v2 }
 0x25b   : > { %2136 = vmatpush3.msra.mxu0 %v2975_v51 }
 0x25c   : > { %2175 = vmatprep.subr.mxu0 %v2558_v2 }
 0x2da   : > { %v850_v17 = vpop.f32.mrf.mxu1 }
 0x2dc   : > { %v780_v19 = vpop.f32.mrf.mxu0  ;;  %v2034_v21 = vpop.f32.mrf.mxu1 }
 0x2dd   : > { %v851_v23 = vadd.f32 %v850_v17, %v780_v19 }
 0x2de   : > { %v1999_v25 = vpop.f32.mrf.mxu0 }
 0x2df   : > { %v854_v27 = vadd.f32 %v3056_v60, %v851_v23 }
 0x2e1   : > { %2346 = vtanh.f32 %v854_v27 }
 0x2ee   : > { %v2347_v29 = vpop.eup %2346 }
 0x2ef   : > { %1598 = vst.msk [vmem:[%s2740_s12 + $0x18] sm:$0xff] %vm410_vm1, %v2347_v29  ;;  %1599 = vst.msk [vmem:[%s2742_s13 + $0x8] sm:$0xff] %vm410_vm1, %v2347_v29  ;;  %2103 = vmatmul.mubr.f32.vlgmr.msra.gmra.mxu1 %v2347_v29 }
 0x2f0   : > { %2141 = vmatpush3.msra.mxu1 %v2745_v1  ;;  %2172 = vmatprep.mubr.msk.f32.mxu1 %vm2559_vm0, %v2558_v2  ;;  %v1600_v1 = vld [vmem:[%s2729_s24 + $0x10] sm:$0xff] }
 0x2f1   : > { %2142 = vmatprep.subr.mxu1 %v2558_v2 }
 0x2f2   : > { %2143 = vmatpush3.msra.mxu1 %v2748_v3 }
 0x2f3   : > { %2144 = vmatprep.subr.mxu1 %v2558_v2 }
 0x2f4   : > { %2145 = vmatpush3.msra.mxu1 %v2755_v4 }
 0x2f5   : > { %2146 = vmatprep.subr.mxu1 %v2558_v2 }
 0x2f6   : > { %2147 = vmatpush3.msra.mxu1 %v2761_v5 }
 0x2f7   : > { %2148 = vmatprep.subr.mxu1 %v2558_v2 }
 0x2f8   : > { %2149 = vmatpush3.msra.mxu1 %v2770_v8  ;;  %v1245_v8 = vld [vmem:[#allocation6 + $0xb8] sm:$0xff] }
 0x2f9   : > { %2150 = vmatprep.subr.mxu1 %v2558_v2 }
 0x2fa   : > { %2151 = vmatpush3.msra.mxu1 %v2778_v10  ;;  %v1243_v10 = vld [vmem:[#allocation6 + $0xa8] sm:$0xff] }
 0x2fb   : > { %2152 = vmatprep.subr.mxu1 %v2558_v2 }
 0x2fc   : > { %v944_v3 = vpop.f32.mrf.mxu0  ;;  %2153 = vmatpush3.msra.mxu1 %v2786_v12  ;;  %v1241_v12 = vld [vmem:[#allocation6 + $0x98] sm:$0xff] }
 0x2fd   : > { %v948_v31 = vadd.f32 %v1600_v1, %v944_v3  ;;  %2154 = vmatprep.subr.mxu1 %v2558_v2 }
 0x2fe   : > { %v2069_v4 = vpop.f32.mrf.mxu0  ;;  %2155 = vmatpush3.msra.mxu1 %v2794_v14  ;;  %v1239_v14 = vld [vmem:[#allocation6 + $0x88] sm:$0xff] }
 0x2ff   : > { %2348 = vtanh.f32 %v948_v31  ;;  %2156 = vmatprep.subr.mxu1 %v2558_v2 }
 0x300   : > { %2157 = vmatpush3.msra.mxu1 %v2802_v16 }
 0x301   : > { %2158 = vmatprep.subr.mxu1 %v2558_v2 }
 0x302   : > { %2159 = vmatpush3.msra.mxu1 %v2810_v18 }
 0x303   : > { %2160 = vmatprep.subr.mxu1 %v2558_v2 }
 0x304   : > { %2161 = vmatpush3.msra.mxu1 %v2818_v20 }
 0x305   : > { %2162 = vmatprep.subr.mxu1 %v2558_v2 }
 0x306   : > { %2163 = vmatpush3.msra.mxu1 %v2826_v22  ;;  %v1604_v22 = vld [vmem:[%s2729_s24 + $0x18] sm:$0xff]  ;;  %s3294_s24 = scalar_lea.hbm %s3380_s5, %s1620_s10 }
 0x307   : > { %2164 = vmatprep.subr.mxu1 %v2558_v2 }
 0x308   : > { %2165 = vmatpush3.msra.mxu1 %v2834_v24 }
 0x309   : > { %2166 = vmatprep.subr.mxu1 %v2558_v2 }
 0x30a   : > { %2167 = vmatpush3.msra.mxu1 %v2842_v26 }
 0x30b   : > { %2168 = vmatprep.subr.mxu1 %v2558_v2 }
 0x30c   : > { %v2349_v5 = vpop.eup %2348  ;;  %2169 = vmatpush3.msra.mxu1 %v2850_v28 }
 0x30d   : > { %1601 = vst.msk [vmem:[%s2740_s12 + $0x20] sm:$0xff] %vm410_vm1, %v2349_v5  ;;  %2138 = vmatmul.mubr.f32.vlgmr.msra.gmra.mxu0 %v2349_v5  ;;  %2170 = vmatprep.subr.mxu1 %v2558_v2 }
 0x30e   : > { %2171 = vmatpush3.msra.mxu1 %v2858_v30  ;;  %2176 = vmatpush3.msra.mxu0 %v2763_v6  ;;  %v1247_v6 = vld [vmem:[#allocation6 + $0xc8] sm:$0xff] }
 0x30f   : > { %2173 = vmatmul.mubr.f32.vlgmr.msra.gmra.mxu1 %v2349_v5  ;;  %2210 = vmatprep.subr.mxu1 %v2558_v2 }
 0x310   : > { %2211 = vmatpush3.msra.mxu1 %v2871_v34  ;;  %2177 = vmatprep.subr.mxu0 %v2558_v2 }
 0x311   : > { %2212 = vmatprep.subr.mxu1 %v2558_v2  ;;  %2178 = vmatpush3.msra.mxu0 %v2767_v7  ;;  %v1246_v7 = vld [vmem:[#allocation6 + $0xc0] sm:$0xff] }
 0x312   : > { %2213 = vmatpush3.msra.mxu1 %v2880_v37  ;;  %2179 = vmatprep.subr.mxu0 %v2558_v2 }
 0x313   : > { %2214 = vmatprep.subr.mxu1 %v2558_v2  ;;  %2180 = vmatpush3.msra.mxu0 %v2773_v9  ;;  %v1244_v9 = vld [vmem:[#allocation6 + $0xb0] sm:$0xff] }
 0x314   : > { %2215 = vmatpush3.msra.mxu1 %v2885_v38  ;;  %2181 = vmatprep.subr.mxu0 %v2558_v2 }
 0x315   : > { %2216 = vmatprep.subr.mxu1 %v2558_v2  ;;  %2182 = vmatpush3.msra.mxu0 %v2781_v11  ;;  %v1242_v11 = vld [vmem:[#allocation6 + $0xa0] sm:$0xff] }
 0x316   : > { %2217 = vmatpush3.msra.mxu1 %v2891_v39  ;;  %2183 = vmatprep.subr.mxu0 %v2558_v2 }
 0x317   : > { %2218 = vmatprep.subr.mxu1 %v2558_v2  ;;  %2184 = vmatpush3.msra.mxu0 %v2789_v13  ;;  %v1240_v13 = vld [vmem:[#allocation6 + $0x90] sm:$0xff] }
 0x318   : > { %2219 = vmatpush3.msra.mxu1 %v2897_v40  ;;  %2185 = vmatprep.subr.mxu0 %v2558_v2 }
 0x319   : > { %2220 = vmatprep.subr.mxu1 %v2558_v2  ;;  %2186 = vmatpush3.msra.mxu0 %v2797_v15  ;;  %v1238_v15 = vld [vmem:[#allocation6 + $0x80] sm:$0xff] }
 0x31a   : > { %2221 = vmatpush3.msra.mxu1 %v2903_v41  ;;  %2187 = vmatprep.subr.mxu0 %v2558_v2 }
 0x31b   : > { %2222 = vmatprep.subr.mxu1 %v2558_v2  ;;  %2207 = vmatprep.mubr.msk.f32.mxu0 %vm2559_vm0, %v2558_v2 }
 0x31c   : > { %2223 = vmatpush3.msra.mxu1 %v2909_v42  ;;  %2242 = vmatprep.mubr.msk.f32.mxu1 %vm2559_vm0, %v2558_v2 }
 0x31d   : > { %2224 = vmatprep.subr.mxu1 %v2558_v2  ;;  %2188 = vmatpush3.msra.mxu0 %v1247_v6 }
 0x31e   : > { %2225 = vmatpush3.msra.mxu1 %v2943_v43  ;;  %2189 = vmatprep.subr.mxu0 %v2558_v2 }
 0x31f   : > { %2226 = vmatprep.subr.mxu1 %v2558_v2  ;;  %2190 = vmatpush3.msra.mxu0 %v1246_v7 }
 0x320   : > { %2227 = vmatpush3.msra.mxu1 %v2947_v44  ;;  %2191 = vmatprep.subr.mxu0 %v2558_v2 }
 0x321   : > { %2228 = vmatprep.subr.mxu1 %v2558_v2  ;;  %2192 = vmatpush3.msra.mxu0 %v1245_v8 }
 0x322   : > { %2229 = vmatpush3.msra.mxu1 %v2951_v45  ;;  %2193 = vmatprep.subr.mxu0 %v2558_v2 }
 0x323   : > { %2230 = vmatprep.subr.mxu1 %v2558_v2  ;;  %2194 = vmatpush3.msra.mxu0 %v1244_v9 }
 0x324   : > { %2231 = vmatpush3.msra.mxu1 %v2955_v46  ;;  %2195 = vmatprep.subr.mxu0 %v2558_v2 }
 0x325   : > { %2232 = vmatprep.subr.mxu1 %v2558_v2  ;;  %2196 = vmatpush3.msra.mxu0 %v1243_v10 }
 0x326   : > { %2233 = vmatpush3.msra.mxu1 %v2959_v47  ;;  %2197 = vmatprep.subr.mxu0 %v2558_v2 }
 0x327   : > { %2234 = vmatprep.subr.mxu1 %v2558_v2  ;;  %2198 = vmatpush3.msra.mxu0 %v1242_v11 }
 0x328   : > { %2235 = vmatpush3.msra.mxu1 %v2963_v48  ;;  %2199 = vmatprep.subr.mxu0 %v2558_v2 }
 0x329   : > { %2236 = vmatprep.subr.mxu1 %v2558_v2  ;;  %2200 = vmatpush3.msra.mxu0 %v1241_v12 }
 0x32a   : > { %2237 = vmatpush3.msra.mxu1 %v2967_v49  ;;  %2201 = vmatprep.subr.mxu0 %v2558_v2 }
 0x32b   : > { %2238 = vmatprep.subr.mxu1 %v2558_v2  ;;  %2202 = vmatpush3.msra.mxu0 %v1240_v13 }
 0x32c   : > { %2239 = vmatpush3.msra.mxu1 %v2971_v50  ;;  %2203 = vmatprep.subr.mxu0 %v2558_v2 }
 0x32d   : > { %2240 = vmatprep.subr.mxu1 %v2558_v2  ;;  %2204 = vmatpush3.msra.mxu0 %v1239_v14 }
 0x32e   : > { %2241 = vmatpush3.msra.mxu1 %v2975_v51  ;;  %2205 = vmatprep.subr.mxu0 %v2558_v2 }
 0x32f   : > { %2206 = vmatpush3.msra.mxu0 %v1238_v15 }
 0x3af   : > { %v1050_v16 = vpop.f32.mrf.mxu1 }
 0x3b1   : > { %v2104_v18 = vpop.f32.mrf.mxu1 }
 0x3cd   : > { %v1120_v20 = vpop.f32.mrf.mxu0 }
 0x3ce   : > { %v1121_v24 = vadd.f32 %v1120_v20, %v1050_v16 }
 0x3cf   : > { %v2139_v26 = vpop.f32.mrf.mxu0  ;;  %v1214_v28 = vpop.f32.mrf.mxu1 }
 0x3d0   : > { %v1124_v30 = vadd.f32 %v3056_v60, %v1121_v24  ;;  %v1218_v33 = vadd.f32 %v1604_v22, %v1214_v28 }
 0x3d1   : > { %v2174_v34 = vpop.f32.mrf.mxu1 }
 0x3d2   : > { %2350 = vtanh.f32 %v1124_v30 }
 0x3d3   : > { %2352 = vtanh.f32 %v1218_v33 }
 0x3df   : > { %v2351_v2 = vpop.eup %2350 }
 0x3e0   : > { %v2353_v35 = vpop.eup %2352  ;;  %1602 = vst.msk [vmem:[%s2740_s12 + $0x28] sm:$0xff] %vm410_vm1, %v2351_v2  ;;  %1603 = vst.msk [vmem:[%s2742_s13 + $0x10] sm:$0xff] %vm410_vm1, %v2351_v2  ;;  %2208 = vmatmul.mubr.f32.vlgmr.msra.gmra.mxu0 %v2351_v2 }
 0x3e1   : > { %1605 = vst.msk [vmem:[%s2740_s12 + $0x30] sm:$0xff] %vm410_vm1, %v2353_v35  ;;  %1400 = vst [vmem:[#allocation2] sm:$0xff] %v2353_v35  ;;  %2243 = vmatmul.mubr.f32.vlgmr.msra.gmra.mxu1 %v2353_v35 }
 0x4a0   : > { %v1320_v37 = vpop.f32.mrf.mxu0 }
 0x4a1   : > { %v1390_v38 = vpop.f32.mrf.mxu1 }
 0x4a2   : > { %v1391_v39 = vadd.f32 %v1390_v38, %v1320_v37  ;;  %v2209_v40 = vpop.f32.mrf.mxu0 }
 0x4a3   : > { %v2244_v41 = vpop.f32.mrf.mxu1 }
 0x4a4   : > { %v1394_v42 = vadd.f32 %v3056_v60, %v1391_v39 }
 0x4a6   : > { %2354 = vtanh.f32 %v1394_v42 }
 0x4b3   : > { %v2355_v43 = vpop.eup %2354 }
 0x4b4   : > { %1606 = vst.msk [vmem:[%s2740_s12 + $0x38] sm:$0xff] %vm410_vm1, %v2355_v43  ;;  %1401 = vst [vmem:[#allocation2 + $0x8] sm:$0xff] %v2355_v43 }
 0x4b5   : > { %1607 = vst.msk [vmem:[%s2742_s13 + $0x18] sm:$0xff] %vm410_vm1, %v2355_v43 }
 0x4b6   : > { %2449 = shalt.err (!%p2446_p9)
}
 0x4b7   : > { %s2450_s12 = scalar_lea.hbm %s3285_s11, 1024  ;;  %s2454_s6 = scalar_lea.hbm %s3379_s4, 2048 }
 0x4b8   : > { %p2451_p12 = scmp.ne.s32.totalorder %s3285_s11, %s2450_s12  ;;  %p2455_p7 = scmp.lt.s32.totalorder %s3285_s11, %s3379_s4 }
 0x4b9   : > { %p2456_p5 = scmp.lt.s32.totalorder %s2454_s6, %s2450_s12 }
 0x4ba   : > { %p2452_p13 = pnand %p2451_p12, %p2695_p3 }
 0x4bb   : > { %p2457_p6 = por %p2456_p5, %p2455_p7 }
 0x4bc   : > { %p2453_p0 = pneg %p2452_p13 }
 0x4be   : > { %p2458_p1 = pnand %p2457_p6, %p2453_p0 }
 0x4c0   : > { %2461 = shalt.err (!%p2458_p1)
}
 0x4c1   : > { %s2561_s16 = smov 128   ;;  %s2562_s30 = smov 8  }
 0x4c2   : > { %2255 = dma.vmem_to_hbm [thread:$0]  (%p2695_p3), %s3289_s27, 1024, %s3285_s11, %s1403_s21, %s2561_s16, %s2561_s16, %s2562_s30  }
 0x4c3   : > { %s1408_s26 = scalar_lea.sflag [#allocation11], %s2725_s9  ;;  %s2462_s28 = scalar_lea.vmem %s3296_s15, 512 }
 0x4c4   : > { %p2463_p4 = scmp.ne.s32.totalorder %s3296_s15, %s2462_s28  ;;  %s2563_s17 = smov [#allocation10]  }
 0x4c5   : > { %s2466_s12 = sshll.u32 %s2563_s17, 4  ;;  %s2467_s12 = int_to_ptr.vmem [resolvable:$false] %s2466_s12 }
 0x4c6   : > { %p2464_p8 = pnand %p2463_p4, %p2695_p3  ;;  %s2468_s13 = scalar_lea.vmem %s2467_s12, 1024 }
 0x4c7   : > { %p2469_p11 = scmp.lt.s32.totalorder %s3296_s15, %s2467_s12  ;;  %p2470_p2 = scmp.lt.s32.totalorder %s2468_s13, %s2462_s28 }
 0x4c8   : > { %p2465_p10 = pneg %p2464_p8 }
 0x4c9   : > { %p2471_p9 = por %p2470_p2, %p2469_p11 }
 0x4cb   : > { %p2472_p12 = pnand %p2471_p9, %p2465_p10 }
 0x4cd   : > { %2475 = shalt.err (!%p2472_p12)
}
 0x4ce   : > { %s2476_s27 = scalar_lea.hbm %s3294_s24, 512  ;;  %s2480_s21 = scalar_lea.hbm %s3380_s5, 1024 }
 0x4cf   : > { %p2477_p13 = scmp.ne.s32.totalorder %s3294_s24, %s2476_s27  ;;  %p2481_p5 = scmp.lt.s32.totalorder %s3294_s24, %s3380_s5 }
 0x4d0   : > { %p2482_p6 = scmp.lt.s32.totalorder %s2480_s21, %s2476_s27 }
 0x4d1   : > { %p2478_p0 = pnand %p2477_p13, %p2695_p3 }
 0x4d2   : > { %p2483_p1 = por %p2482_p6, %p2481_p5 }
 0x4d3   : > { %p2479_p7 = pneg %p2478_p0 }
 0x4d5   : > { %p2484_p4 = pnand %p2483_p1, %p2479_p7 }
 0x4d7   : > { %2487 = shalt.err (!%p2484_p4)
}
 0x4d8   : > { %2256 = dma.vmem_to_hbm [thread:$0]  (%p2695_p3), %s3296_s15, 512, %s3294_s24, %s1408_s26, %s2561_s16, %s2561_s16, %s2562_s30  }
 0x4d9 PF: > { %s1455_s10 = sand.u32 1, %s2530_s18   ;;  %p3395_p8 = scmp.ne.s32.totalorder %s3387_s29, 0 }
 0x4da   : > { %p3396_p10 = scmp.ge.s32.totalorder %s2550_s23, 2  ;;  %s1456_s1 = scalar_lea.sflag [#allocation5], %s1455_s10 }
 0x4dc   : > { %p2271_p11 = pnand %p3396_p10, %p3395_p8 }
 0x4de   : > { %p2272_p2 = pneg %p2271_p11 }
 0x4e0   : > { %2521 = dma.done.wait (%p2272_p2), %s1456_s1, 1024  }
 0x4e1   : > { %2523 = vsyncadd (%p2272_p2), %s1456_s1, 4294966272  ;;  %s1465_s28 = scalar_lea.sflag [#allocation11], %s1455_s10 }
 0x4e2   : > { %2525 = dma.done.wait (%p2272_p2), %s1465_s28, 512  }
 0x4e3   : > { %2527 = vsyncadd (%p2272_p2), %s1465_s28, 4294966784  ;;  %s26_s23 = sadd.s32 1, %s2550_s23   ;;  %s3397_s18 = smov %s2534_s19 }
 0x4e4   : > { %p23_p9 = scmp.ge.s32.totalorder %s26_s23, 4   ;;  %s3398_s19 = smov %s2538_s20 }
 0x4e5   : > { %s3399_s20 = smov %s2704_s14  ;;  %s3400_s21 = smov %s2546_s22 }
 0x4e6   : > { %s3401_s22 = smov %s3403_s25  ;;  %25 = sbr.rel (!%p23_p9) target bundleno = 11 (0xb), region = 125 }
 0x4eb   :  { %1470 = vsyncpa [#allocation4], 1 }
 0x4ec   :  { %1472 = vsyncpa [#allocation4 + $0x1], 1 }
 0x4ed   :  { %1473 = vsyncpa [#allocation7], 1 }
 0x4ee   :  { %1474 = vsyncpa [#allocation5], 1 }
 0x4ef   :  { %1476 = vsyncpa [#allocation5 + $0x1], 1 }
 0x4f0   :  { %1477 = vsyncpa [#allocation11], 1 }
 0x4f1   :  { %1479 = vsyncpa [#allocation11 + $0x1], 1 }

</bundles_post_ra>
